<compile_context>
chip_gen: v6e
topology: v6e:2x2x1
jax: 0.10.0
libtpu: 0.0.40
codegen_flags: <defaults>
</compile_context>

<pallas_src>
import functools

import numpy as np
import jax
import jax.numpy as jnp
from jax import lax
from jax.experimental import pallas as pl
from jax.experimental.pallas import tpu as pltpu

LANE = 128
SUB = 8


def _round_up(x, m):
    return ((x + m - 1) // m) * m


# ----------------------------------------------------------------------------
# Pallas kernel: post-LSTM attention + scoring, one batch BLOCK per grid step.
#
# Packed weights:
#   whcat  (Hp, 4Hp) : [sel_att | num_type_att | col_att | cond_col_att]
#   weccat (Hp, 2Hp) : [sel_out_col | cond_col_out_col]
#   wmid   (4, Hp, Hp): 0=sel_out_K 1=ty_num_out 2=cond_col_out_K 3=cond_col_out_sel
#   wheadT (8, Hp)   : row 0=sel_out, rows 1:6=cond_num_out, row 6=cond_col_out
#   bhead  (1, 8)
# ----------------------------------------------------------------------------
def _selcond_kernel(xlen_ref, clen_ref, gts_ref,
                    h_ref, ec_ref,
                    whcat_ref, bhcat_ref, weccat_ref, beccat_ref,
                    wmid_ref, bmid_ref, wheadt_ref, bhead_ref,
                    cond_num_ref, sel_ref, cond_col_ref,
                    *, t_valid, c_valid):
    f32 = jnp.float32
    NEG = f32(-100.0)

    h = h_ref[...]                       # (Bb, Tp, Hp), compute dtype
    ec = ec_ref[...]                     # (Bb, Cp, Hp)
    cdt = h.dtype
    Bb, Tp, Hp = h.shape
    Cp = ec.shape[1]
    OUTW = sel_ref.shape[-1]             # 128 (lane-dense output width)

    Lx = xlen_ref[...]                   # (Bb, 1) int32
    Lc = clen_ref[...]                   # (Bb, 1) int32
    gt = gts_ref[...]                    # (Bb, 1) int32

    # ---- iotas / masks -----------------------------------------------------
    t_iota = lax.broadcasted_iota(jnp.int32, (1, 1, Tp), 2)
    c_iota_sub = lax.broadcasted_iota(jnp.int32, (1, Cp, 1), 1)
    c_iota_ln3 = lax.broadcasted_iota(jnp.int32, (1, 1, Cp), 2)
    c_iota_ln2 = lax.broadcasted_iota(jnp.int32, (1, Cp), 1)

    x_mask = t_iota >= Lx[:, :, None]            # (Bb, 1, Tp)  True -> -100
    cnum_mask = c_iota_sub >= Lc[:, :, None]     # (Bb, Cp, 1)
    col_mask_ln = c_iota_ln2 >= Lc               # (Bb, Cp)     lane layout
    t_static = (t_iota < t_valid).astype(f32)    # (1, 1, Tp)   excl. T padding
    c_static = c_iota_sub < c_valid              # (1, Cp, 1)   excl. C padding

    def softmax_t(v):                    # softmax over the (padded) time axis
        m = jnp.max(v, axis=-1, keepdims=True)
        e = jnp.exp(v - m) * t_static    # padded time steps contribute exactly 0
        return e * pl.reciprocal(jnp.sum(e, axis=-1, keepdims=True), approx=True)

    def mm(x3, w, b):                    # (Bb,R,K) @ (K,N) + (1,N) -> f32
        bb, r, k = x3.shape
        y = jnp.dot(x3.reshape(bb * r, k).astype(w.dtype), w,
                    preferred_element_type=f32) + b
        return y.reshape(bb, r, w.shape[1])

    def bmm_nt(a, b_):                   # (Bb,M,K) x (Bb,N,K) -> (Bb,M,N) f32
        return jnp.einsum('bmk,bnk->bmn', a.astype(cdt), b_.astype(cdt),
                          preferred_element_type=f32)

    def bmm(a, b_):                      # (Bb,M,K) x (Bb,K,N) -> (Bb,M,N) f32
        return jnp.einsum('bmk,bkn->bmn', a.astype(cdt), b_.astype(cdt),
                          preferred_element_type=f32)

    def lane_pad(x2):                    # (Bb, n) -> (Bb, OUTW) dense store
        padn = OUTW - x2.shape[-1]
        if padn == 0:
            return x2
        zeros = jnp.zeros((x2.shape[0], padn), x2.dtype)
        return jnp.concatenate([x2, zeros], axis=-1)

    # ---- fused projections ---------------------------------------------------
    hp = mm(h, whcat_ref[...], bhcat_ref[...])       # (Bb, Tp, 4Hp)
    h_sel = hp[..., 0:Hp]
    h_nt = hp[..., Hp:2 * Hp]
    h_colatt = hp[..., 2 * Hp:3 * Hp]
    h_ccatt = hp[..., 3 * Hp:4 * Hp]

    ecp = mm(ec, weccat_ref[...], beccat_ref[...])   # (Bb, Cp, 2Hp)
    ec_selcol = ecp[..., 0:Hp]
    ec_cccol = ecp[..., Hp:2 * Hp]

    # ---------------- sel branch ----------------
    sel_val = jnp.where(x_mask, NEG, bmm_nt(ec, h_sel))          # (Bb, Cp, Tp)
    K_sel = bmm(softmax_t(sel_val), h)                           # (Bb, Cp, Hp)
    sel_hidden = jnp.tanh(mm(K_sel, wmid_ref[0], bmid_ref[0:1, :]) + ec_selcol)
    sel_score = (jnp.sum(sel_hidden * wheadt_ref[0:1, :][None], axis=-1)
                 + bhead_ref[0:1, 0:1])                          # (Bb, Cp)
    sel_ref[...] = lane_pad(jnp.where(col_mask_ln, NEG, sel_score))

    # ---------------- cond-num branch ----------------
    nt_val = jnp.where(x_mask, NEG,
                       jnp.where(cnum_mask, NEG, bmm_nt(ec, h_nt)))
    att_nt = softmax_t(nt_val)                                   # (Bb, Cp, Tp)
    att_sum = jnp.sum(jnp.where(c_static, att_nt, 0.0), axis=1, keepdims=True)
    K_nt = bmm(att_sum, h)                                       # (Bb, 1, Hp)
    nt_hidden = jnp.tanh(mm(K_nt, wmid_ref[1], bmid_ref[1:2, :]))
    cond_num = (jnp.sum(nt_hidden * wheadt_ref[...][None], axis=-1)
                + bhead_ref[...])                                # (Bb, 8)
    cond_num_ref[...] = lane_pad(cond_num)                       # cols 1:6 valid

    # ---------------- cond-col branch ----------------
    onehot = (c_iota_ln3 == gt[:, :, None]).astype(f32)          # (Bb, 1, Cp)
    chosen = bmm(onehot, ec)                                     # e_col[gt]
    att_sel = jnp.where(x_mask, NEG, bmm_nt(chosen, h_colatt))   # (Bb, 1, Tp)
    K_agg = bmm(softmax_t(att_sel), h)                           # (Bb, 1, Hp)

    cc_val = jnp.where(x_mask, NEG, bmm_nt(ec, h_ccatt))         # (Bb, Cp, Tp)
    K_cc = bmm(softmax_t(cc_val), h)                             # (Bb, Cp, Hp)
    cc_hidden = (mm(K_cc, wmid_ref[2], bmid_ref[2:3, :]) + ec_cccol
                 + mm(K_agg, wmid_ref[3], bmid_ref[3:4, :]))     # (Bb, Cp, Hp)
    cond_col = (jnp.sum(jnp.maximum(cc_hidden, 0.0)
                        * wheadt_ref[6:7, :][None], axis=-1)
                + bhead_ref[0:1, 6:7])                           # (Bb, Cp)
    cond_col_ref[...] = lane_pad(jnp.where(col_mask_ln, NEG, cond_col))


def selcond_scores_pallas(h_enc, e_col, x_len, col_len, gt_sel,
                          Whh, bhh, Whead, bhead,
                          compute_dtype=jnp.float32):
    """Post-LSTM attention + score heads.  Returns (cond_num, sel, cond_col)."""
    B, T, H = h_enc.shape
    C = e_col.shape[1]
    f32 = jnp.float32
    cdt = compute_dtype

    Hp = _round_up(H, LANE)
    Tp = _round_up(T, SUB)
    Cp = _round_up(C, SUB)

    # Batch blocking: sublane-aligned block, >=2 grid blocks (v7x megacore).
    B_blk = max(SUB, min(64, SUB * pl.cdiv(B, 2 * SUB)))
    grid_b = max(2, pl.cdiv(B, B_blk))
    B_pad = grid_b * B_blk

    def pad(x, shape):
        return jnp.pad(x, [(0, s - d) for d, s in zip(x.shape, shape)])

    h_p = pad(h_enc.astype(f32), (B_pad, Tp, Hp)).astype(cdt)
    ec_p = pad(e_col.astype(f32), (B_pad, Cp, Hp)).astype(cdt)
    xlen_p = pad(x_len.astype(jnp.int32).reshape(B, 1), (B_pad, 1))
    clen_p = pad(col_len.astype(jnp.int32).reshape(B, 1), (B_pad, 1))
    gt_p = pad(gt_sel.astype(jnp.int32).reshape(B, 1), (B_pad, 1))

    Whh_p = pad(Whh.astype(f32), (10, Hp, Hp))
    bhh_p = pad(bhh.astype(f32), (10, Hp))
    # Fused h-projections: [sel_att(0) | num_type_att(1) | col_att(5) | cond_col_att(6)]
    W_h_cat = jnp.concatenate([Whh_p[0], Whh_p[1], Whh_p[5], Whh_p[6]],
                              axis=1).astype(cdt)
    b_h_cat = jnp.concatenate([bhh_p[0], bhh_p[1], bhh_p[5], bhh_p[6]])[None, :]
    # Fused e_col-projections: [sel_out_col(3) | cond_col_out_col(8)]
    W_ec_cat = jnp.concatenate([Whh_p[3], Whh_p[8]], axis=1).astype(cdt)
    b_ec_cat = jnp.concatenate([bhh_p[3], bhh_p[8]])[None, :]
    # Per-branch projections: sel_out_K(2), ty_num_out(4), cond_col_out_K(7),
    # cond_col_out_sel(9)
    W_mid = jnp.stack([Whh_p[2], Whh_p[4], Whh_p[7], Whh_p[9]]).astype(cdt)
    b_mid = jnp.stack([bhh_p[2], bhh_p[4], bhh_p[7], bhh_p[9]])
    # Heads (transposed, biases stay f32): rows 0/1:6/6 = sel/cond_num/cond_col.
    WheadT = pad(Whead.astype(f32), (Hp, 8)).T            # (8, Hp)
    bhead_p = pad(bhead.astype(f32), (1, 8))

    kernel = functools.partial(_selcond_kernel, t_valid=T, c_valid=C)

    in_specs = [
        pl.BlockSpec((B_blk, 1), lambda i: (i, 0)),        # x_len
        pl.BlockSpec((B_blk, 1), lambda i: (i, 0)),        # col_len
        pl.BlockSpec((B_blk, 1), lambda i: (i, 0)),        # gt_sel
        pl.BlockSpec((B_blk, Tp, Hp), lambda i: (i, 0, 0)),
        pl.BlockSpec((B_blk, Cp, Hp), lambda i: (i, 0, 0)),
        pl.BlockSpec((Hp, 4 * Hp), lambda i: (0, 0)),      # weights: block index
        pl.BlockSpec((1, 4 * Hp), lambda i: (0, 0)),       # constant (small, so
        pl.BlockSpec((Hp, 2 * Hp), lambda i: (0, 0)),      # default buffering is
        pl.BlockSpec((1, 2 * Hp), lambda i: (0, 0)),       # fine VMEM-wise)
        pl.BlockSpec((4, Hp, Hp), lambda i: (0, 0, 0)),
        pl.BlockSpec((4, Hp), lambda i: (0, 0)),
        pl.BlockSpec((8, Hp), lambda i: (0, 0)),
        pl.BlockSpec((1, 8), lambda i: (0, 0)),
    ]
    out_specs = [
        pl.BlockSpec((B_blk, LANE), lambda i: (i, 0)),     # cond_num (lane-dense)
        pl.BlockSpec((B_blk, LANE), lambda i: (i, 0)),     # sel
        pl.BlockSpec((B_blk, LANE), lambda i: (i, 0)),     # cond_col
    ]
    out_shape = tuple(jax.ShapeDtypeStruct((B_pad, LANE), f32) for _ in range(3))

    cond_num, sel, cond_col = pl.pallas_call(
        kernel,
        out_shape=out_shape,
        grid=(grid_b,),
        in_specs=in_specs,
        out_specs=out_specs,
        compiler_params=pltpu.CompilerParams(
            dimension_semantics=("parallel",)),
    )(xlen_p, clen_p, gt_p, h_p, ec_p, W_h_cat, b_h_cat, W_ec_cat, b_ec_cat,
      W_mid, b_mid, WheadT, bhead_p)

    return cond_num[:B, 1:6], sel[:B, :C], cond_col[:B, :C]


# ----------------------------------------------------------------------------
# Bidirectional, length-packed LSTM encoders (plain-JAX glue).
# ----------------------------------------------------------------------------
def _lstm_scan(x, Wi, Wh, bi, bh):
    B, T, _ = x.shape
    hid = Wh.shape[1]
    # Hoist the input projection out of the recurrence: one big MXU matmul.
    xw = (x.reshape(B * T, -1) @ Wi.T + (bi + bh)).reshape(B, T, 4 * hid)
    h0 = jnp.zeros((B, hid), x.dtype)
    c0 = jnp.zeros((B, hid), x.dtype)

    def step(carry, xt):
        h, c = carry
        g = xt + h @ Wh.T
        i, f, gg, o = jnp.split(g, 4, axis=-1)
        i = jax.nn.sigmoid(i)
        f = jax.nn.sigmoid(f)
        gg = jnp.tanh(gg)
        o = jax.nn.sigmoid(o)
        c = f * c + i * gg
        h = o * jnp.tanh(c)
        return (h, c), h

    _, hs = lax.scan(step, (h0, c0), jnp.swapaxes(xw, 0, 1))
    return jnp.swapaxes(hs, 0, 1)


def _reverse_within_length(x, lens):
    B, T = x.shape[0], x.shape[1]
    t = jnp.arange(T)[None, :]
    idx = jnp.where(t < lens[:, None], lens[:, None] - 1 - t, t)
    idx = jnp.broadcast_to(idx[:, :, None], x.shape)
    return jnp.take_along_axis(x, idx, axis=1)


def bilstm(x, lens, layers):
    """layers: list of ((Wi,Wh,bi,bh)_fwd, (Wi,Wh,bi,bh)_bwd) per depth."""
    B, T = x.shape[0], x.shape[1]
    mask = (jnp.arange(T)[None, :] < lens[:, None]).astype(x.dtype)[:, :, None]
    out = x
    for fwd, bwd in layers:
        of = _lstm_scan(out, *fwd) * mask
        xr = _reverse_within_length(out, lens)
        ob = _lstm_scan(xr, *bwd)
        ob = _reverse_within_length(ob, lens) * mask
        out = jnp.concatenate([of, ob], axis=-1)
    return out


# ----------------------------------------------------------------------------
# Pure-JAX reference of the post-LSTM math (for validating the kernel).
# ----------------------------------------------------------------------------
def _ref_one(h, ec, Lx, Lc, gt, Whh, bhh, Whead, bhead):
    T = h.shape[0]
    C = ec.shape[0]
    t_idx = jnp.arange(T)[None, :]
    c_idx = jnp.arange(C)[:, None]
    NEG = -100.0

    def lin(x, i):
        return x @ Whh[i] + bhh[i]

    sel_val = jnp.where(t_idx >= Lx, NEG, ec @ lin(h, 0).T)
    sel_att = jax.nn.softmax(sel_val, axis=-1)
    K_sel = sel_att @ h
    sel_score = jnp.tanh(lin(K_sel, 2) + lin(ec, 3)) @ Whead[:, 0:1] + bhead[0, 0]
    sel_score = jnp.where(c_idx >= Lc, NEG, sel_score)[:, 0]

    nt = ec @ lin(h, 1).T
    nt = jnp.where(c_idx >= Lc, NEG, nt)
    nt = jnp.where(t_idx >= Lx, NEG, nt)
    K_nt = (jax.nn.softmax(nt, axis=-1) @ h).sum(0)
    cond_num = jnp.tanh(K_nt @ Whh[4] + bhh[4]) @ Whead[:, 1:6] + bhead[0, 1:6]

    chosen = ec[gt]
    att_sel = jnp.where(jnp.arange(T) >= Lx, NEG, lin(h, 5) @ chosen)
    K_agg = jax.nn.softmax(att_sel) @ h
    cc = jnp.where(t_idx >= Lx, NEG, ec @ lin(h, 6).T)
    K_cc = jax.nn.softmax(cc, axis=-1) @ h
    hidden = lin(K_cc, 7) + lin(ec, 8) + (K_agg @ Whh[9] + bhh[9])[None, :]
    cond_col = (jnp.maximum(hidden, 0.0) @ Whead[:, 6:7] + bhead[0, 6])[:, 0]
    cond_col = jnp.where(jnp.arange(C) >= Lc, NEG, cond_col)
    return cond_num, sel_score, cond_col


# ----------------------------------------------------------------------------
# Deterministic parameter construction.
# ----------------------------------------------------------------------------
def init_lstm(key, in_size, hid, depth):
    layers = []
    for l in range(depth):
        inp = in_size if l == 0 else 2 * hid
        dirs = []
        for _ in range(2):
            key, k1, k2, k3, k4 = jax.random.split(key, 5)
            Wi = jax.random.uniform(k1, (4 * hid, inp), jnp.float32, -0.08, 0.08)
            Wh = jax.random.uniform(k2, (4 * hid, hid), jnp.float32, -0.08, 0.08)
            bi = jax.random.uniform(k3, (4 * hid,), jnp.float32, -0.08, 0.08)
            bh = jax.random.uniform(k4, (4 * hid,), jnp.float32, -0.08, 0.08)
            dirs.append((Wi, Wh, bi, bh))
        layers.append(tuple(dirs))
    return layers, key


if __name__ == "__main__":
    # Small shapes consistent with the module (db_content = 1).
    N_word, N_h, N_depth = 16, 32, 2
    B, T, C = 2, 8, 6
    H = N_h

    key = jax.random.PRNGKey(0)
    key, kx, kt, kc = jax.random.split(key, 4)
    x_emb_var = jax.random.normal(kx, (B, T, N_word), jnp.float32) * 0.5
    x_type_emb_var = jax.random.normal(kt, (B, T, N_word), jnp.float32) * 0.5
    col_inp_var = jax.random.normal(kc, (B, C, N_word), jnp.float32) * 0.5
    x_len = jnp.array([8, 5], jnp.int32)
    col_len = jnp.array([6, 4], jnp.int32)
    gt_sel = jnp.array([1, 2], jnp.int32)

    # Encoders (selcond_lstm: input 2*N_word; selcond_name_enc: input N_word).
    selcond_lstm_params, key = init_lstm(key, 2 * N_word, N_h // 2, N_depth)
    name_enc_params, key = init_lstm(key, N_word, N_h // 2, N_depth)

    # 10 H->H linears + 3 heads (H->1, H->5, H->1); weights stored (in, out).
    key, *wk = jax.random.split(key, 11)
    Whh = jnp.stack([jax.random.uniform(k, (H, H), jnp.float32, -0.1, 0.1)
                     for k in wk])
    key, kb = jax.random.split(key)
    bhh = jax.random.uniform(kb, (10, H), jnp.float32, -0.1, 0.1)
    key, k1, k2, k3, k4 = jax.random.split(key, 5)
    Whead = jnp.concatenate([
        jax.random.uniform(k1, (H, 1), jnp.float32, -0.1, 0.1),   # sel_out
        jax.random.uniform(k2, (H, 5), jnp.float32, -0.1, 0.1),   # cond_num_out
        jax.random.uniform(k3, (H, 1), jnp.float32, -0.1, 0.1),   # cond_col_out
    ], axis=1)
    bhead = jax.random.uniform(k4, (1, 7), jnp.float32, -0.1, 0.1)

    # Forward pass.
    x_emb_concat = jnp.concatenate([x_emb_var, x_type_emb_var], axis=2)
    e_col = bilstm(col_inp_var, col_len, name_enc_params)      # (B, C, H)
    h_enc = bilstm(x_emb_concat, x_len, selcond_lstm_params)   # (B, T, H)

    # f32 run (validated against the pure-JAX reference).
    cond_num_score, sel_score, cond_col_score = selcond_scores_pallas(
        h_enc, e_col, x_len, col_len, gt_sel, Whh, bhh, Whead, bhead)
    jax.block_until_ready((cond_num_score, sel_score, cond_col_score))

    ref_cn, ref_ss, ref_cc = jax.vmap(
        _ref_one, in_axes=(0, 0, 0, 0, 0, None, None, None, None))(
        h_enc, e_col, x_len, col_len, gt_sel, Whh, bhh, Whead, bhead)

    assert cond_num_score.shape == (B, 5)
    assert sel_score.shape == (B, C)
    assert cond_col_score.shape == (B, C)
    # approx-reciprocal softmax => slightly looser than 1e-4 tolerance.
    np.testing.assert_allclose(np.asarray(cond_num_score), np.asarray(ref_cn),
                               rtol=1e-2, atol=1e-2)
    np.testing.assert_allclose(np.asarray(sel_score), np.asarray(ref_ss),
                               rtol=1e-2, atol=1e-2)
    np.testing.assert_allclose(np.asarray(cond_col_score), np.asarray(ref_cc),
                               rtol=1e-2, atol=1e-2)

    # bf16 matmul-input variant (recommended on v6e/v7x); f32 accumulation.
    cn16, ss16, cc16 = selcond_scores_pallas(
        h_enc, e_col, x_len, col_len, gt_sel, Whh, bhh, Whead, bhead,
        compute_dtype=jnp.bfloat16)
    jax.block_until_ready((cn16, ss16, cc16))
    np.testing.assert_allclose(np.asarray(cn16), np.asarray(ref_cn),
                               rtol=5e-2, atol=5e-2)
    np.testing.assert_allclose(np.asarray(ss16), np.asarray(ref_ss),
                               rtol=5e-2, atol=5e-2)
    np.testing.assert_allclose(np.asarray(cc16), np.asarray(ref_cc),
                               rtol=5e-2, atol=5e-2)

    print("KERNEL_OK")
</pallas_src>

<mosaic_0001>
module attributes {stable_mosaic.version = 11 : i64} {
  func.func @_selcond_kernel(%arg0: i32, %arg1: memref<8x1xi32, #tpu.memory_space<vmem>>, %arg2: memref<8x1xi32, #tpu.memory_space<vmem>>, %arg3: memref<8x1xi32, #tpu.memory_space<vmem>>, %arg4: memref<8x8x128xf32, #tpu.memory_space<vmem>>, %arg5: memref<8x8x128xf32, #tpu.memory_space<vmem>>, %arg6: memref<128x512xf32, #tpu.memory_space<vmem>>, %arg7: memref<1x512xf32, #tpu.memory_space<vmem>>, %arg8: memref<128x256xf32, #tpu.memory_space<vmem>>, %arg9: memref<1x256xf32, #tpu.memory_space<vmem>>, %arg10: memref<4x128x128xf32, #tpu.memory_space<vmem>>, %arg11: memref<4x128xf32, #tpu.memory_space<vmem>>, %arg12: memref<8x128xf32, #tpu.memory_space<vmem>>, %arg13: memref<1x8xf32, #tpu.memory_space<vmem>>, %arg14: memref<8x128xf32, #tpu.memory_space<vmem>>, %arg15: memref<8x128xf32, #tpu.memory_space<vmem>>, %arg16: memref<8x128xf32, #tpu.memory_space<vmem>>) attributes {dimension_semantics = [#tpu.dimension_semantics<parallel>], iteration_bounds = array<i64: 2>, scalar_prefetch = 0 : i64, scratch_operands = 0 : i64, tpu.core_type = #tpu.core_type<tc>, window_params = [{transform_indices = @transform_0, window_bounds = array<i64: 8, 1>}, {transform_indices = @transform_1, window_bounds = array<i64: 8, 1>}, {transform_indices = @transform_2, window_bounds = array<i64: 8, 1>}, {transform_indices = @transform_3, window_bounds = array<i64: 8, 8, 128>}, {transform_indices = @transform_4, window_bounds = array<i64: 8, 8, 128>}, {pipeline_mode = #tpu.pipeline_mode<synchronous>, transform_indices = @transform_5, window_bounds = array<i64: 128, 512>}, {pipeline_mode = #tpu.pipeline_mode<synchronous>, transform_indices = @transform_6, window_bounds = array<i64: 1, 512>}, {pipeline_mode = #tpu.pipeline_mode<synchronous>, transform_indices = @transform_7, window_bounds = array<i64: 128, 256>}, {pipeline_mode = #tpu.pipeline_mode<synchronous>, transform_indices = @transform_8, window_bounds = array<i64: 1, 256>}, {pipeline_mode = #tpu.pipeline_mode<synchronous>, transform_indices = @transform_9, window_bounds = array<i64: 4, 128, 128>}, {pipeline_mode = #tpu.pipeline_mode<synchronous>, transform_indices = @transform_10, window_bounds = array<i64: 4, 128>}, {pipeline_mode = #tpu.pipeline_mode<synchronous>, transform_indices = @transform_11, window_bounds = array<i64: 8, 128>}, {pipeline_mode = #tpu.pipeline_mode<synchronous>, transform_indices = @transform_12, window_bounds = array<i64: 1, 8>}, {transform_indices = @transform_13, window_bounds = array<i64: 8, 128>}, {transform_indices = @transform_14, window_bounds = array<i64: 8, 128>}, {transform_indices = @transform_15, window_bounds = array<i64: 8, 128>}]} {
    %c0 = arith.constant 0 : index
    %c0_0 = arith.constant 0 : index
    %c0_1 = arith.constant 0 : index
    %0 = vector.load %arg4[%c0, %c0_0, %c0_1] : memref<8x8x128xf32, #tpu.memory_space<vmem>>, vector<8x8x128xf32>
    %c0_2 = arith.constant 0 : index
    %c0_3 = arith.constant 0 : index
    %c0_4 = arith.constant 0 : index
    %1 = vector.load %arg5[%c0_2, %c0_3, %c0_4] : memref<8x8x128xf32, #tpu.memory_space<vmem>>, vector<8x8x128xf32>
    %c0_5 = arith.constant 0 : index
    %c0_6 = arith.constant 0 : index
    %2 = vector.load %arg1[%c0_5, %c0_6] : memref<8x1xi32, #tpu.memory_space<vmem>>, vector<8x1xi32>
    %c0_7 = arith.constant 0 : index
    %c0_8 = arith.constant 0 : index
    %3 = vector.load %arg2[%c0_7, %c0_8] : memref<8x1xi32, #tpu.memory_space<vmem>>, vector<8x1xi32>
    %c0_9 = arith.constant 0 : index
    %c0_10 = arith.constant 0 : index
    %4 = vector.load %arg3[%c0_9, %c0_10] : memref<8x1xi32, #tpu.memory_space<vmem>>, vector<8x1xi32>
    %5 = tpu.iota {dimensions = array<i32: 2>} : vector<1x1x8xi32>
    %6 = tpu.iota {dimensions = array<i32: 1>} : vector<1x8x1xi32>
    %7 = tpu.iota {dimensions = array<i32: 2>} : vector<1x1x8xi32>
    %8 = tpu.iota {dimensions = array<i32: 1>} : vector<1x8xi32>
    %9 = vector.shape_cast %2 : vector<8x1xi32> to vector<8x1x1xi32>
    %10 = vector.broadcast %5 : vector<1x1x8xi32> to vector<8x1x8xi32>
    %11 = vector.broadcast %9 : vector<8x1x1xi32> to vector<8x1x8xi32>
    %12 = arith.cmpi sge, %10, %11 : vector<8x1x8xi32>
    %13 = vector.shape_cast %3 : vector<8x1xi32> to vector<8x1x1xi32>
    %14 = vector.broadcast %6 : vector<1x8x1xi32> to vector<8x8x1xi32>
    %15 = vector.broadcast %13 : vector<8x1x1xi32> to vector<8x8x1xi32>
    %16 = arith.cmpi sge, %14, %15 : vector<8x8x1xi32>
    %17 = vector.broadcast %8 : vector<1x8xi32> to vector<8x8xi32>
    %18 = vector.broadcast %3 : vector<8x1xi32> to vector<8x8xi32>
    %19 = arith.cmpi sge, %17, %18 : vector<8x8xi32>
    %c8_i32 = arith.constant 8 : i32
    %20 = vector.broadcast %c8_i32 : i32 to vector<1x1x8xi32>
    %21 = arith.cmpi slt, %5, %20 : vector<1x1x8xi32>
    %22 = arith.extui %21 : vector<1x1x8xi1> to vector<1x1x8xi32>
    %23 = arith.sitofp %22 : vector<1x1x8xi32> to vector<1x1x8xf32>
    %c6_i32 = arith.constant 6 : i32
    %24 = vector.broadcast %c6_i32 : i32 to vector<1x8x1xi32>
    %25 = arith.cmpi slt, %6, %24 : vector<1x8x1xi32>
    %c0_11 = arith.constant 0 : index
    %c0_12 = arith.constant 0 : index
    %26 = vector.load %arg6[%c0_11, %c0_12] : memref<128x512xf32, #tpu.memory_space<vmem>>, vector<128x512xf32>
    %c0_13 = arith.constant 0 : index
    %c0_14 = arith.constant 0 : index
    %27 = vector.load %arg7[%c0_13, %c0_14] : memref<1x512xf32, #tpu.memory_space<vmem>>, vector<1x512xf32>
    %28 = vector.shape_cast %0 : vector<8x8x128xf32> to vector<64x128xf32>
    %cst = arith.constant dense<0.000000e+00> : vector<64x512xf32>
    %29 = tpu.matmul %28, %26, %cst {dimension_numbers = #tpu.dot_dimension_numbers<[1], [0], [0], [1], [0, 0, 1, 1], [], []>} : vector<64x128xf32>, vector<128x512xf32>, vector<64x512xf32> -> vector<64x512xf32>
    %30 = vector.broadcast %27 : vector<1x512xf32> to vector<64x512xf32>
    %31 = arith.addf %29, %30 : vector<64x512xf32>
    %32 = vector.shape_cast %31 : vector<64x512xf32> to vector<8x8x512xf32>
    %33 = vector.extract_strided_slice %32 {offsets = [0, 0, 0], sizes = [8, 8, 128], strides = [1, 1, 1]} : vector<8x8x512xf32> to vector<8x8x128xf32>
    %34 = vector.extract_strided_slice %32 {offsets = [0, 0, 128], sizes = [8, 8, 128], strides = [1, 1, 1]} : vector<8x8x512xf32> to vector<8x8x128xf32>
    %35 = vector.extract_strided_slice %32 {offsets = [0, 0, 256], sizes = [8, 8, 128], strides = [1, 1, 1]} : vector<8x8x512xf32> to vector<8x8x128xf32>
    %36 = vector.extract_strided_slice %32 {offsets = [0, 0, 384], sizes = [8, 8, 128], strides = [1, 1, 1]} : vector<8x8x512xf32> to vector<8x8x128xf32>
    %c0_15 = arith.constant 0 : index
    %c0_16 = arith.constant 0 : index
    %37 = vector.load %arg8[%c0_15, %c0_16] : memref<128x256xf32, #tpu.memory_space<vmem>>, vector<128x256xf32>
    %c0_17 = arith.constant 0 : index
    %c0_18 = arith.constant 0 : index
    %38 = vector.load %arg9[%c0_17, %c0_18] : memref<1x256xf32, #tpu.memory_space<vmem>>, vector<1x256xf32>
    %39 = vector.shape_cast %1 : vector<8x8x128xf32> to vector<64x128xf32>
    %cst_19 = arith.constant dense<0.000000e+00> : vector<64x256xf32>
    %40 = tpu.matmul %39, %37, %cst_19 {dimension_numbers = #tpu.dot_dimension_numbers<[1], [0], [0], [1], [0, 0, 1, 1], [], []>} : vector<64x128xf32>, vector<128x256xf32>, vector<64x256xf32> -> vector<64x256xf32>
    %41 = vector.broadcast %38 : vector<1x256xf32> to vector<64x256xf32>
    %42 = arith.addf %40, %41 : vector<64x256xf32>
    %43 = vector.shape_cast %42 : vector<64x256xf32> to vector<8x8x256xf32>
    %44 = vector.extract_strided_slice %43 {offsets = [0, 0, 0], sizes = [8, 8, 128], strides = [1, 1, 1]} : vector<8x8x256xf32> to vector<8x8x128xf32>
    %45 = vector.extract_strided_slice %43 {offsets = [0, 0, 128], sizes = [8, 8, 128], strides = [1, 1, 1]} : vector<8x8x256xf32> to vector<8x8x128xf32>
    "tpu.trace_start"() <{level = 10 : i32, message = "bmk,bnk->bmn"}> : () -> ()
    %cst_20 = arith.constant dense<0.000000e+00> : vector<8x8x8xf32>
    %46 = tpu.matmul %1, %33, %cst_20 {dimension_numbers = #tpu.dot_dimension_numbers<[2], [2], [1], [1], [0, 0, 0, 1, 1, 1], [0], [0]>} : vector<8x8x128xf32>, vector<8x8x128xf32>, vector<8x8x8xf32> -> vector<8x8x8xf32>
    %cst_21 = arith.constant -1.000000e+02 : f32
    "tpu.trace_stop"() : () -> ()
    %47 = vector.shape_cast %12 : vector<8x1x8xi1> to vector<8x1x8xi1>
    %48 = vector.broadcast %47 : vector<8x1x8xi1> to vector<8x8x8xi1>
    %49 = vector.broadcast %cst_21 : f32 to vector<8x8x8xf32>
    %50 = arith.select %48, %49, %46 : vector<8x8x8xi1>, vector<8x8x8xf32>
    %cst_22 = arith.constant dense<0xFF800000> : vector<8x8xf32>
    %51 = vector.multi_reduction <maximumf>, %50, %cst_22 [2] : vector<8x8x8xf32> to vector<8x8xf32>
    %52 = vector.shape_cast %51 : vector<8x8xf32> to vector<8x8x1xf32>
    %53 = vector.broadcast %52 : vector<8x8x1xf32> to vector<8x8x8xf32>
    %54 = arith.subf %50, %53 : vector<8x8x8xf32>
    %55 = math.exp %54 : vector<8x8x8xf32>
    %56 = vector.broadcast %23 : vector<1x1x8xf32> to vector<8x8x8xf32>
    %57 = arith.mulf %55, %56 : vector<8x8x8xf32>
    %cst_23 = arith.constant dense<0.000000e+00> : vector<8x8xf32>
    %58 = vector.multi_reduction <add>, %57, %cst_23 [2] : vector<8x8x8xf32> to vector<8x8xf32>
    %59 = vector.shape_cast %58 : vector<8x8xf32> to vector<8x8x1xf32>
    %60 = tpu.reciprocal %59 {approx = true} : vector<8x8x1xf32> -> vector<8x8x1xf32>
    %61 = vector.broadcast %60 : vector<8x8x1xf32> to vector<8x8x8xf32>
    %62 = arith.mulf %57, %61 : vector<8x8x8xf32>
    "tpu.trace_start"() <{level = 10 : i32, message = "bmk,bkn->bmn"}> : () -> ()
    %cst_24 = arith.constant dense<0.000000e+00> : vector<8x8x128xf32>
    %63 = tpu.matmul %62, %0, %cst_24 {dimension_numbers = #tpu.dot_dimension_numbers<[2], [1], [1], [2], [0, 0, 0, 1, 1, 2], [0], [0]>} : vector<8x8x8xf32>, vector<8x8x128xf32>, vector<8x8x128xf32> -> vector<8x8x128xf32>
    "tpu.trace_stop"() : () -> ()
    %c0_25 = arith.constant 0 : index
    %c0_26 = arith.constant 0 : index
    %c0_27 = arith.constant 0 : index
    %64 = vector.load %arg10[%c0_25, %c0_26, %c0_27] : memref<4x128x128xf32, #tpu.memory_space<vmem>>, vector<1x128x128xf32>
    %65 = vector.shape_cast %64 : vector<1x128x128xf32> to vector<128x128xf32>
    %c0_28 = arith.constant 0 : index
    %c0_29 = arith.constant 0 : index
    %66 = vector.load %arg11[%c0_28, %c0_29] : memref<4x128xf32, #tpu.memory_space<vmem>>, vector<1x128xf32>
    %67 = vector.shape_cast %63 : vector<8x8x128xf32> to vector<64x128xf32>
    %cst_30 = arith.constant dense<0.000000e+00> : vector<64x128xf32>
    %68 = tpu.matmul %67, %65, %cst_30 {dimension_numbers = #tpu.dot_dimension_numbers<[1], [0], [0], [1], [0, 0, 1, 1], [], []>} : vector<64x128xf32>, vector<128x128xf32>, vector<64x128xf32> -> vector<64x128xf32>
    %69 = vector.broadcast %66 : vector<1x128xf32> to vector<64x128xf32>
    %70 = arith.addf %68, %69 : vector<64x128xf32>
    %71 = vector.shape_cast %70 : vector<64x128xf32> to vector<8x8x128xf32>
    %72 = arith.addf %71, %44 : vector<8x8x128xf32>
    %73 = math.tanh %72 : vector<8x8x128xf32>
    %c0_31 = arith.constant 0 : index
    %c0_32 = arith.constant 0 : index
    %74 = vector.load %arg12[%c0_31, %c0_32] : memref<8x128xf32, #tpu.memory_space<vmem>>, vector<1x128xf32>
    %75 = vector.shape_cast %74 : vector<1x128xf32> to vector<1x1x128xf32>
    %76 = vector.broadcast %75 : vector<1x1x128xf32> to vector<8x8x128xf32>
    %77 = arith.mulf %73, %76 : vector<8x8x128xf32>
    %cst_33 = arith.constant dense<0.000000e+00> : vector<8x8xf32>
    %78 = vector.multi_reduction <add>, %77, %cst_33 [2] : vector<8x8x128xf32> to vector<8x8xf32>
    %c0_34 = arith.constant 0 : index
    %c0_35 = arith.constant 0 : index
    %79 = vector.load %arg13[%c0_34, %c0_35] : memref<1x8xf32, #tpu.memory_space<vmem>>, vector<1x1xf32>
    %80 = vector.broadcast %79 : vector<1x1xf32> to vector<8x8xf32>
    %81 = arith.addf %78, %80 : vector<8x8xf32>
    %cst_36 = arith.constant -1.000000e+02 : f32
    %82 = vector.broadcast %cst_36 : f32 to vector<8x8xf32>
    %83 = arith.select %19, %82, %81 : vector<8x8xi1>, vector<8x8xf32>
    %cst_37 = arith.constant 0.000000e+00 : f32
    %84 = vector.broadcast %cst_37 : f32 to vector<8x120xf32>
    %85 = tpu.concatenate %83, %84 in 1 : vector<8x8xf32>, vector<8x120xf32> -> vector<8x128xf32>
    %c0_38 = arith.constant 0 : index
    %c0_39 = arith.constant 0 : index
    %86 = vector.load %arg15[%c0_38, %c0_39] : memref<8x128xf32, #tpu.memory_space<vmem>>, vector<8x128xf32>
    tpu.vector_store %arg15[%c0_38, %c0_39], %85 {strides = array<i32>} : memref<8x128xf32, #tpu.memory_space<vmem>>, vector<8x128xf32>,
    "tpu.trace_start"() <{level = 10 : i32, message = "bmk,bnk->bmn"}> : () -> ()
    %cst_40 = arith.constant dense<0.000000e+00> : vector<8x8x8xf32>
    %87 = tpu.matmul %1, %34, %cst_40 {dimension_numbers = #tpu.dot_dimension_numbers<[2], [2], [1], [1], [0, 0, 0, 1, 1, 1], [0], [0]>} : vector<8x8x128xf32>, vector<8x8x128xf32>, vector<8x8x8xf32> -> vector<8x8x8xf32>
    %cst_41 = arith.constant -1.000000e+02 : f32
    "tpu.trace_stop"() : () -> ()
    %88 = vector.shape_cast %16 : vector<8x8x1xi1> to vector<8x8x1xi1>
    %89 = vector.broadcast %88 : vector<8x8x1xi1> to vector<8x8x8xi1>
    %90 = vector.broadcast %cst_41 : f32 to vector<8x8x8xf32>
    %91 = arith.select %89, %90, %87 : vector<8x8x8xi1>, vector<8x8x8xf32>
    %cst_42 = arith.constant -1.000000e+02 : f32
    %92 = vector.shape_cast %12 : vector<8x1x8xi1> to vector<8x1x8xi1>
    %93 = vector.broadcast %92 : vector<8x1x8xi1> to vector<8x8x8xi1>
    %94 = vector.broadcast %cst_42 : f32 to vector<8x8x8xf32>
    %95 = arith.select %93, %94, %91 : vector<8x8x8xi1>, vector<8x8x8xf32>
    %cst_43 = arith.constant dense<0xFF800000> : vector<8x8xf32>
    %96 = vector.multi_reduction <maximumf>, %95, %cst_43 [2] : vector<8x8x8xf32> to vector<8x8xf32>
    %97 = vector.shape_cast %96 : vector<8x8xf32> to vector<8x8x1xf32>
    %98 = vector.broadcast %97 : vector<8x8x1xf32> to vector<8x8x8xf32>
    %99 = arith.subf %95, %98 : vector<8x8x8xf32>
    %100 = math.exp %99 : vector<8x8x8xf32>
    %101 = vector.broadcast %23 : vector<1x1x8xf32> to vector<8x8x8xf32>
    %102 = arith.mulf %100, %101 : vector<8x8x8xf32>
    %cst_44 = arith.constant dense<0.000000e+00> : vector<8x8xf32>
    %103 = vector.multi_reduction <add>, %102, %cst_44 [2] : vector<8x8x8xf32> to vector<8x8xf32>
    %104 = vector.shape_cast %103 : vector<8x8xf32> to vector<8x8x1xf32>
    %105 = tpu.reciprocal %104 {approx = true} : vector<8x8x1xf32> -> vector<8x8x1xf32>
    %106 = vector.broadcast %105 : vector<8x8x1xf32> to vector<8x8x8xf32>
    %107 = arith.mulf %102, %106 : vector<8x8x8xf32>
    %cst_45 = arith.constant 0.000000e+00 : f32
    %108 = vector.shape_cast %25 : vector<1x8x1xi1> to vector<1x8x1xi1>
    %109 = vector.broadcast %108 : vector<1x8x1xi1> to vector<8x8x8xi1>
    %110 = vector.broadcast %cst_45 : f32 to vector<8x8x8xf32>
    %111 = arith.select %109, %107, %110 : vector<8x8x8xi1>, vector<8x8x8xf32>
    %cst_46 = arith.constant dense<0.000000e+00> : vector<8x8xf32>
    %112 = vector.multi_reduction <add>, %111, %cst_46 [1] : vector<8x8x8xf32> to vector<8x8xf32>
    %113 = vector.shape_cast %112 : vector<8x8xf32> to vector<8x1x8xf32>
    "tpu.trace_start"() <{level = 10 : i32, message = "bmk,bkn->bmn"}> : () -> ()
    %cst_47 = arith.constant dense<0.000000e+00> : vector<8x1x128xf32>
    %114 = tpu.matmul %113, %0, %cst_47 {dimension_numbers = #tpu.dot_dimension_numbers<[2], [1], [1], [2], [0, 0, 0, 1, 1, 2], [0], [0]>} : vector<8x1x8xf32>, vector<8x8x128xf32>, vector<8x1x128xf32> -> vector<8x1x128xf32>
    "tpu.trace_stop"() : () -> ()
    %c1 = arith.constant 1 : index
    %c0_48 = arith.constant 0 : index
    %c0_49 = arith.constant 0 : index
    %115 = vector.load %arg10[%c1, %c0_48, %c0_49] : memref<4x128x128xf32, #tpu.memory_space<vmem>>, vector<1x128x128xf32>
    %116 = vector.shape_cast %115 : vector<1x128x128xf32> to vector<128x128xf32>
    %c1_50 = arith.constant 1 : index
    %c0_51 = arith.constant 0 : index
    %117 = vector.load %arg11[%c1_50, %c0_51] : memref<4x128xf32, #tpu.memory_space<vmem>>, vector<1x128xf32>
    %118 = vector.shape_cast %114 : vector<8x1x128xf32> to vector<8x128xf32>
    %cst_52 = arith.constant dense<0.000000e+00> : vector<8x128xf32>
    %119 = tpu.matmul %118, %116, %cst_52 {dimension_numbers = #tpu.dot_dimension_numbers<[1], [0], [0], [1], [0, 0, 1, 1], [], []>} : vector<8x128xf32>, vector<128x128xf32>, vector<8x128xf32> -> vector<8x128xf32>
    %120 = vector.broadcast %117 : vector<1x128xf32> to vector<8x128xf32>
    %121 = arith.addf %119, %120 : vector<8x128xf32>
    %122 = vector.shape_cast %121 : vector<8x128xf32> to vector<8x1x128xf32>
    %123 = math.tanh %122 : vector<8x1x128xf32>
    %c0_53 = arith.constant 0 : index
    %c0_54 = arith.constant 0 : index
    %124 = vector.load %arg12[%c0_53, %c0_54] : memref<8x128xf32, #tpu.memory_space<vmem>>, vector<8x128xf32>
    %125 = vector.shape_cast %124 : vector<8x128xf32> to vector<1x8x128xf32>
    %126 = vector.broadcast %123 : vector<8x1x128xf32> to vector<8x8x128xf32>
    %127 = vector.broadcast %125 : vector<1x8x128xf32> to vector<8x8x128xf32>
    %128 = arith.mulf %126, %127 : vector<8x8x128xf32>
    %cst_55 = arith.constant dense<0.000000e+00> : vector<8x8xf32>
    %129 = vector.multi_reduction <add>, %128, %cst_55 [2] : vector<8x8x128xf32> to vector<8x8xf32>
    %c0_56 = arith.constant 0 : index
    %c0_57 = arith.constant 0 : index
    %130 = vector.load %arg13[%c0_56, %c0_57] : memref<1x8xf32, #tpu.memory_space<vmem>>, vector<1x8xf32>
    %131 = vector.broadcast %130 : vector<1x8xf32> to vector<8x8xf32>
    %132 = arith.addf %129, %131 : vector<8x8xf32>
    %cst_58 = arith.constant 0.000000e+00 : f32
    %133 = vector.broadcast %cst_58 : f32 to vector<8x120xf32>
    %134 = tpu.concatenate %132, %133 in 1 : vector<8x8xf32>, vector<8x120xf32> -> vector<8x128xf32>
    %c0_59 = arith.constant 0 : index
    %c0_60 = arith.constant 0 : index
    %135 = vector.load %arg14[%c0_59, %c0_60] : memref<8x128xf32, #tpu.memory_space<vmem>>, vector<8x128xf32>
    tpu.vector_store %arg14[%c0_59, %c0_60], %134 {strides = array<i32>} : memref<8x128xf32, #tpu.memory_space<vmem>>, vector<8x128xf32>,
    %136 = vector.shape_cast %4 : vector<8x1xi32> to vector<8x1x1xi32>
    %137 = vector.broadcast %7 : vector<1x1x8xi32> to vector<8x1x8xi32>
    %138 = vector.broadcast %136 : vector<8x1x1xi32> to vector<8x1x8xi32>
    %139 = arith.cmpi eq, %137, %138 : vector<8x1x8xi32>
    %140 = arith.extui %139 : vector<8x1x8xi1> to vector<8x1x8xi32>
    %141 = arith.sitofp %140 : vector<8x1x8xi32> to vector<8x1x8xf32>
    "tpu.trace_start"() <{level = 10 : i32, message = "bmk,bkn->bmn"}> : () -> ()
    %cst_61 = arith.constant dense<0.000000e+00> : vector<8x1x128xf32>
    %142 = tpu.matmul %141, %1, %cst_61 {dimension_numbers = #tpu.dot_dimension_numbers<[2], [1], [1], [2], [0, 0, 0, 1, 1, 2], [0], [0]>} : vector<8x1x8xf32>, vector<8x8x128xf32>, vector<8x1x128xf32> -> vector<8x1x128xf32>
    "tpu.trace_stop"() : () -> ()
    "tpu.trace_start"() <{level = 10 : i32, message = "bmk,bnk->bmn"}> : () -> ()
    %cst_62 = arith.constant dense<0.000000e+00> : vector<8x1x8xf32>
    %143 = tpu.matmul %142, %35, %cst_62 {dimension_numbers = #tpu.dot_dimension_numbers<[2], [2], [1], [1], [0, 0, 0, 1, 1, 1], [0], [0]>} : vector<8x1x128xf32>, vector<8x8x128xf32>, vector<8x1x8xf32> -> vector<8x1x8xf32>
    %cst_63 = arith.constant -1.000000e+02 : f32
    "tpu.trace_stop"() : () -> ()
    %144 = vector.broadcast %cst_63 : f32 to vector<8x1x8xf32>
    %145 = arith.select %12, %144, %143 : vector<8x1x8xi1>, vector<8x1x8xf32>
    %cst_64 = arith.constant dense<0xFF800000> : vector<8x1xf32>
    %146 = vector.multi_reduction <maximumf>, %145, %cst_64 [2] : vector<8x1x8xf32> to vector<8x1xf32>
    %147 = vector.shape_cast %146 : vector<8x1xf32> to vector<8x1x1xf32>
    %148 = vector.broadcast %147 : vector<8x1x1xf32> to vector<8x1x8xf32>
    %149 = arith.subf %145, %148 : vector<8x1x8xf32>
    %150 = math.exp %149 : vector<8x1x8xf32>
    %151 = vector.broadcast %23 : vector<1x1x8xf32> to vector<8x1x8xf32>
    %152 = arith.mulf %150, %151 : vector<8x1x8xf32>
    %cst_65 = arith.constant dense<0.000000e+00> : vector<8x1xf32>
    %153 = vector.multi_reduction <add>, %152, %cst_65 [2] : vector<8x1x8xf32> to vector<8x1xf32>
    %154 = vector.shape_cast %153 : vector<8x1xf32> to vector<8x1x1xf32>
    %155 = tpu.reciprocal %154 {approx = true} : vector<8x1x1xf32> -> vector<8x1x1xf32>
    %156 = vector.broadcast %155 : vector<8x1x1xf32> to vector<8x1x8xf32>
    %157 = arith.mulf %152, %156 : vector<8x1x8xf32>
    "tpu.trace_start"() <{level = 10 : i32, message = "bmk,bkn->bmn"}> : () -> ()
    %cst_66 = arith.constant dense<0.000000e+00> : vector<8x1x128xf32>
    %158 = tpu.matmul %157, %0, %cst_66 {dimension_numbers = #tpu.dot_dimension_numbers<[2], [1], [1], [2], [0, 0, 0, 1, 1, 2], [0], [0]>} : vector<8x1x8xf32>, vector<8x8x128xf32>, vector<8x1x128xf32> -> vector<8x1x128xf32>
    "tpu.trace_stop"() : () -> ()
    "tpu.trace_start"() <{level = 10 : i32, message = "bmk,bnk->bmn"}> : () -> ()
    %cst_67 = arith.constant dense<0.000000e+00> : vector<8x8x8xf32>
    %159 = tpu.matmul %1, %36, %cst_67 {dimension_numbers = #tpu.dot_dimension_numbers<[2], [2], [1], [1], [0, 0, 0, 1, 1, 1], [0], [0]>} : vector<8x8x128xf32>, vector<8x8x128xf32>, vector<8x8x8xf32> -> vector<8x8x8xf32>
    %cst_68 = arith.constant -1.000000e+02 : f32
    "tpu.trace_stop"() : () -> ()
    %160 = vector.shape_cast %12 : vector<8x1x8xi1> to vector<8x1x8xi1>
    %161 = vector.broadcast %160 : vector<8x1x8xi1> to vector<8x8x8xi1>
    %162 = vector.broadcast %cst_68 : f32 to vector<8x8x8xf32>
    %163 = arith.select %161, %162, %159 : vector<8x8x8xi1>, vector<8x8x8xf32>
    %cst_69 = arith.constant dense<0xFF800000> : vector<8x8xf32>
    %164 = vector.multi_reduction <maximumf>, %163, %cst_69 [2] : vector<8x8x8xf32> to vector<8x8xf32>
    %165 = vector.shape_cast %164 : vector<8x8xf32> to vector<8x8x1xf32>
    %166 = vector.broadcast %165 : vector<8x8x1xf32> to vector<8x8x8xf32>
    %167 = arith.subf %163, %166 : vector<8x8x8xf32>
    %168 = math.exp %167 : vector<8x8x8xf32>
    %169 = vector.broadcast %23 : vector<1x1x8xf32> to vector<8x8x8xf32>
    %170 = arith.mulf %168, %169 : vector<8x8x8xf32>
    %cst_70 = arith.constant dense<0.000000e+00> : vector<8x8xf32>
    %171 = vector.multi_reduction <add>, %170, %cst_70 [2] : vector<8x8x8xf32> to vector<8x8xf32>
    %172 = vector.shape_cast %171 : vector<8x8xf32> to vector<8x8x1xf32>
    %173 = tpu.reciprocal %172 {approx = true} : vector<8x8x1xf32> -> vector<8x8x1xf32>
    %174 = vector.broadcast %173 : vector<8x8x1xf32> to vector<8x8x8xf32>
    %175 = arith.mulf %170, %174 : vector<8x8x8xf32>
    "tpu.trace_start"() <{level = 10 : i32, message = "bmk,bkn->bmn"}> : () -> ()
    %cst_71 = arith.constant dense<0.000000e+00> : vector<8x8x128xf32>
    %176 = tpu.matmul %175, %0, %cst_71 {dimension_numbers = #tpu.dot_dimension_numbers<[2], [1], [1], [2], [0, 0, 0, 1, 1, 2], [0], [0]>} : vector<8x8x8xf32>, vector<8x8x128xf32>, vector<8x8x128xf32> -> vector<8x8x128xf32>
    "tpu.trace_stop"() : () -> ()
    %c2 = arith.constant 2 : index
    %c0_72 = arith.constant 0 : index
    %c0_73 = arith.constant 0 : index
    %177 = vector.load %arg10[%c2, %c0_72, %c0_73] : memref<4x128x128xf32, #tpu.memory_space<vmem>>, vector<1x128x128xf32>
    %178 = vector.shape_cast %177 : vector<1x128x128xf32> to vector<128x128xf32>
    %c2_74 = arith.constant 2 : index
    %c0_75 = arith.constant 0 : index
    %179 = vector.load %arg11[%c2_74, %c0_75] : memref<4x128xf32, #tpu.memory_space<vmem>>, vector<1x128xf32>
    %180 = vector.shape_cast %176 : vector<8x8x128xf32> to vector<64x128xf32>
    %cst_76 = arith.constant dense<0.000000e+00> : vector<64x128xf32>
    %181 = tpu.matmul %180, %178, %cst_76 {dimension_numbers = #tpu.dot_dimension_numbers<[1], [0], [0], [1], [0, 0, 1, 1], [], []>} : vector<64x128xf32>, vector<128x128xf32>, vector<64x128xf32> -> vector<64x128xf32>
    %182 = vector.broadcast %179 : vector<1x128xf32> to vector<64x128xf32>
    %183 = arith.addf %181, %182 : vector<64x128xf32>
    %184 = vector.shape_cast %183 : vector<64x128xf32> to vector<8x8x128xf32>
    %185 = arith.addf %184, %45 : vector<8x8x128xf32>
    %c3 = arith.constant 3 : index
    %c0_77 = arith.constant 0 : index
    %c0_78 = arith.constant 0 : index
    %186 = vector.load %arg10[%c3, %c0_77, %c0_78] : memref<4x128x128xf32, #tpu.memory_space<vmem>>, vector<1x128x128xf32>
    %187 = vector.shape_cast %186 : vector<1x128x128xf32> to vector<128x128xf32>
    %c3_79 = arith.constant 3 : index
    %c0_80 = arith.constant 0 : index
    %188 = vector.load %arg11[%c3_79, %c0_80] : memref<4x128xf32, #tpu.memory_space<vmem>>, vector<1x128xf32>
    %189 = vector.shape_cast %158 : vector<8x1x128xf32> to vector<8x128xf32>
    %cst_81 = arith.constant dense<0.000000e+00> : vector<8x128xf32>
    %190 = tpu.matmul %189, %187, %cst_81 {dimension_numbers = #tpu.dot_dimension_numbers<[1], [0], [0], [1], [0, 0, 1, 1], [], []>} : vector<8x128xf32>, vector<128x128xf32>, vector<8x128xf32> -> vector<8x128xf32>
    %191 = vector.broadcast %188 : vector<1x128xf32> to vector<8x128xf32>
    %192 = arith.addf %190, %191 : vector<8x128xf32>
    %193 = vector.shape_cast %192 : vector<8x128xf32> to vector<8x1x128xf32>
    %194 = vector.broadcast %193 : vector<8x1x128xf32> to vector<8x8x128xf32>
    %195 = arith.addf %185, %194 : vector<8x8x128xf32>
    %cst_82 = arith.constant 0.000000e+00 : f32
    %196 = vector.broadcast %cst_82 : f32 to vector<8x8x128xf32>
    %197 = arith.maximumf %195, %196 : vector<8x8x128xf32>
    %c6 = arith.constant 6 : index
    %c0_83 = arith.constant 0 : index
    %198 = vector.load %arg12[%c6, %c0_83] : memref<8x128xf32, #tpu.memory_space<vmem>>, vector<1x128xf32>
    %199 = vector.shape_cast %198 : vector<1x128xf32> to vector<1x1x128xf32>
    %200 = vector.broadcast %199 : vector<1x1x128xf32> to vector<8x8x128xf32>
    %201 = arith.mulf %197, %200 : vector<8x8x128xf32>
    %cst_84 = arith.constant dense<0.000000e+00> : vector<8x8xf32>
    %202 = vector.multi_reduction <add>, %201, %cst_84 [2] : vector<8x8x128xf32> to vector<8x8xf32>
    %c0_85 = arith.constant 0 : index
    %c6_86 = arith.constant 6 : index
    %203 = vector.load %arg13[%c0_85, %c6_86] : memref<1x8xf32, #tpu.memory_space<vmem>>, vector<1x1xf32>
    %204 = vector.broadcast %203 : vector<1x1xf32> to vector<8x8xf32>
    %205 = arith.addf %202, %204 : vector<8x8xf32>
    %cst_87 = arith.constant -1.000000e+02 : f32
    %206 = vector.broadcast %cst_87 : f32 to vector<8x8xf32>
    %207 = arith.select %19, %206, %205 : vector<8x8xi1>, vector<8x8xf32>
    %cst_88 = arith.constant 0.000000e+00 : f32
    %208 = vector.broadcast %cst_88 : f32 to vector<8x120xf32>
    %209 = tpu.concatenate %207, %208 in 1 : vector<8x8xf32>, vector<8x120xf32> -> vector<8x128xf32>
    %c0_89 = arith.constant 0 : index
    %c0_90 = arith.constant 0 : index
    %210 = vector.load %arg16[%c0_89, %c0_90] : memref<8x128xf32, #tpu.memory_space<vmem>>, vector<8x128xf32>
    tpu.vector_store %arg16[%c0_89, %c0_90], %209 {strides = array<i32>} : memref<8x128xf32, #tpu.memory_space<vmem>>, vector<8x128xf32>,
    return
  }
  func.func @transform_0(%arg0: i32) -> (i32, i32) {
    %c0_i32 = arith.constant 0 : i32
    %c0_i32_0 = arith.constant 0 : i32
    return %arg0, %c0_i32 : i32, i32
  }
  func.func @transform_1(%arg0: i32) -> (i32, i32) {
    %c0_i32 = arith.constant 0 : i32
    %c0_i32_0 = arith.constant 0 : i32
    return %arg0, %c0_i32 : i32, i32
  }
  func.func @transform_2(%arg0: i32) -> (i32, i32) {
    %c0_i32 = arith.constant 0 : i32
    %c0_i32_0 = arith.constant 0 : i32
    return %arg0, %c0_i32 : i32, i32
  }
  func.func @transform_3(%arg0: i32) -> (i32, i32, i32) {
    %c0_i32 = arith.constant 0 : i32
    %c0_i32_0 = arith.constant 0 : i32
    %c0_i32_1 = arith.constant 0 : i32
    return %arg0, %c0_i32, %c0_i32_0 : i32, i32, i32
  }
  func.func @transform_4(%arg0: i32) -> (i32, i32, i32) {
    %c0_i32 = arith.constant 0 : i32
    %c0_i32_0 = arith.constant 0 : i32
    %c0_i32_1 = arith.constant 0 : i32
    return %arg0, %c0_i32, %c0_i32_0 : i32, i32, i32
  }
  func.func @transform_5(%arg0: i32) -> (i32, i32) {
    %c0_i32 = arith.constant 0 : i32
    %c0_i32_0 = arith.constant 0 : i32
    %c0_i32_1 = arith.constant 0 : i32
    return %c0_i32, %c0_i32_0 : i32, i32
  }
  func.func @transform_6(%arg0: i32) -> (i32, i32) {
    %c0_i32 = arith.constant 0 : i32
    %c0_i32_0 = arith.constant 0 : i32
    %c0_i32_1 = arith.constant 0 : i32
    return %c0_i32, %c0_i32_0 : i32, i32
  }
  func.func @transform_7(%arg0: i32) -> (i32, i32) {
    %c0_i32 = arith.constant 0 : i32
    %c0_i32_0 = arith.constant 0 : i32
    %c0_i32_1 = arith.constant 0 : i32
    return %c0_i32, %c0_i32_0 : i32, i32
  }
  func.func @transform_8(%arg0: i32) -> (i32, i32) {
    %c0_i32 = arith.constant 0 : i32
    %c0_i32_0 = arith.constant 0 : i32
    %c0_i32_1 = arith.constant 0 : i32
    return %c0_i32, %c0_i32_0 : i32, i32
  }
  func.func @transform_9(%arg0: i32) -> (i32, i32, i32) {
    %c0_i32 = arith.constant 0 : i32
    %c0_i32_0 = arith.constant 0 : i32
    %c0_i32_1 = arith.constant 0 : i32
    %c0_i32_2 = arith.constant 0 : i32
    return %c0_i32, %c0_i32_0, %c0_i32_1 : i32, i32, i32
  }
  func.func @transform_10(%arg0: i32) -> (i32, i32) {
    %c0_i32 = arith.constant 0 : i32
    %c0_i32_0 = arith.constant 0 : i32
    %c0_i32_1 = arith.constant 0 : i32
    return %c0_i32, %c0_i32_0 : i32, i32
  }
  func.func @transform_11(%arg0: i32) -> (i32, i32) {
    %c0_i32 = arith.constant 0 : i32
    %c0_i32_0 = arith.constant 0 : i32
    %c0_i32_1 = arith.constant 0 : i32
    return %c0_i32, %c0_i32_0 : i32, i32
  }
  func.func @transform_12(%arg0: i32) -> (i32, i32) {
    %c0_i32 = arith.constant 0 : i32
    %c0_i32_0 = arith.constant 0 : i32
    %c0_i32_1 = arith.constant 0 : i32
    return %c0_i32, %c0_i32_0 : i32, i32
  }
  func.func @transform_13(%arg0: i32) -> (i32, i32) {
    %c0_i32 = arith.constant 0 : i32
    %c0_i32_0 = arith.constant 0 : i32
    return %arg0, %c0_i32 : i32, i32
  }
  func.func @transform_14(%arg0: i32) -> (i32, i32) {
    %c0_i32 = arith.constant 0 : i32
    %c0_i32_0 = arith.constant 0 : i32
    return %arg0, %c0_i32 : i32, i32
  }
  func.func @transform_15(%arg0: i32) -> (i32, i32) {
    %c0_i32 = arith.constant 0 : i32
    %c0_i32_0 = arith.constant 0 : i32
    return %arg0, %c0_i32 : i32, i32
  }
}

</mosaic_0001>

<bundles_post_ra>
// kernel: tpu_custom_call.1
= control target key start
LH: loop header
LB: loop body
LE: loop exit
PB: predicated region body
PF: predicated region fallthrough
CT: control target
= control target key end

     0   :  { %s11744_s0 = inlined_call_operand.vmem [shape: s32[16,1], index: 0, kind: input, shape index: {}]   ;;  %s11745_s1 = inlined_call_operand.vmem [shape: s32[16,1], index: 1, kind: input, shape index: {}]   ;;  %s11746_s2 = inlined_call_operand.vmem [shape: s32[16,1], index: 2, kind: input, shape index: {}]   ;;  %s11747_s3 = inlined_call_operand.hbm [shape: f32[16,8,128], index: 3, kind: input, shape index: {}]   ;;  %s11748_s4 = inlined_call_operand.hbm [shape: f32[16,8,128], index: 4, kind: input, shape index: {}]   ;;  %s11749_s5 = inlined_call_operand.hbm [shape: f32[128,512], index: 5, kind: input, shape index: {}]   ;;  %s11750_s6 = inlined_call_operand.vmem [shape: f32[1,512], index: 6, kind: input, shape index: {}]   ;;  %s11751_s7 = inlined_call_operand.hbm [shape: f32[128,256], index: 7, kind: input, shape index: {}]   ;;  %s11752_s8 = inlined_call_operand.vmem [shape: f32[1,256], index: 8, kind: input, shape index: {}]   ;;  %s11753_s9 = inlined_call_operand.hbm [shape: f32[4,128,128], index: 9, kind: input, shape index: {}]   ;;  %s11754_s10 = inlined_call_operand.vmem [shape: f32[4,128], index: 10, kind: input, shape index: {}]   ;;  %s11755_s11 = inlined_call_operand.vmem [shape: f32[8,128], index: 11, kind: input, shape index: {}]   ;;  %s11756_s12 = inlined_call_operand.vmem [shape: f32[1,8], index: 12, kind: input, shape index: {}]   ;;  %s11757_s13 = inlined_call_operand.hbm [shape: f32[16,128], index: 13, kind: output, shape index: {0}]   ;;  %s11758_s14 = inlined_call_operand.hbm [shape: f32[16,128], index: 14, kind: output, shape index: {1}]   ;;  %s11759_s15 = inlined_call_operand.hbm [shape: f32[16,128], index: 15, kind: output, shape index: {2}]  }
   0x1   :  { %11785 = sst [smem:[#allocation48_spill]] %s11747_s3 }
   0x2   :  { %11786 = sst [smem:[#allocation49_spill]] %s11749_s5 }
   0x3   :  { %11787 = sst [smem:[#allocation50_spill]] %s11751_s7 }
   0x4   :  { %11788 = sst [smem:[#allocation51_spill]] %s11753_s9 }
   0x5   :  { %11789 = sst [smem:[#allocation52_spill]] %s11756_s12 }
   0x6   :  { %11790 = sst [smem:[#allocation53_spill]] %s11757_s13 }
   0x7   :  { %11791 = sst [smem:[#allocation54_spill]] %s11758_s14 }
   0x8   :  { %11792 = sst [smem:[#allocation55_spill]] %s11759_s15 }
   0x9   :  { %21 = vsyncpa [#allocation3], 0 }
   0xa   :  { %23 = vsyncpa [#allocation3 + $0x1], 0 }
   0xb   :  { %24 = vsyncpa [#allocation6], 0 }
   0xc   :  { %26 = vsyncpa [#allocation6 + $0x1], 0 }
   0xd   :  { %27 = vsyncpa [#allocation9], 0 }
   0xe   :  { %28 = vsyncpa [#allocation4], 0 }
   0xf   :  { %30 = vsyncpa [#allocation4 + $0x1], 0 }
  0x10   :  { %31 = vsyncpa [#allocation13], 0 }
  0x11   :  { %33 = vsyncpa [#allocation13 + $0x1], 0  ;;  %s10021_s18 = smov 0   ;;  %s10023_s19 = smov 0  }
  0x12   :  { %s10025_s20 = smov 0   ;;  %s10027_s21 = smov 0  }
  0x13 LB: > { %11793 = sst [smem:[#allocation21_spill]] %s9908_s18  ;;  %s10042_s22 = sadd.s32 4294967295, %s9920_s21   ;;  %s9920_s21 = sphi %s10027_s21, %s11898_s21   ;;  %s9916_s20 = sphi %s10025_s20, %s11900_s20   ;;  %s9912_s19 = sphi %s10023_s19, %s11902_s19   ;;  %s9908_s18 = sphi %s10021_s18, %s11901_s18  }
  0x14   : > { %11794 = sst [smem:[#allocation22_spill]] %s9916_s20  ;;  %s11760_s23 = sadd.s32 4294967294, %s9920_s21  }
  0x15   : > { %p137_p0 = scmp.ne.s32.totalorder %s9912_s19, %s9908_s18  ;;  %p11763_p1 = scmp.eq.s32.totalorder %s10042_s22, 0 }
  0x16   : > { %p361_p3 = scmp.eq.s32.totalorder %s11760_s23, 1  ;;  %p8522_p5 = scmp.ge.s32.totalorder %s9920_s21, 1 }
  0x17   : > { %p10053_p4 = por %p11763_p1, %p137_p0  ;;  %p420_p7 = scmp.lt.s32.totalorder %s9920_s21, 3 }
  0x18   : > { %p10058_p6 = por %p361_p3, %p137_p0  ;;  %s9922_s27 = smov [#allocation7]  }
  0x19   : > { %s11795_s24 = scalar_select %p10053_p4, 1, 0 }
  0x1a   : > { %s11796_s25 = scalar_select %p10058_p6, 1, 0 }
  0x1b   : > { %p10063_p8 = pnand %p8522_p5, %p420_p7  ;;  %s432_s28 = sshll.u32 %s9922_s27, 4  ;;  %s433_s28 = int_to_ptr.vmem [resolvable:$true] %s432_s28 }
  0x1c   : > { %11797 = sst [smem:[#allocation23_spill]] %s11796_s25  ;;  %s9923_s30 = smov [#allocation8]  }
  0x1d   : > { %p9379_p9 = pneg %p10063_p8  ;;  %s448_s16 = sshll.u32 %s9923_s30, 4  ;;  %s449_s16 = int_to_ptr.vmem [resolvable:$true] %s448_s16 }
  0x1e   : > { %s9665_s17 = scalar_lea.vmem %s433_s28, 8192  ;;  %p9673_p5 = scmp.lt.s32.totalorder %s433_s28, %s433_s28 }
  0x1f   : > { %p10072_p11 = pnand %p9379_p9, %p11763_p1  ;;  %p9666_p13 = scmp.ne.s32.totalorder %s433_s28, %s9665_s17 }
  0x20   : > { %p9674_p7 = scmp.lt.s32.totalorder %s9665_s17, %s9665_s17 }
  0x21   : > { %p9656_p12 = pneg %p10072_p11 }
  0x22   : > { %p9675_p10 = por %p9674_p7, %p9673_p5 }
  0x23   : > { %p9668_p0 = pnand %p9666_p13, %p9656_p12 }
  0x25   : > { %p9669_p3 = pneg %p9668_p0 }
  0x27   : > { %p9676_p9 = pnand %p9675_p10, %p9669_p3 }
  0x29   : > { %9679 = shalt.err (!%p9676_p9)
}
  0x2a   : > { %s9924_s27 = smov 512   ;;  %s9925_s23 = smov 32  }
  0x2b   : > { %s11800_s5 = sld [smem:[#allocation49_spill]]  ;;  %s9691_s18 = scalar_lea.vmem %s449_s16, 4096 }
  0x2c   : > { %p9692_p1 = scmp.ne.s32.totalorder %s449_s16, %s9691_s18  ;;  %p9699_p2 = scmp.lt.s32.totalorder %s449_s16, %s449_s16 }
  0x2d   : > { %p9700_p6 = scmp.lt.s32.totalorder %s9691_s18, %s9691_s18 }
  0x2e   : > { %p9694_p13 = pnand %p9692_p1, %p9656_p12 }
  0x2f   : > { %p9701_p5 = por %p9700_p6, %p9699_p2 }
  0x30   : > { %p9695_p0 = pneg %p9694_p13 }
  0x31   : > { %9382 = dma.hbm_to_vmem [thread:$0]  (!%p10072_p11), %s11800_s5, 8192, %s433_s28, [#allocation6], %s9924_s27, %s9924_s27, %s9925_s23  }
  0x32   : > { %p9702_p10 = pnand %p9701_p5, %p9695_p0 }
  0x34   : > { %9705 = shalt.err (!%p9702_p10)
}
  0x35   : > { %s9926_s17 = smov 256   ;;  %s9927_s13 = smov 16  }
  0x36   : > { %s11801_s7 = sld [smem:[#allocation50_spill]]  ;;  %s9928_s23 = smov [#allocation10]  }
  0x37   : > { %s464_s25 = sshll.u32 %s9928_s23, 4  ;;  %s465_s25 = int_to_ptr.vmem [resolvable:$true] %s464_s25 }
  0x38   : > { %s9717_s28 = scalar_lea.vmem %s465_s25, 8192  ;;  %p9725_p6 = scmp.lt.s32.totalorder %s465_s25, %s465_s25 }
  0x39   : > { %p9718_p1 = scmp.ne.s32.totalorder %s465_s25, %s9717_s28  ;;  %p9726_p7 = scmp.lt.s32.totalorder %s9717_s28, %s9717_s28 }
  0x3b   : > { %p9720_p3 = pnand %p9718_p1, %p9656_p12  ;;  %p9727_p9 = por %p9726_p7, %p9725_p6 }
  0x3c   : > { %9385 = dma.hbm_to_vmem [thread:$0]  (!%p10072_p11), %s11801_s7, 4096, %s449_s16, [#allocation9], %s9926_s17, %s9926_s17, %s9927_s13  }
  0x3d   : > { %p9721_p2 = pneg %p9720_p3 }
  0x3f   : > { %p9728_p13 = pnand %p9727_p9, %p9721_p2 }
  0x41   : > { %9731 = shalt.err (!%p9728_p13)
}
  0x42   : > { %s11767_s18 = smov 128   ;;  %s11769_s13 = smov 8  }
  0x43   : > { %s11802_s9 = sld [smem:[#allocation51_spill]]  ;;  %s10106_s16 = sadd.s32 1, %s9920_s21  }
  0x44   : > { %11803 = sst [smem:[#allocation24_spill]] %s10106_s16  ;;  %s121_s27 = ssub.s32 %s9920_s21, %s10106_s16 }
  0x45   : > { %s124_s30 = sadd.s32 1, %s9916_s20  ;;  %p122_p12 = scmp.eq.s32.totalorder %s121_s27, 0 }
  0x46   : > { %p131_p0 = scmp.ne.s32.totalorder %s9916_s20, %s9912_s19  ;;  %p132_p5 = scmp.eq.s32.totalorder %s9920_s21, 0 }
  0x47   : > { %p9409_p10 = scmp.lt.s32.totalorder %s9920_s21, 2  ;;  %p11805_p3 = scmp.eq.s32.totalorder %s10042_s22, 1 }
  0x48   : > { %s10116_s17 = scalar_select %p122_p12, %s9916_s20, %s124_s30  }
  0x49   : > { %9388 = dma.hbm_to_vmem [thread:$0]  (!%p10072_p11), %s11802_s9, 8192, %s465_s25, [#allocation9], %s11767_s18, %s11767_s18, %s11769_s13  }
  0x4a   : > { %11804 = sst [smem:[#allocation25_spill]] %s10116_s17  ;;  %p133_p1 = por %p132_p5, %p131_p0 }
  0x4b   : > { %p10120_p2 = por %p11805_p3, %p131_p0  ;;  %s508_s23 = sand.u32 1, %s9916_s20  }
  0x4c   : > { %s8611_s28 = sshll.u32 %s9920_s21, 10  ;;  %s10126_s25 = sshll.u32 %s508_s23, 6 }
  0x4d   : > { %s11806_s29 = scalar_select %p10120_p2, 1, 0 }
  0x4e   : > { %s11808_s3 = sld [smem:[#allocation48_spill]]  ;;  %s512_s30 = scalar_lea.vmem [#allocation2], %s10126_s25 }
  0x4f   : > { %11807 = sst [smem:[#allocation26_spill]] %s11806_s29  ;;  %s519_s18 = sshll.u32 %s512_s30, 4  ;;  %s10138_s18 = int_to_ptr.vmem [resolvable:$true] %s519_s18 }
  0x50   : > { %p10134_p11 = pnand %p9409_p10, %p133_p1  ;;  %s10143_s14 = scalar_lea.hbm %s11748_s4, %s8611_s28 }
  0x51   : > { %s10145_s15 = scalar_lea.sflag [#allocation3], %s508_s23 }
  0x52   : > { %p9734_p7 = pneg %p10134_p11 }
  0x54   : > { %s10131_s27 = scalar_lea.hbm %s11808_s3, %s8611_s28  ;;  %s9737_s20 = scalar_lea.hbm %s11808_s3, 2048 }
  0x55   : > { %s9732_s9 = scalar_lea.hbm %s10131_s27, 1024  ;;  %p9738_p12 = scmp.lt.s32.totalorder %s10131_s27, %s11808_s3 }
  0x56   : > { %p9733_p6 = scmp.ne.s32.totalorder %s10131_s27, %s9732_s9  ;;  %p9739_p0 = scmp.lt.s32.totalorder %s9737_s20, %s9732_s9 }
  0x58   : > { %p9735_p9 = pnand %p9734_p7, %p9733_p6  ;;  %p9740_p5 = por %p9739_p0, %p9738_p12 }
  0x5a   : > { %p9736_p13 = pneg %p9735_p9 }
  0x5c   : > { %p9741_p10 = pnand %p9740_p5, %p9736_p13 }
  0x5e   : > { %9744 = shalt.err (!%p9741_p10)
}
  0x5f   : > { %s9745_s5 = scalar_lea.vmem %s10138_s18, 1024  ;;  %s9931_s7 = smov [#allocation2]  }
  0x60   : > { %p9746_p1 = scmp.ne.s32.totalorder %s10138_s18, %s9745_s5  ;;  %s9750_s17 = sshll.u32 %s9931_s7, 4  ;;  %s9751_s17 = int_to_ptr.vmem [resolvable:$false] %s9750_s17 }
  0x61   : > { %s9752_s23 = scalar_lea.vmem %s9751_s17, 2048  ;;  %p9753_p9 = scmp.lt.s32.totalorder %s10138_s18, %s9751_s17 }
  0x62   : > { %p9748_p3 = pnand %p9746_p1, %p9734_p7  ;;  %p9754_p2 = scmp.lt.s32.totalorder %s9752_s23, %s9745_s5 }
  0x64   : > { %p9749_p6 = pneg %p9748_p3  ;;  %p9755_p4 = por %p9754_p2, %p9753_p9 }
  0x66   : > { %p9756_p12 = pnand %p9755_p4, %p9749_p6 }
  0x68   : > { %9759 = shalt.err (!%p9756_p12)
}
  0x69   : > { %s11810_s9 = smov 8   ;;  %s11811_s20 = smov 128  }
  0x6a   : > { %9392 = dma.hbm_to_vmem [thread:$0]  (!%p10134_p11), %s10131_s27, 1024, %s10138_s18, %s10145_s15, %s11811_s20, %s11811_s20, %s11810_s9  }
  0x6b   : > { %s533_s16 = scalar_lea.vmem [#allocation5], %s10126_s25  ;;  %s529_s28 = sand.u32 1, %s9920_s21  }
  0x6c   : > { %s540_s29 = sshll.u32 %s533_s16, 4  ;;  %s530_s30 = scalar_lea.sflag [#allocation6], %s529_s28  ;;  %s10177_s29 = int_to_ptr.vmem [resolvable:$true] %s540_s29 }
  0x6d   : > { %s9760_s5 = scalar_lea.hbm %s10143_s14, 1024  ;;  %s9765_s23 = scalar_lea.hbm %s11748_s4, 2048 }
  0x6e   : > { %p9761_p4 = scmp.ne.s32.totalorder %s10143_s14, %s9760_s5  ;;  %p9766_p0 = scmp.lt.s32.totalorder %s10143_s14, %s11748_s4 }
  0x6f   : > { %p9767_p5 = scmp.lt.s32.totalorder %s9765_s23, %s9760_s5 }
  0x70   : > { %p9763_p2 = pnand %p9761_p4, %p9734_p7 }
  0x71   : > { %p9768_p10 = por %p9767_p5, %p9766_p0 }
  0x72   : > { %p9764_p13 = pneg %p9763_p2 }
  0x74   : > { %p9769_p1 = pnand %p9768_p10, %p9764_p13 }
  0x76   : > { %9772 = shalt.err (!%p9769_p1)
}
  0x77   : > { %s9773_s18 = scalar_lea.vmem %s10177_s29, 1024  ;;  %s9932_s25 = smov [#allocation5]  }
  0x78   : > { %p9774_p3 = scmp.ne.s32.totalorder %s10177_s29, %s9773_s18  ;;  %s9778_s27 = sshll.u32 %s9932_s25, 4  ;;  %s9779_s27 = int_to_ptr.vmem [resolvable:$false] %s9778_s27 }
  0x79   : > { %s9780_s15 = scalar_lea.vmem %s9779_s27, 2048  ;;  %p9781_p12 = scmp.lt.s32.totalorder %s10177_s29, %s9779_s27 }
  0x7a   : > { %p9776_p6 = pnand %p9774_p3, %p9734_p7  ;;  %p9782_p4 = scmp.lt.s32.totalorder %s9780_s15, %s9773_s18 }
  0x7c   : > { %p9777_p9 = pneg %p9776_p6  ;;  %p9783_p2 = por %p9782_p4, %p9781_p12 }
  0x7e   : > { %p9784_p0 = pnand %p9783_p2, %p9777_p9 }
  0x80   : > { %9787 = shalt.err (!%p9784_p0)
}
  0x81   : > { %9395 = dma.hbm_to_vmem [thread:$0]  (!%p10134_p11), %s10143_s14, 1024, %s10177_s29, %s530_s30, %s11811_s20, %s11811_s20, %s11810_s9  }
  0x82   : > { %552 = sbr.rel (%p10063_p8) target bundleno = 3426 (0xd62), region = 72 }
  0x87   : > { %s10207_s3 = sand.u32 1, %s9912_s19   ;;  %p11812_p7 = scmp.ne.s32.totalorder %s11795_s24, 0 }
  0x88   : > { %s8534_s12 = sshll.u32 %s10207_s3, 6  ;;  %s555_s16 = scalar_lea.sflag [#allocation3], %s10207_s3 }
  0x89   : > { %s10211_s28 = scalar_lea.vmem [#allocation2], %s8534_s12 }
  0x8a   : > { %9883 = dma.done.wait (%p11812_p7), %s555_s16, 1024  }
  0x8b   : > { %9885 = vsyncadd (%p11812_p7), %s555_s16, 4294966272  ;;  %s563_s26 = sand.u32 1, %s10042_s22   ;;  %s10220_s14 = scalar_lea.vmem [#allocation5], %s8534_s12 }
  0x8c   : > { %s564_s13 = scalar_lea.sflag [#allocation6], %s563_s26 }
  0x8d   : > { %9887 = dma.done.wait (%p11812_p7), %s564_s13, 1024  }
  0x8e   : > { %9889 = vsyncadd (%p11812_p7), %s564_s13, 4294966272  ;;  %p11813_p8 = scmp.eq.s32.totalorder %s10042_s22, 0 }
  0x90   : > { %9891 = dma.done.wait (%p11813_p8), [#allocation6], 8192   ;;  %p11814_p11 = pmov %p11813_p8 }
  0x91   : > { %p11815_p13 = pmov %p11813_p8 }
  0x92   : > { %9893 = vsyncadd (%p11814_p11), [#allocation6], 4294959104 }
  0x93   : > { %9895 = dma.done.wait (%p11815_p13), [#allocation9], 12288   ;;  %p11816_p5 = pmov %p11813_p8 }
  0x94   : > { %v11780_v0 = vmov 0.0   ;;  %v961_v1 = vld [vmem:[#allocation7 + $0x1e8] sm:$0xff]  ;;  %v960_v2 = vld [vmem:[#allocation7 + $0x1e0] sm:$0xff]  ;;  %v963_v17 = vld [vmem:[#allocation7 + $0x1f8] sm:$0xff]  ;;  %vm9934_vm0 = vmmov 0   ;;  %p653_p10 = scmp.lt.s32.totalorder %s10042_s22, 1 }
  0x95   : > { %9897 = vsyncadd (%p11816_p5), [#allocation9], 4294955008  ;;  %1050 = vmatprep.mubr.f32.mxu0 %v11780_v0  ;;  %1163 = vmatprep.mubr.f32.mxu1 %v11780_v0  ;;  %v957_v3 = vld [vmem:[#allocation7 + $0x1c8] sm:$0xff]  ;;  %v956_v4 = vld [vmem:[#allocation7 + $0x1c0] sm:$0xff]  ;;  %vm1953_vm2 = vcmask 64512   ;;  %s11873_s13 = sld [smem:[#allocation52_spill]] }
  0x96   : > { %986 = vmatprep.subr.mxu0 %v961_v1  ;;  %v953_v5 = vld [vmem:[#allocation7 + $0x1a8] sm:$0xff]  ;;  %v952_v6 = vld [vmem:[#allocation7 + $0x1a0] sm:$0xff]  ;;  %v962_v18 = vld [vmem:[#allocation7 + $0x1f0] sm:$0xff]  ;;  %1099 = vmatprep.subr.mxu1 %v963_v17  ;;  %s654_s24 = scalar_select %p653_p10, %s10042_s22, 1 }
  0x97   : > { %987 = vmatpush1.msra.mxu0 %v960_v2  ;;  %v949_v7 = vld [vmem:[#allocation7 + $0x188] sm:$0xff]  ;;  %v948_v8 = vld [vmem:[#allocation7 + $0x180] sm:$0xff]  ;;  %v959_v20 = vld [vmem:[#allocation7 + $0x1d8] sm:$0xff]  ;;  %1100 = vmatpush1.msra.mxu1 %v962_v18  ;;  %s11885_s18 = sld [smem:[#allocation54_spill]] }
  0x98   : > { %988 = vmatprep.subr.mxu0 %v957_v3  ;;  %v945_v9 = vld [vmem:[#allocation7 + $0x168] sm:$0xff]  ;;  %v944_v10 = vld [vmem:[#allocation7 + $0x160] sm:$0xff]  ;;  %v958_v21 = vld [vmem:[#allocation7 + $0x1d0] sm:$0xff]  ;;  %1101 = vmatprep.subr.mxu1 %v959_v20  ;;  %s10331_s9 = sshll.u32 %s654_s24, 3  ;;  %s11887_s12 = sld [smem:[#allocation26_spill]] }
  0x99   : > { %989 = vmatpush1.msra.mxu0 %v956_v4  ;;  %v941_v11 = vld [vmem:[#allocation7 + $0x148] sm:$0xff]  ;;  %v940_v12 = vld [vmem:[#allocation7 + $0x140] sm:$0xff]  ;;  %v955_v23 = vld [vmem:[#allocation7 + $0x1b8] sm:$0xff]  ;;  %1102 = vmatpush1.msra.mxu1 %v958_v21  ;;  %s656_s30 = scalar_lea.vmem %s11744_s0, %s10331_s9  ;;  %s10695_s27 = scalar_lea.vmem %s11745_s1, %s10331_s9 }
  0x9a   : > { %990 = vmatprep.subr.mxu0 %v953_v5  ;;  %v937_v13 = vld [vmem:[#allocation7 + $0x128] sm:$0xff]  ;;  %v936_v14 = vld [vmem:[#allocation7 + $0x120] sm:$0xff]  ;;  %v954_v25 = vld [vmem:[#allocation7 + $0x1b0] sm:$0xff]  ;;  %1103 = vmatprep.subr.mxu1 %v955_v23  ;;  %s664_s16 = scalar_lea.vmem %s11746_s2, %s10331_s9  ;;  %s9938_s24 = smov [#allocation12]  }
  0x9b   : > { %991 = vmatpush1.msra.mxu0 %v952_v6  ;;  %v933_v15 = vld [vmem:[#allocation7 + $0x108] sm:$0xff]  ;;  %v932_v16 = vld [vmem:[#allocation7 + $0x100] sm:$0xff]  ;;  %v951_v27 = vld [vmem:[#allocation7 + $0x198] sm:$0xff]  ;;  %1104 = vmatpush1.msra.mxu1 %v954_v25  ;;  %s9792_s9 = sshll.u32 %s9938_s24, 4  ;;  %s9793_s9 = int_to_ptr.vmem [resolvable:$false] %s9792_s9 }
  0x9c   : > { %992 = vmatprep.subr.mxu0 %v949_v7  ;;  %v929_v19 = vld [vmem:[#allocation7 + $0xe8] sm:$0xff]  ;;  %v928_v22 = vld [vmem:[#allocation7 + $0xe0] sm:$0xff]  ;;  %v950_v29 = vld [vmem:[#allocation7 + $0x190] sm:$0xff]  ;;  %1105 = vmatprep.subr.mxu1 %v951_v27  ;;  %s9794_s20 = scalar_lea.vmem %s9793_s9, 256 }
  0x9d   : > { %993 = vmatpush1.msra.mxu0 %v948_v8  ;;  %v925_v24 = vld [vmem:[#allocation7 + $0xc8] sm:$0xff]  ;;  %v924_v26 = vld [vmem:[#allocation7 + $0xc0] sm:$0xff]  ;;  %v947_v31 = vld [vmem:[#allocation7 + $0x178] sm:$0xff]  ;;  %1106 = vmatpush1.msra.mxu1 %v950_v29  ;;  %s11886_s25 = smov %s11885_s18 }
  0x9e   : > { %994 = vmatprep.subr.mxu0 %v945_v9  ;;  %v921_v28 = vld [vmem:[#allocation7 + $0xa8] sm:$0xff]  ;;  %v920_v30 = vld [vmem:[#allocation7 + $0xa0] sm:$0xff]  ;;  %v946_v33 = vld [vmem:[#allocation7 + $0x170] sm:$0xff]  ;;  %1107 = vmatprep.subr.mxu1 %v947_v31  ;;  %p11888_p3 = scmp.ne.s32.totalorder %s11887_s12, 0 }
  0x9f   : > { %995 = vmatpush1.msra.mxu0 %v944_v10  ;;  %v917_v32 = vld [vmem:[#allocation7 + $0x88] sm:$0xff]  ;;  %v916_v34 = vld [vmem:[#allocation7 + $0x80] sm:$0xff]  ;;  %v943_v35 = vld [vmem:[#allocation7 + $0x158] sm:$0xff]  ;;  %1108 = vmatpush1.msra.mxu1 %v946_v33 }
  0xa0   : > { %996 = vmatprep.subr.mxu0 %v941_v11  ;;  %v913_v36 = vld [vmem:[#allocation7 + $0x68] sm:$0xff]  ;;  %v942_v37 = vld [vmem:[#allocation7 + $0x150] sm:$0xff]  ;;  %v912_v38 = vld [vmem:[#allocation7 + $0x60] sm:$0xff]  ;;  %1109 = vmatprep.subr.mxu1 %v943_v35 }
  0xa1   : > { %997 = vmatpush1.msra.mxu0 %v940_v12  ;;  %v939_v39 = vld [vmem:[#allocation7 + $0x138] sm:$0xff]  ;;  %v909_v40 = vld [vmem:[#allocation7 + $0x48] sm:$0xff]  ;;  %v938_v41 = vld [vmem:[#allocation7 + $0x130] sm:$0xff]  ;;  %1110 = vmatpush1.msra.mxu1 %v942_v37 }
  0xa2   : > { %998 = vmatprep.subr.mxu0 %v937_v13  ;;  %v908_v42 = vld [vmem:[#allocation7 + $0x40] sm:$0xff]  ;;  %v935_v43 = vld [vmem:[#allocation7 + $0x118] sm:$0xff]  ;;  %v905_v44 = vld [vmem:[#allocation7 + $0x28] sm:$0xff]  ;;  %1111 = vmatprep.subr.mxu1 %v939_v39 }
  0xa3   : > { %999 = vmatpush1.msra.mxu0 %v936_v14  ;;  %v934_v45 = vld [vmem:[#allocation7 + $0x110] sm:$0xff]  ;;  %v904_v46 = vld [vmem:[#allocation7 + $0x20] sm:$0xff]  ;;  %1112 = vmatpush1.msra.mxu1 %v938_v41  ;;  %v931_v47 = vld [vmem:[#allocation7 + $0xf8] sm:$0xff] }
  0xa4   : > { %1000 = vmatprep.subr.mxu0 %v933_v15  ;;  %v901_v48 = vld [vmem:[#allocation7 + $0x8] sm:$0xff]  ;;  %1113 = vmatprep.subr.mxu1 %v935_v43  ;;  %v930_v49 = vld [vmem:[#allocation7 + $0xf0] sm:$0xff]  ;;  %v900_v50 = vld [vmem:[#allocation7] sm:$0xff] }
  0xa5   : > { %1001 = vmatpush1.msra.mxu0 %v932_v16  ;;  %1114 = vmatpush1.msra.mxu1 %v934_v45  ;;  %v927_v51 = vld [vmem:[#allocation7 + $0xd8] sm:$0xff]  ;;  %v10237_v52 = vld [vmem:[%s10211_s28] sm:$0xff]  ;;  %v926_v53 = vld [vmem:[#allocation7 + $0xd0] sm:$0xff] }
  0xa6   : > { %1002 = vmatprep.subr.mxu0 %v929_v19  ;;  %1115 = vmatprep.subr.mxu1 %v931_v47  ;;  %v923_v54 = vld [vmem:[#allocation7 + $0xb8] sm:$0xff]  ;;  %v922_v55 = vld [vmem:[#allocation7 + $0xb0] sm:$0xff]  ;;  %v10242_v59 = vld [vmem:[%s10211_s28 + $0x8] sm:$0xff] }
  0xa7   : > { %1003 = vmatpush1.msra.mxu0 %v928_v22  ;;  %1116 = vmatpush1.msra.mxu1 %v930_v49  ;;  %v1243_v56 = vld [vmem:[#allocation8 + $0xf8] sm:$0xff]  ;;  %v1242_v58 = vld [vmem:[#allocation8 + $0xf0] sm:$0xff]  ;;  %v1241_v63 = vld [vmem:[#allocation8 + $0xe8] sm:$0xff]  ;;  %v686_v49 = vlaneseq }
  0xa8   : > { %1004 = vmatprep.subr.mxu0 %v925_v24  ;;  %1117 = vmatprep.subr.mxu1 %v927_v51  ;;  %v919_v57 = vld [vmem:[#allocation7 + $0x98] sm:$0xff]  ;;  %v918_v60 = vld [vmem:[#allocation7 + $0x90] sm:$0xff]  ;;  %v1240_v2 = vld [vmem:[#allocation8 + $0xe0] sm:$0xff]  ;;  %v11778_v51 = vmov 0  }
  0xa9   : > { %1005 = vmatpush1.msra.mxu0 %v924_v26  ;;  %1118 = vmatpush1.msra.mxu1 %v926_v53  ;;  %v915_v61 = vld [vmem:[#allocation7 + $0x78] sm:$0xff]  ;;  %v914_v62 = vld [vmem:[#allocation7 + $0x70] sm:$0xff]  ;;  %v1237_v11 = vld [vmem:[#allocation8 + $0xc8] sm:$0xff]  ;;  %v9936_v53 = vmov 1966171168  }
  0xaa   : > { %1006 = vmatprep.subr.mxu0 %v921_v28  ;;  %1119 = vmatprep.subr.mxu1 %v923_v54  ;;  %v911_v1 = vld [vmem:[#allocation7 + $0x58] sm:$0xff]  ;;  %v669_v3 = vld [vmem:[%s10211_s28 + $0x10] sm:$0xff]  ;;  %v1236_v13 = vld [vmem:[#allocation8 + $0xc0] sm:$0xff]  ;;  %v692_v54 = vunpack.c.l.s4 %v9936_v53 }
  0xab   : > { %1007 = vmatpush1.msra.mxu0 %v920_v30  ;;  %1120 = vmatpush1.msra.mxu1 %v922_v55  ;;  %v910_v4 = vld [vmem:[#allocation7 + $0x50] sm:$0xff]  ;;  %v907_v5 = vld [vmem:[#allocation7 + $0x38] sm:$0xff]  ;;  %v671_v15 = vld [vmem:[%s10211_s28 + $0x20] sm:$0xff]  ;;  %v10329_v55 = vshrl.u32 %v686_v49, 7 }
  0xac   : > { %1008 = vmatprep.subr.mxu0 %v917_v32  ;;  %1121 = vmatprep.subr.mxu1 %v919_v57  ;;  %v1239_v6 = vld [vmem:[#allocation8 + $0xd8] sm:$0xff]  ;;  %v906_v7 = vld [vmem:[#allocation7 + $0x30] sm:$0xff]  ;;  %v1233_v17 = vld [vmem:[#allocation8 + $0xa8] sm:$0xff] }
  0xad   : > { %1009 = vmatpush1.msra.mxu0 %v916_v34  ;;  %1122 = vmatpush1.msra.mxu1 %v918_v60  ;;  %v1238_v8 = vld [vmem:[#allocation8 + $0xd0] sm:$0xff]  ;;  %v903_v9 = vld [vmem:[#allocation7 + $0x18] sm:$0xff]  ;;  %v1232_v18 = vld [vmem:[#allocation8 + $0xa0] sm:$0xff] }
  0xae   : > { %1010 = vmatprep.subr.mxu0 %v913_v36  ;;  %1123 = vmatprep.subr.mxu1 %v915_v61  ;;  %v10249_v10 = vld [vmem:[%s10211_s28 + $0x18] sm:$0xff]  ;;  %v902_v12 = vld [vmem:[#allocation7 + $0x10] sm:$0xff]  ;;  %v10259_v19 = vld [vmem:[%s10211_s28 + $0x28] sm:$0xff] }
  0xaf   : > { %1011 = vmatpush1.msra.mxu0 %v912_v38  ;;  %1124 = vmatpush1.msra.mxu1 %v914_v62  ;;  %v1235_v14 = vld [vmem:[#allocation8 + $0xb8] sm:$0xff]  ;;  %v1234_v16 = vld [vmem:[#allocation8 + $0xb0] sm:$0xff]  ;;  %v1229_v22 = vld [vmem:[#allocation8 + $0x88] sm:$0xff] }
  0xb0   : > { %1012 = vmatprep.subr.mxu0 %v909_v40  ;;  %1125 = vmatprep.subr.mxu1 %v911_v1  ;;  %v1231_v20 = vld [vmem:[#allocation8 + $0x98] sm:$0xff]  ;;  %v1230_v21 = vld [vmem:[#allocation8 + $0x90] sm:$0xff]  ;;  %v1228_v23 = vld [vmem:[#allocation8 + $0x80] sm:$0xff] }
  0xb1   : > { %1013 = vmatpush1.msra.mxu0 %v908_v42  ;;  %1126 = vmatpush1.msra.mxu1 %v910_v4  ;;  %v673_v24 = vld [vmem:[%s10211_s28 + $0x30] sm:$0xff]  ;;  %v1227_v25 = vld [vmem:[#allocation8 + $0x78] sm:$0xff]  ;;  %v1225_v27 = vld [vmem:[#allocation8 + $0x68] sm:$0xff] }
  0xb2   : > { %1014 = vmatprep.subr.mxu0 %v905_v44  ;;  %1127 = vmatprep.subr.mxu1 %v907_v5  ;;  %v1226_v26 = vld [vmem:[#allocation8 + $0x70] sm:$0xff]  ;;  %v1224_v28 = vld [vmem:[#allocation8 + $0x60] sm:$0xff]  ;;  %v10269_v29 = vld [vmem:[%s10211_s28 + $0x38] sm:$0xff] }
  0xb3   : > { %1015 = vmatpush1.msra.mxu0 %v904_v46  ;;  %1128 = vmatpush1.msra.mxu1 %v906_v7  ;;  %v1223_v30 = vld [vmem:[#allocation8 + $0x58] sm:$0xff]  ;;  %v1222_v31 = vld [vmem:[#allocation8 + $0x50] sm:$0xff]  ;;  %v1221_v32 = vld [vmem:[#allocation8 + $0x48] sm:$0xff] }
  0xb4   : > { %1016 = vmatprep.subr.mxu0 %v901_v48  ;;  %1129 = vmatprep.subr.mxu1 %v903_v9  ;;  %v1220_v33 = vld [vmem:[#allocation8 + $0x40] sm:$0xff]  ;;  %v1219_v34 = vld [vmem:[#allocation8 + $0x38] sm:$0xff]  ;;  %v1218_v35 = vld [vmem:[#allocation8 + $0x30] sm:$0xff] }
  0xb5   : > { %1017 = vmatpush1.msra.mxu0 %v900_v50  ;;  %1130 = vmatpush1.msra.mxu1 %v902_v12  ;;  %v1217_v36 = vld [vmem:[#allocation8 + $0x28] sm:$0xff]  ;;  %v1216_v37 = vld [vmem:[#allocation8 + $0x20] sm:$0xff]  ;;  %v1215_v38 = vld [vmem:[#allocation8 + $0x18] sm:$0xff] }
  0xb6   : > { %1051 = vmatmul.mubr.f32.vlgmr.msra.gmra.mxu0 %v10237_v52  ;;  %1256 = vmatprep.subr.mxu0 %v1243_v56  ;;  %v1214_v39 = vld [vmem:[#allocation8 + $0x10] sm:$0xff]  ;;  %v1213_v40 = vld [vmem:[#allocation8 + $0x8] sm:$0xff]  ;;  %v1212_v41 = vld [vmem:[#allocation8] sm:$0xff]  ;;  %v693_v56 = vunpack.c.0.s8 %v692_v54 }
  0xb7   : > { %1056 = vmatprep.mubr.f32.mxu0 %v11780_v0  ;;  %1257 = vmatpush1.msra.mxu0 %v1242_v58  ;;  %v10282_v42 = vld [vmem:[%s10220_s14] sm:$0xff]  ;;  %v10289_v43 = vld [vmem:[%s10220_s14 + $0x8] sm:$0xff]  ;;  %v10294_v44 = vld [vmem:[%s10220_s14 + $0x10] sm:$0xff] }
  0xb8   : > { %1258 = vmatprep.subr.mxu0 %v1241_v63  ;;  %1164 = vmatmul.mubr.f32.vlgmr.msra.gmra.mxu1 %v10237_v52  ;;  %v10299_v45 = vld [vmem:[%s10220_s14 + $0x18] sm:$0xff]  ;;  %v10304_v46 = vld [vmem:[%s10220_s14 + $0x20] sm:$0xff]  ;;  %v10309_v47 = vld [vmem:[%s10220_s14 + $0x28] sm:$0xff]  ;;  %v10338_v57 = vsub.s32 %v693_v56, %v10329_v55 }
  0xb9   : > { %1259 = vmatpush1.msra.mxu0 %v1240_v2  ;;  %1169 = vmatprep.mubr.f32.mxu1 %v11780_v0  ;;  %v10314_v48 = vld [vmem:[%s10220_s14 + $0x30] sm:$0xff]  ;;  %v10319_v50 = vld [vmem:[%s10220_s14 + $0x38] sm:$0xff]  ;;  %v683_v58 = vld [vmem:[%s656_s30] sm:$0xff]  ;;  %s11582_s30 = sshll.u32 %s10042_s22, 7 }
  0xba   : > { %1057 = vmatmul.mubr.f32.gmra.mxu0 %v10242_v59  ;;  %1260 = vmatprep.subr.mxu0 %v1239_v6  ;;  %v10341_v60 = vrot.slane %v683_v58, %v10338_v57  ;;  %v690_v61 = vcombine.high %v683_v58, %v683_v58  ;;  %v10353_v6 = vsub.s32 0, %v10329_v55  ;;  %v10358_v7 = vld [vmem:[%s11750_s6] sm:$0xf]  ;;  %s11601_s15 = scalar_lea.hbm %s11885_s18, %s11582_s30 }
  0xbb   : > { %1062 = vmatprep.mubr.f32.mxu0 %v11780_v0  ;;  %1261 = vmatpush1.msra.mxu0 %v1238_v8 }
  0xbc   : > { %1262 = vmatprep.subr.mxu0 %v1237_v11  ;;  %8844 = vmatprep.subr.mxu1 %v11780_v0  ;;  %v705_v62 = vcombine.high %v10341_v60, %v10341_v60  ;;  %v10346_v63 = vrot.slane %v690_v61, %v10338_v57  ;;  %v10362_v8 = vrot.slane %v10358_v7, %v10353_v6 }
  0xbd   : > { %1263 = vmatpush1.msra.mxu0 %v1236_v13  ;;  %1170 = vmatmul.mubr.f32.gmra.mxu1 %v10242_v59 }
  0xbe   : > { %1063 = vmatmul.mubr.f32.gmra.mxu0 %v669_v3  ;;  %1264 = vmatprep.subr.mxu0 %v1235_v14  ;;  %v727_v1 = vrot.slane %v705_v62, %v10338_v57  ;;  %v706_v2 = vcombine.high %v10346_v63, %v10346_v63 }
  0xbf   : > { %1068 = vmatprep.mubr.f32.mxu0 %v11780_v0  ;;  %1265 = vmatpush1.msra.mxu0 %v1234_v16  ;;  %v976_v16 = vsub.s32 2, %v10329_v55 }
  0xc0   : > { %1266 = vmatprep.subr.mxu0 %v1233_v17  ;;  %1175 = vmatprep.mubr.f32.mxu1 %v11780_v0  ;;  %v734_v4 = vrot.slane %v706_v2, %v10338_v57 }
  0xc1   : > { %1267 = vmatpush1.msra.mxu0 %v1232_v18  ;;  %1176 = vmatmul.mubr.f32.gmra.mxu1 %v669_v3  ;;  %v737_v3 = vcombine.high %v727_v1, %v727_v1 }
  0xc2   : > { %1069 = vmatmul.mubr.f32.gmra.mxu0 %v10249_v10  ;;  %1268 = vmatprep.subr.mxu0 %v1231_v20  ;;  %v738_v5 = vcombine.high %v734_v4, %v734_v4 }
  0xc3   : > { %1074 = vmatprep.mubr.f32.mxu0 %v11780_v0  ;;  %1269 = vmatpush1.msra.mxu0 %v1230_v21  ;;  %v10385_v21 = vrot.slane %v10358_v7, %v976_v16 }
  0xc4   : > { %1270 = vmatprep.subr.mxu0 %v1229_v22  ;;  %1181 = vmatprep.mubr.f32.mxu1 %v11780_v0 }
  0xc5   : > { %1271 = vmatpush1.msra.mxu0 %v1228_v23  ;;  %1182 = vmatmul.mubr.f32.gmra.mxu1 %v10249_v10 }
  0xc6   : > { %1075 = vmatmul.mubr.f32.gmra.mxu0 %v671_v15  ;;  %1272 = vmatprep.subr.mxu0 %v1227_v25 }
  0xc7   : > { %1080 = vmatprep.mubr.f32.mxu0 %v11780_v0  ;;  %1273 = vmatpush1.msra.mxu0 %v1226_v26 }
  0xc8   : > { %1274 = vmatprep.subr.mxu0 %v1225_v27  ;;  %1187 = vmatprep.mubr.f32.mxu1 %v11780_v0 }
  0xc9   : > { %1275 = vmatpush1.msra.mxu0 %v1224_v28  ;;  %1188 = vmatmul.mubr.f32.gmra.mxu1 %v671_v15 }
  0xca   : > { %1081 = vmatmul.mubr.f32.gmra.mxu0 %v10259_v19  ;;  %1276 = vmatprep.subr.mxu0 %v1223_v30 }
  0xcb   : > { %1086 = vmatprep.mubr.f32.mxu0 %v11780_v0  ;;  %1277 = vmatpush1.msra.mxu0 %v1222_v31 }
  0xcc   : > { %1278 = vmatprep.subr.mxu0 %v1221_v32  ;;  %1193 = vmatprep.mubr.f32.mxu1 %v11780_v0 }
  0xcd   : > { %1279 = vmatpush1.msra.mxu0 %v1220_v33  ;;  %1194 = vmatmul.mubr.f32.gmra.mxu1 %v10259_v19 }
  0xce   : > { %1087 = vmatmul.mubr.f32.gmra.mxu0 %v673_v24  ;;  %1280 = vmatprep.subr.mxu0 %v1219_v34 }
  0xcf   : > { %1092 = vmatprep.mubr.f32.mxu0 %v11780_v0  ;;  %1281 = vmatpush1.msra.mxu0 %v1218_v35 }
  0xd0   : > { %1282 = vmatprep.subr.mxu0 %v1217_v36  ;;  %1199 = vmatprep.mubr.f32.mxu1 %v11780_v0 }
  0xd1   : > { %1283 = vmatpush1.msra.mxu0 %v1216_v37  ;;  %1200 = vmatmul.mubr.f32.gmra.mxu1 %v673_v24 }
  0xd2   : > { %1093 = vmatmul.mubr.f32.gmra.mxu0 %v10269_v29  ;;  %1284 = vmatprep.subr.mxu0 %v1215_v38 }
  0xd3   : > { %1320 = vmatprep.mubr.f32.mxu0 %v11780_v0  ;;  %1285 = vmatpush1.msra.mxu0 %v1214_v39 }
  0xd4   : > { %1205 = vmatprep.mubr.f32.mxu1 %v11780_v0  ;;  %1286 = vmatprep.subr.mxu0 %v1213_v40 }
  0xd5   : > { %1206 = vmatmul.mubr.f32.gmra.mxu1 %v10269_v29  ;;  %1287 = vmatpush1.msra.mxu0 %v1212_v41 }
  0xd6   : > { %8839 = vmatprep.subr.mxu0 %v11780_v0  ;;  %1321 = vmatmul.mubr.f32.vlgmr.msra.gmra.mxu0 %v10282_v42 }
  0xd7   : > { %1326 = vmatprep.mubr.f32.mxu0 %v11780_v0  ;;  %8846 = vmatprep.mubr.msk.f32.mxu1 %vm9934_vm0, %v11780_v0 }
  0xd8   : > { %9460 = vset.pattern.permute.xlu0 %v11778_v51  ;;  %9461 = vset.pattern.permute.xlu1 %v11778_v51 }
  0xd9   : > { %747 = vperm.xlu0 %9460, %v727_v1   ;;  %775 = vperm.xlu1 %9461, %v734_v4  }
  0xda   : > { %1327 = vmatmul.mubr.f32.gmra.mxu0 %v10289_v43 }
  0xdb   : > { %1332 = vmatprep.mubr.f32.mxu0 %v11780_v0 }
  0xdd   : > { %761 = vperm.xlu0 %9460, %v737_v3   ;;  %789 = vperm.xlu1 %9461, %v738_v5  }
  0xde   : > { %1333 = vmatmul.mubr.f32.gmra.mxu0 %v10294_v44 }
  0xdf   : > { %1338 = vmatprep.mubr.f32.mxu0 %v11780_v0 }
  0xe2   : > { %1339 = vmatmul.mubr.f32.gmra.mxu0 %v10299_v45 }
  0xe3   : > { %1344 = vmatprep.mubr.f32.mxu0 %v11780_v0 }
  0xe6   : > { %1345 = vmatmul.mubr.f32.gmra.mxu0 %v10304_v46 }
  0xe7   : > { %1350 = vmatprep.mubr.f32.mxu0 %v11780_v0 }
  0xea   : > { %1351 = vmatmul.mubr.f32.gmra.mxu0 %v10309_v47 }
  0xeb   : > { %1356 = vmatprep.mubr.f32.mxu0 %v11780_v0 }
  0xee   : > { %1357 = vmatmul.mubr.f32.gmra.mxu0 %v10314_v48 }
  0xef   : > { %1362 = vmatprep.mubr.f32.mxu0 %v11780_v0 }
  0xf2   : > { %1363 = vmatmul.mubr.f32.gmra.mxu0 %v10319_v50 }
  0xf3   : > { %8841 = vmatprep.mubr.msk.f32.mxu0 %vm9934_vm0, %v11780_v0 }
 0x176   : > { %v1052_v9 = vpop.f32.mrf.mxu0 }
 0x177   : > { %v1053_v11 = vadd.f32 %v1052_v9, %v10362_v8 }
 0x178   : > { %v10365_v12 = vpop.f32.mrf.mxu0  ;;  %v1165_v25 = vpop.f32.mrf.mxu1 }
 0x179   : > { %8840 = vmatpush3.xpose.msra.mxu0 %v1053_v11  ;;  %v10395_v26 = vadd.f32 %v1165_v25, %v10385_v21 }
 0x17a   : > { %v1058_v13 = vpop.f32.mrf.mxu0  ;;  %8879 = vmatprep.subr.mxu0 %v11780_v0  ;;  %v10398_v28 = vpop.f32.mrf.mxu1 }
 0x17b   : > { %v1059_v14 = vadd.f32 %v1058_v13, %v10362_v8  ;;  %11817 = vst [vmem:[#allocation27_spill] sm:$0xff] %v10398_v28 }
 0x17c   : > { %v10369_v15 = vpop.f32.mrf.mxu0  ;;  %8842 = vmatmul.mubr.f32.vlgmr.msra.gmra.mxu0 %v10282_v42 }
 0x17d   : > { %8845 = vmatpush3.xpose.msra.mxu1 %v1059_v14  ;;  %8880 = vmatpush3.msra.mxu0 %v10237_v52  ;;  %v10404_v32 = vpop.f32.mrf.mxu1 }
 0x17e   : > { %v1064_v17 = vpop.f32.mrf.mxu0  ;;  %8849 = vmatprep.subr.mxu1 %v11780_v0  ;;  %8881 = vmatprep.mubr.msk.f32.mxu0 %vm9934_vm0, %v11780_v0 }
 0x17f   : > { %v1065_v18 = vadd.f32 %v1064_v17, %v10362_v8  ;;  %8889 = vmatprep.subr.mxu0 %v11780_v0  ;;  %v10409_v34 = vpop.f32.mrf.mxu1  ;;  %v748_v17 = vpop.permute.xlu0 %747 }
 0x180   : > { %v10379_v20 = vpop.f32.mrf.mxu0  ;;  %8847 = vmatmul.mubr.f32.vlgmr.msra.gmra.mxu1 %v10289_v43  ;;  %11818 = vst [vmem:[#allocation28_spill] sm:$0xff] %v10409_v34 }
 0x181   : > { %8850 = vmatpush3.xpose.msra.mxu1 %v1065_v18  ;;  %8851 = vmatprep.mubr.msk.f32.mxu1 %vm9934_vm0, %v11780_v0  ;;  %v1177_v37 = vpop.f32.mrf.mxu1  ;;  %v752_v18 = vrot.slane %v748_v17, %v10353_v6  ;;  %v8565_v17 = vld [vmem:[%s11754_s10 + $0x1] ss:$0 sm:$0xff] }
 0x182   : > { %v1070_v22 = vpop.f32.mrf.mxu0  ;;  %8854 = vmatprep.subr.mxu1 %v11780_v0  ;;  %v10418_v38 = vadd.f32 %v1177_v37, %v10385_v21 }
 0x183   : > { %v1071_v23 = vadd.f32 %v1070_v22, %v10362_v8  ;;  %v10421_v40 = vpop.f32.mrf.mxu1  ;;  %v762_v25 = vpop.permute.xlu0 %761 }
 0x184   : > { %v10389_v24 = vpop.f32.mrf.mxu0  ;;  %8852 = vmatmul.mubr.f32.vlgmr.msra.gmra.mxu1 %v10294_v44  ;;  %11819 = vst [vmem:[#allocation29_spill] sm:$0xff] %v10418_v38  ;;  %11820 = vst [vmem:[#allocation30_spill] sm:$0xff] %v10421_v40 }
 0x185   : > { %8855 = vmatpush3.xpose.msra.mxu1 %v1071_v23  ;;  %8856 = vmatprep.mubr.msk.f32.mxu1 %vm9934_vm0, %v11780_v0  ;;  %v1183_v54 = vpop.f32.mrf.mxu1 }
 0x186   : > { %v1076_v27 = vpop.f32.mrf.mxu0  ;;  %8859 = vmatprep.subr.mxu1 %v11780_v0  ;;  %v10430_v56 = vadd.f32 %v1183_v54, %v10385_v21  ;;  %v776_v54 = vpop.permute.xlu1 %775 }
 0x187   : > { %v1077_v30 = vadd.f32 %v1076_v27, %v10362_v8  ;;  %v10433_v61 = vpop.f32.mrf.mxu1 }
 0x188   : > { %v10401_v31 = vpop.f32.mrf.mxu0  ;;  %8857 = vmatmul.mubr.f32.vlgmr.msra.gmra.mxu1 %v10299_v45  ;;  %11821 = vst [vmem:[#allocation31_spill] sm:$0xff] %v10433_v61 }
 0x189   : > { %8860 = vmatpush3.xpose.msra.mxu1 %v1077_v30  ;;  %8861 = vmatprep.mubr.msk.f32.mxu1 %vm9934_vm0, %v11780_v0  ;;  %v1189_v1 = vpop.f32.mrf.mxu1 }
 0x18a   : > { %v1082_v33 = vpop.f32.mrf.mxu0  ;;  %8864 = vmatprep.subr.mxu1 %v11780_v0  ;;  %v10440_v2 = vadd.f32 %v1189_v1, %v10385_v21 }
 0x18b   : > { %v1083_v35 = vadd.f32 %v1082_v33, %v10362_v8  ;;  %v10442_v3 = vpop.f32.mrf.mxu1 }
 0x18c   : > { %v10412_v36 = vpop.f32.mrf.mxu0  ;;  %8862 = vmatmul.mubr.f32.vlgmr.msra.gmra.mxu1 %v10304_v46  ;;  %11822 = vst [vmem:[#allocation32_spill] sm:$0xff] %v10440_v2  ;;  %11823 = vst [vmem:[#allocation33_spill] sm:$0xff] %v10442_v3 }
 0x18d   : > { %8865 = vmatpush3.xpose.msra.mxu1 %v1083_v35  ;;  %8866 = vmatprep.mubr.msk.f32.mxu1 %vm9934_vm0, %v11780_v0  ;;  %v1195_v4 = vpop.f32.mrf.mxu1 }
 0x18e   : > { %v1088_v39 = vpop.f32.mrf.mxu0  ;;  %8869 = vmatprep.subr.mxu1 %v11780_v0  ;;  %v10447_v5 = vadd.f32 %v1195_v4, %v10385_v21 }
 0x18f   : > { %v1089_v41 = vadd.f32 %v1088_v39, %v10362_v8 }
 0x190   : > { %v10424_v53 = vpop.f32.mrf.mxu0  ;;  %8867 = vmatmul.mubr.f32.vlgmr.msra.gmra.mxu1 %v10309_v47 }
 0x191   : > { %8870 = vmatpush3.xpose.msra.mxu1 %v1089_v41  ;;  %8871 = vmatprep.mubr.msk.f32.mxu1 %vm9934_vm0, %v11780_v0 }
 0x192   : > { %v1094_v58 = vpop.f32.mrf.mxu0  ;;  %8874 = vmatprep.subr.mxu1 %v11780_v0 }
 0x193   : > { %v1095_v62 = vadd.f32 %v1094_v58, %v10362_v8  ;;  %v10452_v8 = vpop.f32.mrf.mxu1 }
 0x194   : > { %8872 = vmatmul.mubr.f32.vlgmr.msra.gmra.mxu1 %v10314_v48  ;;  %11824 = vst [vmem:[#allocation34_spill] sm:$0xff] %v10452_v8 }
 0x195   : > { %8875 = vmatpush3.xpose.msra.mxu1 %v1095_v62  ;;  %8876 = vmatprep.mubr.msk.f32.mxu1 %vm9934_vm0, %v11780_v0  ;;  %v1201_v9 = vpop.f32.mrf.mxu1 }
 0x196   : > { %8884 = vmatprep.subr.mxu1 %v11780_v0  ;;  %v10456_v11 = vadd.f32 %v1201_v9, %v10385_v21  ;;  %v780_v9 = vrot.slane %v776_v54, %v10353_v6 }
 0x197   : > { %v10458_v13 = vpop.f32.mrf.mxu1 }
 0x198   : > { %8877 = vmatmul.mubr.f32.vlgmr.msra.gmra.mxu1 %v10319_v50  ;;  %11825 = vst [vmem:[#allocation35_spill] sm:$0xff] %v10456_v11  ;;  %11826 = vst [vmem:[#allocation36_spill] sm:$0xff] %v10458_v13 }
 0x199   : > { %8885 = vmatpush3.msra.mxu1 %v10242_v59  ;;  %8886 = vmatprep.mubr.msk.f32.mxu1 %vm9934_vm0, %v11780_v0  ;;  %v1207_v14 = vpop.f32.mrf.mxu1  ;;  %v10464_v59 = vand.u32 127, %v686_v49  ;;  %v766_v49 = vrot.slane %v762_v25, %v10353_v6 }
 0x19a   : > { %8894 = vmatprep.subr.mxu1 %v11780_v0  ;;  %v10461_v16 = vadd.f32 %v1207_v14, %v10385_v21 }
 0x19b   : > { %vm10468_vm1 = vcmp.ge.s32.totalorder %v10464_v59, %v752_v18  ;;  %v10472_v23 = vpop.f32.mrf.mxu1  ;;  %vm10481_vm3 = vcmp.ge.s32.totalorder %v10464_v59, %v766_v49  ;;  %vm10492_vm4 = vcmp.ge.s32.totalorder %v10464_v59, %v780_v9  ;;  %vm896_vm6 = vcmp.lt.s32.totalorder %v10464_v59, 8 }
 0x19c   : > { %11827 = vst [vmem:[#allocation37_spill] sm:$0xff] %v10461_v16  ;;  %11830 = vst [vmem:[#allocation38_spill] sm:$0xff] %v10472_v23 }
 0x240   : > { %v1505_v27 = vpop.f32.mrf.mxu1 }
 0x241   : > { %v1946_v30 = vsel %vm10468_vm1, -100.0, %v1505_v27 }
 0x242   : > { %v8848_v33 = vpop.f32.mrf.mxu1  ;;  %v1957_v35 = vsel %vm1953_vm2, %v1946_v30, -inf }
 0x243   : > { %1958 = vmax.xlane.f32.xlu0 %v1957_v35  ;;  %v790_v33 = vpop.permute.xlu1 %789 }
 0x244   : > { %v10478_v37 = vpop.f32.mrf.mxu1  ;;  %v794_v54 = vrot.slane %v790_v33, %v10353_v6  ;;  %v1244_v33 = vld [vmem:[%s11752_s8] sm:$0x3] }
 0x246   : > { %v8853_v41 = vpop.f32.mrf.mxu1  ;;  %vm10503_vm5 = vcmp.ge.s32.totalorder %v10464_v59, %v794_v54 }
 0x248   : > { %v1645_v58 = vpop.f32.mrf.mxu1 }
 0x249   : > { %v1948_v62 = vsel %vm10481_vm3, -100.0, %v1645_v58 }
 0x24a   : > { %v8858_v1 = vpop.f32.mrf.mxu1  ;;  %v1963_v4 = vsel %vm1953_vm2, %v1948_v62, -inf }
 0x24b   : > { %1964 = vmax.xlane.f32.xlu1 %v1963_v4 }
 0x24c   : > { %v10489_v14 = vpop.f32.mrf.mxu1 }
 0x24e   : > { %v8863_v18 = vpop.f32.mrf.mxu1 }
 0x250   : > { %v1785_v25 = vpop.f32.mrf.mxu1 }
 0x251   : > { %v1950_v27 = vsel %vm10492_vm4, -100.0, %v1785_v25 }
 0x252   : > { %v8868_v35 = vpop.f32.mrf.mxu1  ;;  %v1969_v49 = vsel %vm1953_vm2, %v1950_v27, -inf }
 0x253   : > { %1970 = vmax.xlane.f32.xlu0 %v1969_v49  ;;  %v10510_v35 = vpop.f32.mrf.mxu0  ;;  %v11782_v49 = vsub.s32 1, %v10329_v55 }
 0x254   : > { %v10499_v41 = vpop.f32.mrf.mxu1 }
 0x255   : > { %v10516_v54 = vpop.f32.mrf.mxu0 }
 0x256   : > { %v8873_v58 = vpop.f32.mrf.mxu1 }
 0x257   : > { %v1253_v58 = vrot.slane %v1244_v33, %v11782_v49  ;;  %v1324_v51 = vpop.f32.mrf.mxu0  ;;  %v11839_v33 = vmov 0.0  }
 0x258   : > { %v1925_v4 = vpop.f32.mrf.mxu1  ;;  %v10528_v49 = vsel %vm896_vm6, 1.0, %v11839_v33 }
 0x259   : > { %v1952_v9 = vsel %vm10503_vm5, -100.0, %v1925_v4  ;;  %v10520_v0 = vadd.f32 %v1324_v51, %v1253_v58  ;;  %v10522_v4 = vpop.f32.mrf.mxu0 }
 0x25a   : > { %v1975_v18 = vsel %vm1953_vm2, %v1952_v9, -inf  ;;  %v8878_v25 = vpop.f32.mrf.mxu1 }
 0x25b   : > { %1976 = vmax.xlane.f32.xlu0 %v1975_v18  ;;  %11837 = vst [vmem:[#allocation39_spill] sm:$0xff] %v10520_v0  ;;  %v1330_v25 = vpop.f32.mrf.mxu0 }
 0x25c   : > { %v10524_v18 = vadd.f32 %v1330_v25, %v1253_v58 }
 0x25e   : > { %11838 = vst [vmem:[#allocation40_spill] sm:$0xff] %v10524_v18 }
 0x2cc   : > { %v1959_v23 = vpop.xlane.xlu0 %1958 }
 0x2cd   : > { %v1979_v8 = vsub.f32 %v1946_v30, %v1959_v23  ;;  %v10533_v30 = vpop.f32.mrf.mxu0 }
 0x2ce   : > { %11840 = vst [vmem:[#allocation41_spill] sm:$0xff] %v10533_v30 }
 0x2cf   : > { %v1988_v13 = vmul.f32 1.442695, %v1979_v8 }
 0x2d1   : > { %9468 = vpow2.f32 %v1988_v13 }
 0x2d4   : > { %v1965_v61 = vpop.xlane.xlu1 %1964 }
 0x2d5   : > { %v1981_v3 = vsub.f32 %v1948_v62, %v1965_v61 }
 0x2d7   : > { %v1992_v34 = vmul.f32 1.442695, %v1981_v3 }
 0x2d9   : > { %9470 = vpow2.f32 %v1992_v34 }
 0x2dc   : > { %v1971_v40 = vpop.xlane.xlu0 %1970 }
 0x2dd   : > { %v1983_v51 = vsub.f32 %v1950_v27, %v1971_v40  ;;  %v1336_v40 = vpop.f32.mrf.mxu0 }
 0x2de   : > { %v9469_v0 = vpop.eup %9468  ;;  %v10536_v27 = vadd.f32 %v1336_v40, %v1253_v58 }
 0x2df   : > { %v1996_v28 = vmul.f32 1.442695, %v1983_v51  ;;  %v2003_v25 = vmul.f32 %v9469_v0, %v10528_v49 }
 0x2e0   : > { %11841 = vst [vmem:[#allocation42_spill] sm:$0xff] %v10536_v27 }
 0x2e1   : > { %9472 = vpow2.f32 %v1996_v28  ;;  %v2013_v23 = vsel %vm1953_vm2, %v2003_v25, 0.0  ;;  %v10538_v28 = vpop.f32.mrf.mxu0 }
 0x2e2   : > { %2014 = vadd.xlane.f32.xlu1 %v2013_v23 }
 0x2e4   : > { %v1977_v8 = vpop.xlane.xlu0 %1976 }
 0x2e5   : > { %v1985_v13 = vsub.f32 %v1952_v9, %v1977_v8  ;;  %v1342_v9 = vpop.f32.mrf.mxu0 }
 0x2e6   : > { %v9471_v61 = vpop.eup %9470  ;;  %v10545_v8 = vadd.f32 %v1342_v9, %v1253_v58 }
 0x2e7   : > { %v2000_v3 = vmul.f32 1.442695, %v1985_v13  ;;  %v2005_v34 = vmul.f32 %v9471_v61, %v10528_v49  ;;  %v10547_v13 = vpop.f32.mrf.mxu0 }
 0x2e8   : > { %11842 = vst [vmem:[#allocation43_spill] sm:$0xff] %v10545_v8 }
 0x2e9   : > { %9474 = vpow2.f32 %v2000_v3  ;;  %v2019_v62 = vsel %vm1953_vm2, %v2005_v34, 0.0  ;;  %v1348_v61 = vpop.f32.mrf.mxu0 }
 0x2ea   : > { %2020 = vadd.xlane.f32.xlu0 %v2019_v62  ;;  %v10549_v3 = vadd.f32 %v1348_v61, %v1253_v58 }
 0x2eb   : > { %v10551_v40 = vpop.f32.mrf.mxu0 }
 0x2ec   : > { %11843 = vst [vmem:[#allocation44_spill] sm:$0xff] %v10549_v3  ;;  %v713_v3 = vrot.slane %v10341_v60, %v10338_v57 }
 0x2ee   : > { %v9473_v0 = vpop.eup %9472 }
 0x2ef   : > { %v10541_v51 = vmul.f32 %v9473_v0, %v10528_v49  ;;  %v1354_v0 = vpop.f32.mrf.mxu0 }
 0x2f0   : > { %v10558_v30 = vadd.f32 %v1354_v0, %v1253_v58  ;;  %v720_v0 = vrot.slane %v10346_v63, %v10338_v57 }
 0x2f1   : > { %v2025_v23 = vsel %vm1953_vm2, %v10541_v51, 0.0  ;;  %v10560_v9 = vpop.f32.mrf.mxu0 }
 0x2f2   : > { %2026 = vadd.xlane.f32.xlu1 %v2025_v23  ;;  %11844 = vst [vmem:[#allocation45_spill] sm:$0xff] %v10558_v30  ;;  %11845 = vst [vmem:[#allocation46_spill] sm:$0xff] %v10560_v9  ;;  %v735_v9 = vcombine.high %v713_v3, %v713_v3 }
 0x2f3   : > { %v1360_v23 = vpop.f32.mrf.mxu0 }
 0x2f4   : > { %v10562_v8 = vadd.f32 %v1360_v23, %v1253_v58 }
 0x2f5   : > { %v10564_v61 = vpop.f32.mrf.mxu0 }
 0x2f6   : > { %v9475_v62 = vpop.eup %9474  ;;  %11846 = vst [vmem:[#allocation47_spill] sm:$0xff] %v10562_v8 }
 0x2f7   : > { %v10554_v27 = vmul.f32 %v9475_v62, %v10528_v49  ;;  %v1366_v11 = vpop.f32.mrf.mxu0 }
 0x2f8   : > { %v10568_v62 = vadd.f32 %v1366_v11, %v1253_v58 }
 0x2f9   : > { %v2031_v18 = vsel %vm1953_vm2, %v10554_v27, 0.0  ;;  %v1435_v2 = vpop.f32.mrf.mxu0 }
 0x2fa   : > { %2032 = vadd.xlane.f32.xlu0 %v2031_v18  ;;  %v736_v18 = vcombine.high %v720_v0, %v720_v0 }
 0x2fb   : > { %v8843_v30 = vpop.f32.mrf.mxu0 }
 0x303   : > { %740 = vperm.xlu1 %9461, %v713_v3  }
 0x307   : > { %768 = vperm.xlu1 %9461, %v720_v0  }
 0x30b   : > { %782 = vperm.xlu1 %9461, %v736_v18  }
 0x310   : > { %754 = vperm.xlu0 %9460, %v735_v9  }
 0x36b   : > { %v2015_v23 = vpop.xlane.xlu1 %2014 }
 0x36c   : > { %9476 = vrcp.f32 %v2015_v23 }
 0x373   : > { %v2021_v8 = vpop.xlane.xlu0 %2020 }
 0x374   : > { %9478 = vrcp.f32 %v2021_v8 }
 0x379   : > { %v9477_v16 = vpop.eup %9476 }
 0x37a   : > { %v2043_v60 = vmul.f32 %v9477_v16, %v2003_v25 }
 0x37b   : > { %v2027_v38 = vpop.xlane.xlu1 %2026 }
 0x37c   : > { %9480 = vrcp.f32 %v2027_v38  ;;  %8887 = vmatmul.mubr.msk.f32.vlgmr.msra.gmra.mxu1 %vm1953_vm2, %v2043_v60 }
 0x37d   : > { %8895 = vmatpush3.msra.mxu1 %v10249_v10  ;;  %8896 = vmatprep.mubr.msk.f32.mxu1 %vm9934_vm0, %v11839_v33 }
 0x37e   : > { %8904 = vmatprep.subr.mxu1 %v11839_v33 }
 0x37f   : > { %v741_v63 = vpop.permute.xlu1 %740 }
 0x380   : > { %v745_v11 = vrot.slane %v741_v63, %v10353_v6 }
 0x381   : > { %v9479_v58 = vpop.eup %9478 }
 0x382   : > { %vm10579_vm7 = vcmp.ge.s32.totalorder %v10464_v59, %v745_v11  ;;  %v2045_v16 = vmul.f32 %v9479_v58, %v2005_v34 }
 0x383   : > { %v10585_v38 = vsel %vm10579_vm7, -100.0, %v1435_v2  ;;  %v769_v10 = vpop.permute.xlu1 %768  ;;  %v2033_v25 = vpop.xlane.xlu0 %2032 }
 0x384   : > { %v773_v8 = vrot.slane %v769_v10, %v10353_v6  ;;  %9482 = vrcp.f32 %v2033_v25  ;;  %8897 = vmatmul.mubr.msk.f32.vlgmr.msra.gmra.mxu1 %vm1953_vm2, %v2045_v16  ;;  %v1954_v3 = vsel %vm1953_vm2, %v10585_v38, -inf }
 0x385   : > { %1955 = vmax.xlane.f32.xlu0 %v1954_v3  ;;  %8905 = vmatpush3.msra.mxu1 %v10259_v19 }
 0x386   : > { %vm10593_vm8 = vcmp.ge.s32.totalorder %v10464_v59, %v773_v8  ;;  %8906 = vmatprep.mubr.msk.f32.mxu1 %vm9934_vm0, %v11839_v33  ;;  %8914 = vmatprep.subr.mxu1 %v11839_v33 }
 0x387   : > { %v783_v2 = vpop.permute.xlu1 %782  ;;  %v10603_v9 = vsel %vm10593_vm8, -100.0, %v10489_v14 }
 0x388   : > { %v787_v0 = vrot.slane %v783_v2, %v10353_v6  ;;  %v1966_v19 = vsel %vm1953_vm2, %v10603_v9, -inf }
 0x389   : > { %v9481_v18 = vpop.eup %9480  ;;  %1967 = vmax.xlane.f32.xlu0 %v1966_v19 }
 0x38a   : > { %vm10609_vm9 = vcmp.ge.s32.totalorder %v10464_v59, %v787_v0  ;;  %v2047_v60 = vmul.f32 %v9481_v18, %v10541_v51 }
 0x38b   : > { %v755_v63 = vpop.permute.xlu0 %754  ;;  %v10617_v14 = vsel %vm10609_vm9, -100.0, %v10499_v41  ;;  %v11855_v41 = vsub.s32 1, %v10329_v55 }
 0x38c   : > { %v759_v11 = vrot.slane %v755_v63, %v10353_v6  ;;  %8907 = vmatmul.mubr.msk.f32.vlgmr.msra.gmra.mxu1 %vm1953_vm2, %v2047_v60  ;;  %v1972_v58 = vsel %vm1953_vm2, %v10617_v14, -inf }
 0x38d   : > { %1973 = vmax.xlane.f32.xlu0 %v1972_v58  ;;  %8915 = vmatpush3.msra.mxu1 %v10269_v29  ;;  %v973_v51 = vrot.slane %v10358_v7, %v11855_v41 }
 0x38e   : > { %vm10625_vm10 = vcmp.ge.s32.totalorder %v10464_v59, %v759_v11  ;;  %8916 = vmatprep.mubr.msk.f32.mxu1 %vm9934_vm0, %v11839_v33  ;;  %8963 = vmatprep.subr.mxu1 %v11839_v33 }
 0x38f   : > { %v10638_v10 = vsel %vm10625_vm10, -100.0, %v10478_v37  ;;  %v1055_v3 = vadd.f32 %v10365_v12, %v973_v51  ;;  %v1061_v7 = vadd.f32 %v10369_v15, %v973_v51  ;;  %v1067_v12 = vadd.f32 %v10379_v20, %v973_v51 }
 0x390   : > { %v1960_v29 = vsel %vm1953_vm2, %v10638_v10, -inf  ;;  %v1073_v15 = vadd.f32 %v10389_v24, %v973_v51 }
 0x391   : > { %v9483_v25 = vpop.eup %9482  ;;  %1961 = vmax.xlane.f32.xlu1 %v1960_v29 }
 0x392   : > { %v2049_v8 = vmul.f32 %v9483_v25, %v10554_v27 }
 0x394   : > { %8917 = vmatmul.mubr.msk.f32.vlgmr.msra.gmra.mxu1 %vm1953_vm2, %v2049_v8 }
 0x395   : > { %8964 = vmatpush3.xpose.msra.mxu1 %v1055_v3  ;;  %8965 = vmatprep.mubr.msk.f32.mxu1 %vm9934_vm0, %v11839_v33 }
 0x396   : > { %8968 = vmatprep.subr.mxu1 %v11839_v33 }
 0x398   : > { %8966 = vmatmul.mubr.f32.vlgmr.msra.gmra.mxu1 %v10282_v42  ;;  %v1079_v42 = vadd.f32 %v10401_v31, %v973_v51 }
 0x399   : > { %8969 = vmatpush3.xpose.msra.mxu1 %v1061_v7  ;;  %8970 = vmatprep.mubr.msk.f32.mxu1 %vm9934_vm0, %v11839_v33 }
 0x39a   : > { %8973 = vmatprep.subr.mxu1 %v11839_v33 }
 0x39c   : > { %8971 = vmatmul.mubr.f32.vlgmr.msra.gmra.mxu1 %v10289_v43  ;;  %v1085_v43 = vadd.f32 %v10412_v36, %v973_v51 }
 0x39d   : > { %8974 = vmatpush3.xpose.msra.mxu1 %v1067_v12  ;;  %8975 = vmatprep.mubr.msk.f32.mxu1 %vm9934_vm0, %v11839_v33 }
 0x39e   : > { %8978 = vmatprep.subr.mxu1 %v11839_v33 }
 0x3a0   : > { %8976 = vmatmul.mubr.f32.vlgmr.msra.gmra.mxu1 %v10294_v44  ;;  %v1091_v44 = vadd.f32 %v10424_v53, %v973_v51 }
 0x3a1   : > { %8979 = vmatpush3.xpose.msra.mxu1 %v1073_v15  ;;  %8980 = vmatprep.mubr.msk.f32.mxu1 %vm9934_vm0, %v11839_v33 }
 0x3a2   : > { %8983 = vmatprep.subr.mxu1 %v11839_v33 }
 0x3a4   : > { %8981 = vmatmul.mubr.f32.vlgmr.msra.gmra.mxu1 %v10299_v45  ;;  %v1097_v45 = vadd.f32 %v10510_v35, %v973_v51  ;;  %v684_v35 = vld [vmem:[%s10695_s27] sm:$0xff] }
 0x3a5   : > { %8984 = vmatpush3.xpose.msra.mxu1 %v1079_v42  ;;  %8985 = vmatprep.mubr.msk.f32.mxu1 %vm9934_vm0, %v11839_v33  ;;  %v803_v18 = vcombine.high %v684_v35, %v684_v35 }
 0x3a6   : > { %8988 = vmatprep.subr.mxu1 %v11839_v33 }
 0x3a7   : > { %v817_v58 = vrot.slane %v803_v18, %v10338_v57 }
 0x3a8   : > { %8986 = vmatmul.mubr.f32.vlgmr.msra.gmra.mxu1 %v10304_v46 }
 0x3a9   : > { %8989 = vmatpush3.xpose.msra.mxu1 %v1085_v43  ;;  %8990 = vmatprep.mubr.msk.f32.mxu1 %vm9934_vm0, %v11839_v33 }
 0x3aa   : > { %8993 = vmatprep.subr.mxu1 %v11839_v33 }
 0x3ac   : > { %8991 = vmatmul.mubr.f32.vlgmr.msra.gmra.mxu1 %v10309_v47 }
 0x3ad   : > { %8994 = vmatpush3.xpose.msra.mxu1 %v1091_v44  ;;  %8995 = vmatprep.mubr.msk.f32.mxu1 %vm9934_vm0, %v11839_v33  ;;  %v11856_v44 = vmov 0  }
 0x3ae   : > { %8998 = vmatprep.subr.mxu1 %v11839_v33 }
 0x3b0   : > { %8996 = vmatmul.mubr.f32.vlgmr.msra.gmra.mxu1 %v10314_v48 }
 0x3b1   : > { %8999 = vmatpush3.xpose.msra.mxu1 %v1097_v45  ;;  %9000 = vmatprep.mubr.msk.f32.mxu1 %vm9934_vm0, %v11839_v33 }
 0x3b2   : > { %9003 = vmatprep.subr.mxu1 %v11839_v33 }
 0x3b4   : > { %9001 = vmatmul.mubr.f32.vlgmr.msra.gmra.mxu1 %v10319_v50 }
 0x3b5   : > { %9004 = vmatpush3.msra.mxu1 %v10237_v52  ;;  %9005 = vmatprep.mubr.msk.f32.mxu1 %vm9934_vm0, %v11839_v33 }
 0x3b6   : > { %9008 = vmatprep.subr.mxu1 %v11839_v33 }
 0x40e   : > { %v1956_v46 = vpop.xlane.xlu0 %1955 }
 0x40f   : > { %v1978_v47 = vsub.f32 %v10585_v38, %v1956_v46  ;;  %v810_v38 = vrot.slane %v684_v35, %v10338_v57 }
 0x411   : > { %v1986_v48 = vmul.f32 1.442695, %v1978_v47  ;;  %v818_v19 = vcombine.high %v810_v38, %v810_v38  ;;  %v826_v43 = vrot.slane %v810_v38, %v10338_v57 }
 0x412   : > { %v1968_v20 = vpop.xlane.xlu0 %1967 }
 0x413   : > { %9484 = vpow2.f32 %v1986_v48  ;;  %v1982_v24 = vsub.f32 %v10603_v9, %v1968_v20  ;;  %v840_v11 = vrot.slane %v818_v19, %v10338_v57  ;;  %v848_v47 = vcombine.high %v826_v43, %v826_v43 }
 0x414   : > { %v833_v48 = vrot.slane %v817_v58, %v10338_v57 }
 0x415   : > { %v1994_v31 = vmul.f32 1.442695, %v1982_v24  ;;  %v850_v51 = vcombine.high %v840_v11, %v840_v11  ;;  %v859_v46 = vrot.slane %v840_v11, %v10353_v6  ;;  %v863_v24 = vrot.slane %v848_v47, %v10353_v6 }
 0x416   : > { %v1974_v36 = vpop.xlane.xlu0 %1973 }
 0x417   : > { %9486 = vpow2.f32 %v1994_v31  ;;  %v1984_v50 = vsub.f32 %v10617_v14, %v1974_v36  ;;  %v867_v7 = vrot.slane %v850_v51, %v10353_v6  ;;  %vm885_vm13 = vcmp.ge.s32.totalorder %v10329_v55, %v859_v46 }
 0x418   : > { %v849_v31 = vcombine.high %v833_v48, %v833_v48  ;;  %vm886_vm14 = vcmp.ge.s32.totalorder %v10329_v55, %v863_v24 }
 0x419   : > { %v1998_v52 = vmul.f32 1.442695, %v1984_v50  ;;  %vm887_vm11 = vcmp.ge.s32.totalorder %v10329_v55, %v867_v7 }
 0x41a   : > { %v1962_v53 = vpop.xlane.xlu1 %1961  ;;  %v3444_v45 = vsel %vm887_vm11, 1, %v11856_v44 }
 0x41b   : > { %v1980_v37 = vsub.f32 %v10638_v10, %v1962_v53  ;;  %9488 = vpow2.f32 %v1998_v52  ;;  %v819_v10 = vcombine.high %v817_v58, %v817_v58  ;;  %v3442_v52 = vsel %vm885_vm13, 1, %v11856_v44 }
 0x41c   : > { %v879_v53 = vrot.slane %v849_v31, %v10353_v6 }
 0x41d   : > { %v1990_v27 = vmul.f32 1.442695, %v1980_v37  ;;  %v847_v12 = vrot.slane %v819_v10, %v10338_v57  ;;  %v855_v37 = vrot.slane %v826_v43, %v10353_v6 }
 0x41e   : > { %vm890_vm15 = vcmp.ge.s32.totalorder %v10329_v55, %v879_v53 }
 0x41f   : > { %9490 = vpow2.f32 %v1990_v27  ;;  %v875_v42 = vrot.slane %v847_v12, %v10353_v6  ;;  %v851_v35 = vcombine.high %v847_v12, %v847_v12  ;;  %v3443_v27 = vsel %vm886_vm14, 1, %v11856_v44 }
 0x420   : > { %v9485_v2 = vpop.eup %9484  ;;  %vm884_vm6 = vcmp.ge.s32.totalorder %v10329_v55, %v855_v37  ;;  %v3447_v19 = vsel %vm890_vm15, 1, %v11856_v44 }
 0x421   : > { %v10701_v9 = vmul.f32 %v9485_v2, %v10528_v49  ;;  %vm889_vm12 = vcmp.ge.s32.totalorder %v10329_v55, %v875_v42  ;;  %v883_v2 = vrot.slane %v851_v35, %v10353_v6  ;;  %v3441_v18 = vsel %vm884_vm6, 1, %v11856_v44 }
 0x422   : > { %v3446_v20 = vsel %vm889_vm12, 1, %v11856_v44 }
 0x423   : > { %v2010_v0 = vsel %vm1953_vm2, %v10701_v9, 0.0  ;;  %vm891_vm11 = vcmp.ge.s32.totalorder %v10329_v55, %v883_v2 }
 0x424   : > { %v9487_v60 = vpop.eup %9486  ;;  %2011 = vadd.xlane.f32.xlu1 %v2010_v0 }
 0x425   : > { %v10706_v63 = vmul.f32 %v9487_v60, %v10528_v49  ;;  %v871_v60 = vrot.slane %v833_v48, %v10353_v6 }
 0x427   : > { %v2022_v14 = vsel %vm1953_vm2, %v10706_v63, 0.0  ;;  %vm888_vm12 = vcmp.ge.s32.totalorder %v10329_v55, %v871_v60 }
 0x428   : > { %2023 = vadd.xlane.f32.xlu1 %v2022_v14  ;;  %v9489_v41 = vpop.eup %9488  ;;  %v3448_v14 = vsel %vm891_vm11, 1, %v11856_v44 }
 0x429   : > { %v10718_v3 = vmul.f32 %v9489_v41, %v10528_v49  ;;  %v3445_v41 = vsel %vm888_vm12, 1, %v11856_v44 }
 0x42b   : > { %v2028_v15 = vsel %vm1953_vm2, %v10718_v3, 0.0 }
 0x42c   : > { %v9491_v29 = vpop.eup %9490 }
 0x42d   : > { %v10713_v25 = vmul.f32 %v9491_v29, %v10528_v49 }
 0x42f   : > { %v2016_v8 = vsel %vm1953_vm2, %v10713_v25, 0.0 }
 0x430   : > { %2017 = vadd.xlane.f32.xlu0 %v2016_v8 }
 0x434   : > { %2029 = vadd.xlane.f32.xlu0 %v2028_v15 }
 0x439   : > { %3459 = vperm.xlu1 %9461, %v3444_v45  }
 0x43c   : > { %v10734_v36 = vpop.f32.mrf.mxu1 }
 0x43d   : > { %3465 = vperm.xlu1 %9461, %v3446_v20  }
 0x43e   : > { %v8888_v50 = vpop.f32.mrf.mxu1 }
 0x441   : > { %3453 = vperm.xlu1 %9461, %v3442_v52  }
 0x444   : > { %v10742_v38 = vpop.f32.mrf.mxu1 }
 0x445   : > { %3456 = vperm.xlu1 %9461, %v3443_v27  }
 0x446   : > { %v8898_v0 = vpop.f32.mrf.mxu1 }
 0x449   : > { %3468 = vperm.xlu1 %9461, %v3447_v19  }
 0x44a   : > { %3450 = vperm.xlu0 %9460, %v3441_v18  }
 0x44c   : > { %v10751_v11 = vpop.f32.mrf.mxu1 }
 0x44e   : > { %v8908_v58 = vpop.f32.mrf.mxu1  ;;  %3471 = vperm.xlu0 %9460, %v3448_v14  }
 0x452   : > { %3462 = vperm.xlu0 %9460, %v3445_v41  }
 0x454   : > { %v10755_v51 = vpop.f32.mrf.mxu1 }
 0x456   : > { %v8918_v10 = vpop.f32.mrf.mxu1 }
 0x458   : > { %v2947_v29 = vpop.f32.mrf.mxu1 }
 0x45a   : > { %v8967_v8 = vpop.f32.mrf.mxu1 }
 0x45c   : > { %v3017_v7 = vpop.f32.mrf.mxu1 }
 0x45e   : > { %v8972_v12 = vpop.f32.mrf.mxu1 }
 0x460   : > { %v3087_v15 = vpop.f32.mrf.mxu1 }
 0x462   : > { %v8977_v42 = vpop.f32.mrf.mxu1 }
 0x464   : > { %v3157_v43 = vpop.f32.mrf.mxu1 }
 0x466   : > { %v8982_v45 = vpop.f32.mrf.mxu1 }
 0x468   : > { %v10757_v46 = vpop.f32.mrf.mxu1 }
 0x46a   : > { %v8987_v47 = vpop.f32.mrf.mxu1 }
 0x46c   : > { %v3297_v48 = vpop.f32.mrf.mxu1 }
 0x46e   : > { %v8992_v20 = vpop.f32.mrf.mxu1 }
 0x470   : > { %v3367_v24 = vpop.f32.mrf.mxu1 }
 0x472   : > { %v8997_v31 = vpop.f32.mrf.mxu1 }
 0x474   : > { %v3437_v50 = vpop.f32.mrf.mxu1 }
 0x476   : > { %v9002_v52 = vpop.f32.mrf.mxu1 }
 0x4ad   : > { %v2012_v53 = vpop.xlane.xlu1 %2011 }
 0x4ae   : > { %9492 = vrcp.f32 %v2012_v53 }
 0x4b1   : > { %v2024_v37 = vpop.xlane.xlu1 %2023 }
 0x4b5   : > { %v3460_v35 = vpop.permute.xlu1 %3459 }
 0x4b6   : > { %vm3476_vm13 = vcmp.eq.s32.totalorder %v3460_v35, 1 }
 0x4b7   : > { %v3484_v27 = vsel %vm3476_vm13, -100.0, %v3157_v43  ;;  %v10774_v43 = vld [vmem:[%s10211_s28 + $0x10] sm:$0xff] }
 0x4b8   : > { %v10761_v2 = vsel %vm10481_vm3, -100.0, %v3484_v27 }
 0x4b9   : > { %v3466_v0 = vpop.permute.xlu1 %3465  ;;  %v2018_v19 = vpop.xlane.xlu0 %2017  ;;  %v3506_v18 = vsel %vm1953_vm2, %v10761_v2, -inf }
 0x4ba   : > { %vm3478_vm14 = vcmp.eq.s32.totalorder %v3466_v0, 1  ;;  %9494 = vrcp.f32 %v2018_v19  ;;  %3507 = vmax.xlane.f32.xlu0 %v3506_v18 }
 0x4bb   : > { %v9493_v60 = vpop.eup %9492  ;;  %v3486_v14 = vsel %vm3478_vm14, -100.0, %v3297_v48  ;;  %9496 = vrcp.f32 %v2024_v37 }
 0x4bc   : > { %v2042_v58 = vmul.f32 %v9493_v60, %v10701_v9  ;;  %v10768_v41 = vsel %vm10492_vm4, -100.0, %v3486_v14 }
 0x4bd   : > { %v3454_v10 = vpop.permute.xlu1 %3453  ;;  %v2030_v8 = vpop.xlane.xlu0 %2029  ;;  %v3512_v12 = vsel %vm1953_vm2, %v10768_v41, -inf }
 0x4be   : > { %vm3474_vm15 = vcmp.eq.s32.totalorder %v3454_v10, 1  ;;  %8882 = vmatmul.mubr.msk.f32.vlgmr.msra.gmra.mxu0 %vm1953_vm2, %v2042_v58  ;;  %3513 = vmax.xlane.f32.xlu0 %v3512_v12  ;;  %9498 = vrcp.f32 %v2030_v8  ;;  %v10822_v12 = vld [vmem:[%s10211_s28 + $0x30] sm:$0xff] }
 0x4bf   : > { %v3482_v42 = vsel %vm3474_vm15, -100.0, %v3017_v7  ;;  %8890 = vmatpush3.msra.mxu0 %v10774_v43  ;;  %8891 = vmatprep.mubr.msk.f32.mxu0 %vm9934_vm0, %v11839_v33  ;;  %vm899_vm15 = vcmp.lt.s32.totalorder %v10329_v55, 6 }
 0x4c0   : > { %v10781_v9 = vsel %vm10468_vm1, -100.0, %v3482_v42  ;;  %8899 = vmatprep.subr.mxu0 %v11839_v33 }
 0x4c1   : > { %v3457_v45 = vpop.permute.xlu1 %3456  ;;  %v3500_v47 = vsel %vm1953_vm2, %v10781_v9, -inf }
 0x4c2   : > { %vm3475_vm6 = vcmp.eq.s32.totalorder %v3457_v45, 1  ;;  %3501 = vmax.xlane.f32.xlu0 %v3500_v47 }
 0x4c3   : > { %v3483_v7 = vsel %vm3475_vm6, -100.0, %v3087_v15 }
 0x4c4   : > { %v10788_v48 = vsel %vm10625_vm10, -100.0, %v3483_v7  ;;  %v2649_v7 = vld [vmem:[#allocation10 + $0x78] sm:$0xff] }
 0x4c5   : > { %v3469_v20 = vpop.permute.xlu1 %3468  ;;  %v3451_v31 = vpop.permute.xlu0 %3450  ;;  %v3503_v52 = vsel %vm1953_vm2, %v10788_v48, -inf }
 0x4c6   : > { %vm3479_vm11 = vcmp.eq.s32.totalorder %v3469_v20, 1  ;;  %vm3473_vm12 = vcmp.eq.s32.totalorder %v3451_v31, 1  ;;  %3504 = vmax.xlane.f32.xlu0 %v3503_v52  ;;  %v2648_v20 = vld [vmem:[#allocation10 + $0x70] sm:$0xff]  ;;  %v2646_v31 = vld [vmem:[#allocation10 + $0x60] sm:$0xff] }
 0x4c7   : > { %v9495_v53 = vpop.eup %9494  ;;  %v3487_v37 = vsel %vm3479_vm11, -100.0, %v3367_v24  ;;  %v3481_v35 = vsel %vm3473_vm12, -100.0, %v2947_v29  ;;  %v2644_v52 = vld [vmem:[#allocation10 + $0x50] sm:$0xff] }
 0x4c8   : > { %v10794_v27 = vsel %vm10609_vm9, -100.0, %v3487_v37  ;;  %v2044_v15 = vmul.f32 %v9495_v53, %v10713_v25  ;;  %v10799_v0 = vsel %vm10579_vm7, -100.0, %v3481_v35  ;;  %v9497_v19 = vpop.eup %9496  ;;  %v10807_v25 = vld [vmem:[%s10211_s28 + $0x20] sm:$0xff]  ;;  %v2643_v53 = vld [vmem:[#allocation10 + $0x48] sm:$0xff]  ;;  %v2641_v35 = vld [vmem:[#allocation10 + $0x38] sm:$0xff] }
 0x4c9   : > { %v3472_v18 = vpop.permute.xlu0 %3471  ;;  %v3515_v60 = vsel %vm1953_vm2, %v10794_v27, -inf  ;;  %v3497_v14 = vsel %vm1953_vm2, %v10799_v0, -inf  ;;  %v2046_v24 = vmul.f32 %v9497_v19, %v10706_v63  ;;  %v2642_v37 = vld [vmem:[#allocation10 + $0x40] sm:$0xff]  ;;  %v2639_v19 = vld [vmem:[#allocation10 + $0x28] sm:$0xff] }
 0x4ca   : > { %vm3480_vm13 = vcmp.eq.s32.totalorder %v3472_v18, 1  ;;  %3516 = vmax.xlane.f32.xlu0 %v3515_v60  ;;  %8892 = vmatmul.mubr.msk.f32.vlgmr.msra.gmra.mxu0 %vm1953_vm2, %v2044_v15  ;;  %v2640_v15 = vld [vmem:[#allocation10 + $0x30] sm:$0xff]  ;;  %v2638_v18 = vld [vmem:[#allocation10 + $0x20] sm:$0xff]  ;;  %v2637_v60 = vld [vmem:[#allocation10 + $0x18] sm:$0xff] }
 0x4cb   : > { %v3488_v29 = vsel %vm3480_vm13, -100.0, %v3437_v50  ;;  %3498 = vmax.xlane.f32.xlu1 %v3497_v14  ;;  %8900 = vmatpush3.msra.mxu0 %v10807_v25  ;;  %v9499_v10 = vpop.eup %9498  ;;  %v2636_v14 = vld [vmem:[#allocation10 + $0x10] sm:$0xff] }
 0x4cc   : > { %8901 = vmatprep.mubr.msk.f32.mxu0 %vm9934_vm0, %v11839_v33  ;;  %v10815_v58 = vsel %vm10503_vm5, -100.0, %v3488_v29  ;;  %8909 = vmatprep.subr.mxu0 %v11839_v33  ;;  %v2048_v42 = vmul.f32 %v9499_v10, %v10718_v3  ;;  %v2645_v3 = vld [vmem:[#allocation10 + $0x58] sm:$0xff]  ;;  %v2635_v29 = vld [vmem:[#allocation10 + $0x8] sm:$0xff] }
 0x4cd   : > { %v3463_v8 = vpop.permute.xlu0 %3462  ;;  %v3518_v50 = vsel %vm1953_vm2, %v10815_v58, -inf }
 0x4ce   : > { %vm3477_vm14 = vcmp.eq.s32.totalorder %v3463_v8, 1  ;;  %8902 = vmatmul.mubr.msk.f32.vlgmr.msra.gmra.mxu0 %vm1953_vm2, %v2046_v24  ;;  %v2634_v24 = vld [vmem:[#allocation10] sm:$0xff] }
 0x4cf   : > { %3519 = vmax.xlane.f32.xlu1 %v3518_v50  ;;  %8910 = vmatpush3.msra.mxu0 %v10822_v12  ;;  %v3485_v63 = vsel %vm3477_vm14, -100.0, %v10757_v46  ;;  %v2647_v46 = vld [vmem:[#allocation10 + $0x68] sm:$0xff] }
 0x4d0   : > { %8911 = vmatprep.mubr.msk.f32.mxu0 %vm9934_vm0, %v11839_v33  ;;  %v10831_v45 = vsel %vm10593_vm8, -100.0, %v3485_v63  ;;  %8919 = vmatprep.subr.mxu0 %v2649_v7 }
 0x4d1   : > { %v3509_v47 = vsel %vm1953_vm2, %v10831_v45, -inf }
 0x4d2   : > { %8912 = vmatmul.mubr.msk.f32.vlgmr.msra.gmra.mxu0 %vm1953_vm2, %v2048_v42 }
 0x4d3   : > { %3510 = vmax.xlane.f32.xlu1 %v3509_v47  ;;  %8920 = vmatpush3.msra.mxu0 %v2649_v7 }
 0x4d4   : > { %8921 = vmatprep.subr.mxu0 %v2648_v20 }
 0x4d5   : > { %8922 = vmatpush3.msra.mxu0 %v2648_v20 }
 0x4d6   : > { %8923 = vmatprep.subr.mxu0 %v2647_v46 }
 0x4d7   : > { %8924 = vmatpush3.msra.mxu0 %v2647_v46 }
 0x4d8   : > { %8925 = vmatprep.subr.mxu0 %v2646_v31 }
 0x4d9   : > { %8926 = vmatpush3.msra.mxu0 %v2646_v31 }
 0x4da   : > { %8927 = vmatprep.subr.mxu0 %v2645_v3 }
 0x4db   : > { %8928 = vmatpush3.msra.mxu0 %v2645_v3 }
 0x4dc   : > { %8929 = vmatprep.subr.mxu0 %v2644_v52 }
 0x4dd   : > { %8930 = vmatpush3.msra.mxu0 %v2644_v52 }
 0x4de   : > { %8931 = vmatprep.subr.mxu0 %v2643_v53 }
 0x4df   : > { %8932 = vmatpush3.msra.mxu0 %v2643_v53 }
 0x4e0   : > { %8933 = vmatprep.subr.mxu0 %v2642_v37 }
 0x4e1   : > { %8934 = vmatpush3.msra.mxu0 %v2642_v37 }
 0x4e2   : > { %8935 = vmatprep.subr.mxu0 %v2641_v35 }
 0x4e3   : > { %8936 = vmatpush3.msra.mxu0 %v2641_v35 }
 0x4e4   : > { %8937 = vmatprep.subr.mxu0 %v2640_v15 }
 0x4e5   : > { %8938 = vmatpush3.msra.mxu0 %v2640_v15 }
 0x4e6   : > { %8939 = vmatprep.subr.mxu0 %v2639_v19 }
 0x4e7   : > { %8940 = vmatpush3.msra.mxu0 %v2639_v19 }
 0x4e8   : > { %8941 = vmatprep.subr.mxu0 %v2638_v18 }
 0x4e9   : > { %8942 = vmatpush3.msra.mxu0 %v2638_v18 }
 0x4ea   : > { %8943 = vmatprep.subr.mxu0 %v2637_v60 }
 0x4eb   : > { %8944 = vmatpush3.msra.mxu0 %v2637_v60 }
 0x4ec   : > { %8945 = vmatprep.subr.mxu0 %v2636_v14 }
 0x4ed   : > { %8946 = vmatpush3.msra.mxu0 %v2636_v14 }
 0x4ee   : > { %8947 = vmatprep.subr.mxu0 %v2635_v29 }
 0x4ef   : > { %8948 = vmatpush3.msra.mxu0 %v2635_v29 }
 0x4f0   : > { %8949 = vmatprep.subr.mxu0 %v2634_v24 }
 0x4f1   : > { %8950 = vmatpush3.msra.mxu0 %v2634_v24 }
 0x4f2   : > { %9018 = vmatprep.subr.mxu0 %v11839_v33 }
 0x543   : > { %v3508_v10 = vpop.xlane.xlu0 %3507 }
 0x544   : > { %v3524_v8 = vsub.f32 %v10761_v2, %v3508_v10 }
 0x546   : > { %v3535_v50 = vmul.f32 1.442695, %v3524_v8 }
 0x547   : > { %v3514_v63 = vpop.xlane.xlu0 %3513 }
 0x548   : > { %9500 = vpow2.f32 %v3535_v50  ;;  %v3526_v42 = vsub.f32 %v10768_v41, %v3514_v63 }
 0x54a   : > { %v3539_v47 = vmul.f32 1.442695, %v3526_v42 }
 0x54b   : > { %v3502_v7 = vpop.xlane.xlu0 %3501 }
 0x54c   : > { %9502 = vpow2.f32 %v3539_v47  ;;  %v3522_v46 = vsub.f32 %v10781_v9, %v3502_v7 }
 0x54e   : > { %v3531_v31 = vmul.f32 1.442695, %v3522_v46 }
 0x54f   : > { %v3505_v20 = vpop.xlane.xlu0 %3504 }
 0x550   : > { %v3523_v3 = vsub.f32 %v10788_v48, %v3505_v20  ;;  %9504 = vpow2.f32 %v3531_v31 }
 0x552   : > { %v3533_v41 = vmul.f32 1.442695, %v3523_v3 }
 0x553   : > { %v3517_v35 = vpop.xlane.xlu0 %3516 }
 0x554   : > { %v3499_v52 = vpop.xlane.xlu1 %3498  ;;  %v3527_v19 = vsub.f32 %v10794_v27, %v3517_v35 }
 0x555   : > { %v9501_v53 = vpop.eup %9500  ;;  %v3521_v37 = vsub.f32 %v10799_v0, %v3499_v52 }
 0x556   : > { %v10843_v2 = vmul.f32 %v9501_v53, %v10528_v49  ;;  %v3541_v29 = vmul.f32 1.442695, %v3527_v19 }
 0x557   : > { %v3529_v15 = vmul.f32 1.442695, %v3521_v37 }
 0x558   : > { %v3520_v18 = vpop.xlane.xlu1 %3519  ;;  %v3562_v9 = vsel %vm1953_vm2, %v10843_v2, 0.0 }
 0x559   : > { %v9503_v60 = vpop.eup %9502  ;;  %9506 = vpow2.f32 %v3529_v15  ;;  %v3528_v48 = vsub.f32 %v10815_v58, %v3520_v18  ;;  %3563 = vadd.xlane.f32.xlu1 %v3562_v9  ;;  %v685_v18 = vld [vmem:[%s664_s16] sm:$0xff] }
 0x55a   : > { %v10850_v0 = vmul.f32 %v9503_v60, %v10528_v49  ;;  %9508 = vpow2.f32 %v3533_v41  ;;  %v4596_v9 = vrot.slane %v685_v18, %v10338_v57 }
 0x55b   : > { %v3543_v14 = vmul.f32 1.442695, %v3528_v48  ;;  %v4589_v48 = vcombine.high %v685_v18, %v685_v18 }
 0x55c   : > { %v3511_v24 = vpop.xlane.xlu1 %3510  ;;  %v3568_v10 = vsel %vm1953_vm2, %v10850_v0, 0.0 }
 0x55d   : > { %9510 = vpow2.f32 %v3543_v14  ;;  %v3525_v27 = vsub.f32 %v10831_v45, %v3511_v24  ;;  %3569 = vadd.xlane.f32.xlu1 %v3568_v10  ;;  %v9505_v50 = vpop.eup %9504  ;;  %v4612_v14 = vrot.slane %v4596_v9, %v10338_v57  ;;  %v10893_v10 = vld [vmem:[%s10211_s28 + $0x18] sm:$0xff] }
 0x55e   : > { %9512 = vpow2.f32 %v3541_v29  ;;  %v10861_v7 = vmul.f32 %v9505_v50, %v10528_v49  ;;  %v4604_v29 = vcombine.high %v4596_v9, %v4596_v9  ;;  %v4603_v50 = vrot.slane %v4589_v48, %v10338_v57 }
 0x55f   : > { %v3537_v8 = vmul.f32 1.442695, %v3525_v27  ;;  %v4634_v27 = vcombine.high %v4612_v14, %v4612_v14 }
 0x560   : > { %v3556_v3 = vsel %vm1953_vm2, %v10861_v7, 0.0 }
 0x561   : > { %9514 = vpow2.f32 %v3537_v8  ;;  %v4626_v8 = vrot.slane %v4604_v29, %v10338_v57 }
 0x566   : > { %v9507_v58 = vpop.eup %9506 }
 0x567   : > { %v10856_v63 = vmul.f32 %v9507_v58, %v10528_v49  ;;  %v9509_v42 = vpop.eup %9508  ;;  %v4636_v58 = vcombine.high %v4626_v8, %v4626_v8 }
 0x568   : > { %v10871_v52 = vmul.f32 %v9509_v42, %v10528_v49  ;;  %v4605_v42 = vcombine.high %v4603_v50, %v4603_v50 }
 0x569   : > { %v3553_v47 = vsel %vm1953_vm2, %v10856_v63, 0.0 }
 0x56a   : > { %v9511_v20 = vpop.eup %9510  ;;  %3554 = vadd.xlane.f32.xlu0 %v3553_v47  ;;  %v3559_v15 = vsel %vm1953_vm2, %v10871_v52, 0.0 }
 0x56b   : > { %v10864_v45 = vmul.f32 %v9511_v20, %v10528_v49  ;;  %v9513_v46 = vpop.eup %9512 }
 0x56c   : > { %v10881_v41 = vmul.f32 %v9513_v46, %v10528_v49  ;;  %v4619_v46 = vrot.slane %v4603_v50, %v10338_v57 }
 0x56d   : > { %v3574_v31 = vsel %vm1953_vm2, %v10864_v45, 0.0 }
 0x56e   : > { %v9515_v53 = vpop.eup %9514  ;;  %3575 = vadd.xlane.f32.xlu1 %v3574_v31  ;;  %3557 = vadd.xlane.f32.xlu0 %v3556_v3  ;;  %v3571_v19 = vsel %vm1953_vm2, %v10881_v41, 0.0 }
 0x56f   : > { %v10874_v37 = vmul.f32 %v9515_v53, %v10528_v49 }
 0x571   : > { %v3565_v35 = vsel %vm1953_vm2, %v10874_v37, 0.0 }
 0x572   : > { %3566 = vadd.xlane.f32.xlu1 %v3565_v35  ;;  %3560 = vadd.xlane.f32.xlu0 %v3559_v15  ;;  %v4635_v35 = vcombine.high %v4619_v46, %v4619_v46 }
 0x576   : > { %3572 = vadd.xlane.f32.xlu0 %v3571_v19 }
 0x57e   : > { %v2119_v60 = vpop.f32.mrf.mxu0 }
 0x57f   : > { %8951 = vmatprep.mubr.f32.mxu0 %v2119_v60 }
 0x580   : > { %v8883_v24 = vpop.f32.mrf.mxu0  ;;  %8952 = vmatmul.mubr.f32.vlgmr.msra.gmra.mxu0 %v10734_v36  ;;  %v4633_v36 = vrot.slane %v4605_v42, %v10338_v57 }
 0x581   : > { %9019 = vmatpush3.msra.mxu0 %v10893_v10 }
 0x582   : > { %9028 = vmatprep.subr.mxu0 %v11839_v33  ;;  %v4637_v3 = vcombine.high %v4633_v36, %v4633_v36 }
 0x583   : > { %4639 = vperm.xlu1 %9461, %v4612_v14  }
 0x587   : > { %4653 = vperm.xlu1 %9461, %v4634_v27  }
 0x58a   : > { %v2265_v47 = vpop.f32.mrf.mxu0 }
 0x58b   : > { %4660 = vperm.xlu1 %9461, %v4636_v58   ;;  %8954 = vmatprep.mubr.f32.mxu0 %v2265_v47 }
 0x58c   : > { %4646 = vperm.xlu0 %9460, %v4626_v8   ;;  %v8893_v20 = vpop.f32.mrf.mxu0  ;;  %8955 = vmatmul.mubr.f32.gmra.mxu0 %v10742_v38 }
 0x58e   : > { %v2411_v31 = vpop.f32.mrf.mxu0 }
 0x58f   : > { %4674 = vperm.xlu1 %9461, %v4633_v36   ;;  %8957 = vmatprep.mubr.f32.mxu0 %v2411_v31 }
 0x590   : > { %4667 = vperm.xlu0 %9460, %v4619_v46   ;;  %v8903_v53 = vpop.f32.mrf.mxu0  ;;  %8958 = vmatmul.mubr.f32.gmra.mxu0 %v10751_v11 }
 0x592   : > { %v2557_v15 = vpop.f32.mrf.mxu0 }
 0x593   : > { %4688 = vperm.xlu1 %9461, %v4637_v3   ;;  %8960 = vmatprep.mubr.f32.mxu0 %v2557_v15 }
 0x594   : > { %4681 = vperm.xlu0 %9460, %v4635_v35   ;;  %v8913_v19 = vpop.f32.mrf.mxu0  ;;  %8961 = vmatmul.mubr.f32.gmra.mxu0 %v10755_v51 }
 0x595   : > { %9020 = vmatprep.mubr.msk.f32.mxu0 %vm9934_vm0, %v11839_v33 }
 0x5e2   : > { %v3564_v38 = vpop.xlane.xlu1 %3563 }
 0x5e3   : > { %9516 = vrcp.f32 %v3564_v38 }
 0x5e6   : > { %v3570_v18 = vpop.xlane.xlu1 %3569 }
 0x5e7   : > { %9518 = vrcp.f32 %v3570_v18 }
 0x5f0   : > { %v9517_v9 = vpop.eup %9516 }
 0x5f1   : > { %v3588_v11 = vmul.f32 %v9517_v9, %v10843_v2  ;;  %v10918_v9 = vld [vmem:[%s10211_s28 + $0x28] sm:$0xff] }
 0x5f3   : > { %v3598_v60 = vsel %vm899_vm15, %v3588_v11, 0.0  ;;  %v3555_v48 = vpop.xlane.xlu0 %3554 }
 0x5f4   : > { %v9519_v14 = vpop.eup %9518  ;;  %v3624_v29 = vsel %vm1953_vm2, %v3598_v60, 0.0  ;;  %9520 = vrcp.f32 %v3555_v48 }
 0x5f5   : > { %v3625_v51 = vrot.slane %v3624_v29, 4  ;;  %v3590_v24 = vmul.f32 %v9519_v14, %v10850_v0 }
 0x5f7   : > { %v3626_v27 = vadd.f32 %v3625_v51, %v3624_v29  ;;  %v3600_v8 = vsel %vm899_vm15, %v3590_v24, 0.0  ;;  %v3576_v50 = vpop.xlane.xlu1 %3575  ;;  %v3558_v58 = vpop.xlane.xlu0 %3557  ;;  %v10930_v24 = vld [vmem:[%s10211_s28 + $0x38] sm:$0xff] }
 0x5f8   : > { %9522 = vrcp.f32 %v3576_v50  ;;  %v3638_v2 = vsel %vm1953_vm2, %v3600_v8, 0.0 }
 0x5f9   : > { %v3627_v42 = vrot.slane %v3626_v27, 2  ;;  %9524 = vrcp.f32 %v3558_v58  ;;  %v3639_v47 = vrot.slane %v3638_v2, 4 }
 0x5fb   : > { %v3567_v36 = vpop.xlane.xlu1 %3566  ;;  %v3561_v20 = vpop.xlane.xlu0 %3560  ;;  %v3628_v46 = vadd.f32 %v3627_v42, %v3626_v27  ;;  %v3640_v31 = vadd.f32 %v3639_v47, %v3638_v2 }
 0x5fc   : > { %9526 = vrcp.f32 %v3567_v36 }
 0x5fd   : > { %9528 = vrcp.f32 %v3561_v20  ;;  %v3629_v0 = vrot.slane %v3628_v46, 1  ;;  %v3641_v3 = vrot.slane %v3640_v31, 2 }
 0x5ff   : > { %v3573_v53 = vpop.xlane.xlu0 %3572  ;;  %v3630_v35 = vadd.f32 %v3629_v0, %v3628_v46  ;;  %v3642_v15 = vadd.f32 %v3641_v3, %v3640_v31 }
 0x600   : > { %9530 = vrcp.f32 %v3573_v53 }
 0x601   : > { %v9521_v19 = vpop.eup %9520  ;;  %9021 = vmatmul.mubr.msk.f32.vlgmr.msra.gmra.mxu0 %vm1953_vm2, %v3630_v35  ;;  %v3643_v38 = vrot.slane %v3642_v15, 1 }
 0x602   : > { %v3585_v18 = vmul.f32 %v9521_v19, %v10856_v63  ;;  %9029 = vmatpush3.msra.mxu0 %v10918_v9  ;;  %9030 = vmatprep.mubr.msk.f32.mxu0 %vm9934_vm0, %v11839_v33 }
 0x603   : > { %v3644_v11 = vadd.f32 %v3643_v38, %v3642_v15  ;;  %9038 = vmatprep.subr.mxu0 %v11839_v33 }
 0x604   : > { %v3595_v60 = vsel %vm899_vm15, %v3585_v18, 0.0 }
 0x605   : > { %v9523_v48 = vpop.eup %9522  ;;  %9031 = vmatmul.mubr.msk.f32.vlgmr.msra.gmra.mxu0 %vm1953_vm2, %v3644_v11  ;;  %v3603_v14 = vsel %vm1953_vm2, %v3595_v60, 0.0 }
 0x606   : > { %v9525_v29 = vpop.eup %9524  ;;  %v3592_v63 = vmul.f32 %v9523_v48, %v10864_v45  ;;  %v3604_v51 = vrot.slane %v3603_v14, 4  ;;  %9039 = vmatpush3.msra.mxu0 %v10930_v24  ;;  %9040 = vmatprep.mubr.msk.f32.mxu0 %vm9934_vm0, %v11839_v33 }
 0x607   : > { %v3586_v27 = vmul.f32 %v9525_v29, %v10861_v7  ;;  %9078 = vmatprep.subr.mxu0 %v11839_v33 }
 0x608   : > { %v3602_v8 = vsel %vm899_vm15, %v3592_v63, 0.0  ;;  %v3605_v50 = vadd.f32 %v3604_v51, %v3603_v14  ;;  %v4640_v63 = vpop.permute.xlu1 %4639 }
 0x609   : > { %v9527_v58 = vpop.eup %9526  ;;  %v3596_v45 = vsel %vm899_vm15, %v3586_v27, 0.0  ;;  %v3652_v36 = vsel %vm1953_vm2, %v3602_v8, 0.0  ;;  %v10957_v27 = vld [vmem:[%s10211_s28 + $0x8] sm:$0xff] }
 0x60a   : > { %v9529_v2 = vpop.eup %9528  ;;  %v3589_v42 = vmul.f32 %v9527_v58, %v10874_v37  ;;  %v3606_v47 = vrot.slane %v3605_v50, 2  ;;  %v3610_v7 = vsel %vm1953_vm2, %v3596_v45, 0.0  ;;  %v3653_v53 = vrot.slane %v3652_v36, 4 }
 0x60b   : > { %v3587_v20 = vmul.f32 %v9529_v2, %v10871_v52  ;;  %v3611_v3 = vrot.slane %v3610_v7, 4 }
 0x60c   : > { %v3599_v46 = vsel %vm899_vm15, %v3589_v42, 0.0  ;;  %v3607_v31 = vadd.f32 %v3606_v47, %v3605_v50  ;;  %v3654_v52 = vadd.f32 %v3653_v53, %v3652_v36  ;;  %v4644_v42 = vrot.slane %v4640_v63, %v10353_v6  ;;  %v4654_v53 = vpop.permute.xlu1 %4653 }
 0x60d   : > { %v9531_v0 = vpop.eup %9530  ;;  %v3597_v35 = vsel %vm899_vm15, %v3587_v20, 0.0  ;;  %v3631_v19 = vsel %vm1953_vm2, %v3599_v46, 0.0  ;;  %v3612_v38 = vadd.f32 %v3611_v3, %v3610_v7  ;;  %v4647_v20 = vpop.permute.xlu0 %4646 }
 0x60e   : > { %v3591_v37 = vmul.f32 %v9531_v0, %v10881_v41  ;;  %v3608_v15 = vrot.slane %v3607_v31, 1  ;;  %v3655_v48 = vrot.slane %v3654_v52, 2  ;;  %v3617_v14 = vsel %vm1953_vm2, %v3597_v35, 0.0 }
 0x60f   : > { %v3613_v60 = vrot.slane %v3612_v38, 2  ;;  %v3632_v29 = vrot.slane %v3631_v19, 4  ;;  %v3618_v51 = vrot.slane %v3617_v14, 4  ;;  %vm4694_vm6 = vcmp.eq.s32.totalorder %v10464_v59, %v4644_v42  ;;  %v11017_v42 = vld [vmem:[%s10220_s14 + $0x18] sm:$0xff] }
 0x610   : > { %v3601_v18 = vsel %vm899_vm15, %v3591_v37, 0.0  ;;  %v3609_v11 = vadd.f32 %v3608_v15, %v3607_v31  ;;  %v3656_v50 = vadd.f32 %v3655_v48, %v3654_v52  ;;  %v10972_v52 = vld [vmem:[%s10220_s14] sm:$0xff]  ;;  %v4658_v48 = vrot.slane %v4654_v53, %v10353_v6 }
 0x611   : > { %v3645_v41 = vsel %vm1953_vm2, %v3601_v18, 0.0  ;;  %v3614_v8 = vadd.f32 %v3613_v60, %v3612_v38  ;;  %v3619_v58 = vadd.f32 %v3618_v51, %v3617_v14  ;;  %v3633_v45 = vadd.f32 %v3632_v29, %v3631_v19  ;;  %v4661_v14 = vpop.permute.xlu1 %4660  ;;  %v10985_v29 = vld [vmem:[%s10220_s14 + $0x8] sm:$0xff] }
 0x612   : > { %9006 = vmatmul.mubr.msk.f32.vlgmr.msra.gmra.mxu1 %vm1953_vm2, %v3609_v11  ;;  %v3646_v2 = vrot.slane %v3645_v41, 4  ;;  %v3657_v36 = vrot.slane %v3656_v50, 1  ;;  %v4651_v19 = vrot.slane %v4647_v20, %v10353_v6  ;;  %v8567_v18 = vsel %vm4694_vm6, 1.0, %v11839_v33 }
 0x613   : > { %9009 = vmatpush3.msra.mxu1 %v10957_v27  ;;  %9010 = vmatprep.mubr.msk.f32.mxu1 %vm9934_vm0, %v11839_v33  ;;  %v3615_v47 = vrot.slane %v3614_v8, 1  ;;  %v3620_v7 = vrot.slane %v3619_v58, 2  ;;  %v3634_v46 = vrot.slane %v3633_v45, 2  ;;  %vm4696_vm12 = vcmp.eq.s32.totalorder %v10464_v59, %v4658_v48 }
 0x614   : > { %9013 = vmatprep.subr.mxu1 %v11839_v33  ;;  %v3647_v31 = vadd.f32 %v3646_v2, %v3645_v41  ;;  %v3658_v3 = vadd.f32 %v3657_v36, %v3656_v50  ;;  %vm4695_vm11 = vcmp.eq.s32.totalorder %v10464_v59, %v4651_v19  ;;  %v11001_v50 = vld [vmem:[%s10220_s14 + $0x10] sm:$0xff]  ;;  %v11062_v19 = vld [vmem:[%s10220_s14 + $0x38] sm:$0xff] }
 0x615   : > { %v3616_v0 = vadd.f32 %v3615_v47, %v3614_v8  ;;  %v3621_v35 = vadd.f32 %v3620_v7, %v3619_v58  ;;  %v3635_v37 = vadd.f32 %v3634_v46, %v3633_v45  ;;  %v8568_v63 = vsel %vm4695_vm11, 1.0, %v11839_v33  ;;  %v11030_v7 = vld [vmem:[%s10220_s14 + $0x20] sm:$0xff] }
 0x616   : > { %v3648_v15 = vrot.slane %v3647_v31, 2  ;;  %9041 = vmatmul.mubr.msk.f32.vlgmr.msra.gmra.mxu0 %vm1953_vm2, %v3658_v3  ;;  %v4665_v8 = vrot.slane %v4661_v14, %v10353_v6  ;;  %v8569_v58 = vsel %vm4696_vm12, 1.0, %v11839_v33  ;;  %v11041_v3 = vld [vmem:[%s10220_s14 + $0x28] sm:$0xff]  ;;  %vm2863_vm12 = vcmask 1041409  }
 0x617   : > { %9011 = vmatmul.mubr.msk.f32.vlgmr.msra.gmra.mxu1 %vm1953_vm2, %v3616_v0  ;;  %v3622_v38 = vrot.slane %v3621_v35, 1  ;;  %9079 = vmatpush3.msra.mxu0 %v10972_v52 }
 0x618   : > { %9014 = vmatpush3.msra.mxu1 %v10774_v43  ;;  %9015 = vmatprep.mubr.msk.f32.mxu1 %vm9934_vm0, %v11839_v33  ;;  %v3636_v43 = vrot.slane %v3635_v37, 1  ;;  %v3649_v60 = vadd.f32 %v3648_v15, %v3647_v31  ;;  %vm4697_vm13 = vcmp.eq.s32.totalorder %v10464_v59, %v4665_v8 }
 0x619   : > { %9080 = vmatprep.mubr.msk.f32.mxu0 %vm9934_vm0, %v11839_v33  ;;  %v3623_v11 = vadd.f32 %v3622_v38, %v3621_v35  ;;  %9023 = vmatprep.subr.mxu1 %v11839_v33  ;;  %v8570_v47 = vsel %vm4697_vm13, 1.0, %v11839_v33  ;;  %v1172_v38 = vadd.f32 %v10404_v32, %v10385_v21  ;;  %vm11783_vm13 = vcmask 1042434  }
 0x61a   : > { %9083 = vmatprep.subr.mxu0 %v11839_v33  ;;  %9081 = vmatmul.mubr.msk.f32.vlgmr.msra.gmra.mxu0 %vm1953_vm2, %v8567_v18  ;;  %v3637_v51 = vadd.f32 %v3636_v43, %v3635_v37  ;;  %v3650_v41 = vrot.slane %v3649_v60, 1  ;;  %v11052_v37 = vld [vmem:[%s10220_s14 + $0x30] sm:$0xff]  ;;  %v9643_v43 = vld [vmem:[%s11752_s8] sm:$0x3] }
 0x61b   : > { %9016 = vmatmul.mubr.msk.f32.vlgmr.msra.gmra.mxu1 %vm1953_vm2, %v3623_v11  ;;  %9084 = vmatpush3.msra.mxu0 %v10985_v29  ;;  %v8554_v11 = vld [vmem:[%s11754_s10] ss:$0 sm:$0xff]  ;;  %v11082_v21 = vrot.slane %v9643_v43, %v10353_v6 }
 0x61c   : > { %9024 = vmatpush3.msra.mxu1 %v10807_v25  ;;  %9025 = vmatprep.mubr.msk.f32.mxu1 %vm9934_vm0, %v11839_v33  ;;  %v4668_v25 = vpop.permute.xlu0 %4667  ;;  %v3651_v45 = vadd.f32 %v3650_v41, %v3649_v60 }
 0x61d   : > { %9085 = vmatprep.mubr.msk.f32.mxu0 %vm9934_vm0, %v11839_v33  ;;  %9033 = vmatprep.subr.mxu1 %v11839_v33  ;;  %v4672_v2 = vrot.slane %v4668_v25, %v10353_v6  ;;  %v1329_v60 = vadd.f32 %v10522_v4, %v11082_v21  ;;  %v4259_v25 = vld [vmem:[#allocation10 + $0xf8] sm:$0xff]  ;;  %v4256_v4 = vld [vmem:[#allocation10 + $0xe0] sm:$0xff] }
 0x61e   : > { %9086 = vmatmul.mubr.msk.f32.vlgmr.msra.gmra.mxu0 %vm1953_vm2, %v8568_v63  ;;  %9088 = vmatprep.subr.mxu0 %v11839_v33  ;;  %v1323_v63 = vadd.f32 %v10516_v54, %v11082_v21  ;;  %v4255_v54 = vld [vmem:[#allocation10 + $0xd8] sm:$0xff] }
 0x61f   : > { %9026 = vmatmul.mubr.msk.f32.vlgmr.msra.gmra.mxu1 %vm1953_vm2, %v3637_v51  ;;  %9089 = vmatpush3.msra.mxu0 %v11001_v50  ;;  %vm4698_vm14 = vcmp.eq.s32.totalorder %v10464_v59, %v4672_v2 }
 0x620   : > { %9034 = vmatpush3.msra.mxu1 %v10822_v12  ;;  %9035 = vmatprep.mubr.msk.f32.mxu1 %vm9934_vm0, %v11839_v33  ;;  %v4675_v12 = vpop.permute.xlu1 %4674  ;;  %v4682_v20 = vpop.permute.xlu0 %4681  ;;  %v8571_v46 = vsel %vm4698_vm14, 1.0, %v11839_v33  ;;  %vm2867_vm14 = vcmask 1043459  }
 0x621   : > { %9090 = vmatprep.mubr.msk.f32.mxu0 %vm9934_vm0, %v11839_v33  ;;  %9093 = vmatprep.subr.mxu0 %v11839_v33  ;;  %v4679_v36 = vrot.slane %v4675_v12, %v10353_v6  ;;  %v4686_v31 = vrot.slane %v4682_v20, %v10353_v6  ;;  %v1341_v12 = vadd.f32 %v10538_v28, %v11082_v21  ;;  %v4254_v20 = vld [vmem:[#allocation10 + $0xd0] sm:$0xff]  ;;  %v4253_v28 = vld [vmem:[#allocation10 + $0xc8] sm:$0xff] }
 0x622   : > { %9091 = vmatmul.mubr.msk.f32.vlgmr.msra.gmra.mxu0 %vm1953_vm2, %v8569_v58  ;;  %9043 = vmatprep.subr.mxu1 %v11839_v33  ;;  %v4258_v58 = vld [vmem:[#allocation10 + $0xf0] sm:$0xff] }
 0x623   : > { %9036 = vmatmul.mubr.msk.f32.vlgmr.msra.gmra.mxu1 %vm1953_vm2, %v3651_v45  ;;  %9094 = vmatpush3.msra.mxu0 %v11017_v42  ;;  %vm4699_vm15 = vcmp.eq.s32.totalorder %v10464_v59, %v4679_v36  ;;  %vm4700_vm6 = vcmp.eq.s32.totalorder %v10464_v59, %v4686_v31  ;;  %v4257_v45 = vld [vmem:[#allocation10 + $0xe8] sm:$0xff] }
 0x624   : > { %9095 = vmatprep.mubr.msk.f32.mxu0 %vm9934_vm0, %v11839_v33  ;;  %9098 = vmatprep.subr.mxu0 %v11839_v33  ;;  %v4689_v0 = vpop.permute.xlu1 %4688  ;;  %v8572_v53 = vsel %vm4699_vm15, 1.0, %v11839_v33  ;;  %v8573_v15 = vsel %vm4700_vm6, 1.0, %v11839_v33  ;;  %vm2869_vm15 = vcmask 1044484   ;;  %vm2871_vm6 = vcmask 1045509  }
 0x625   : > { %9075 = vmatprep.mubr.msk.f32.mxu1 %vm9934_vm0, %v11839_v33  ;;  %v4693_v35 = vrot.slane %v4689_v0, %v10353_v6  ;;  %9044 = vmatpush3.msra.mxu1 %v4259_v25  ;;  %v1353_v0 = vadd.f32 %v10551_v40, %v11082_v21  ;;  %v1365_v40 = vadd.f32 %v10564_v61, %v11082_v21  ;;  %v4248_v61 = vld [vmem:[#allocation10 + $0xa0] sm:$0xff]  ;;  %v4246_v25 = vld [vmem:[#allocation10 + $0x90] sm:$0xff] }
 0x626   : > { %9096 = vmatmul.mubr.msk.f32.vlgmr.msra.gmra.mxu0 %vm1953_vm2, %v8570_v47  ;;  %9045 = vmatprep.subr.mxu1 %v11839_v33 }
 0x627   : > { %9099 = vmatpush3.msra.mxu0 %v11030_v7  ;;  %9100 = vmatprep.mubr.msk.f32.mxu0 %vm9934_vm0, %v11839_v33  ;;  %vm4701_vm11 = vcmp.eq.s32.totalorder %v10464_v59, %v4693_v35 }
 0x628   : > { %9103 = vmatprep.subr.mxu0 %v11839_v33  ;;  %v8574_v18 = vsel %vm4701_vm11, 1.0, %v11839_v33  ;;  %9046 = vmatpush3.msra.mxu1 %v4258_v58  ;;  %v4245_v58 = vld [vmem:[#allocation10 + $0x88] sm:$0xff]  ;;  %vm2873_vm11 = vcmask 1046534  }
 0x629   : > { %9047 = vmatprep.subr.mxu1 %v11839_v33 }
 0x62a   : > { %9101 = vmatmul.mubr.msk.f32.vlgmr.msra.gmra.mxu0 %vm1953_vm2, %v8571_v46  ;;  %9048 = vmatpush3.msra.mxu1 %v4257_v45  ;;  %v4244_v45 = vld [vmem:[#allocation10 + $0x80] sm:$0xff] }
 0x62b   : > { %9104 = vmatpush3.msra.mxu0 %v11041_v3  ;;  %9105 = vmatprep.mubr.msk.f32.mxu0 %vm9934_vm0, %v11839_v33 }
 0x62c   : > { %9108 = vmatprep.subr.mxu0 %v11839_v33  ;;  %9049 = vmatprep.subr.mxu1 %v11839_v33 }
 0x62d   : > { %9050 = vmatpush3.msra.mxu1 %v4256_v4 }
 0x62e   : > { %9106 = vmatmul.mubr.msk.f32.vlgmr.msra.gmra.mxu0 %vm1953_vm2, %v8572_v53  ;;  %9051 = vmatprep.subr.mxu1 %v11839_v33 }
 0x62f   : > { %9109 = vmatpush3.msra.mxu0 %v11052_v37  ;;  %9110 = vmatprep.mubr.msk.f32.mxu0 %vm9934_vm0, %v11839_v33 }
 0x630   : > { %9113 = vmatprep.subr.mxu0 %v11839_v33  ;;  %9052 = vmatpush3.msra.mxu1 %v4255_v54 }
 0x631   : > { %9053 = vmatprep.subr.mxu1 %v11839_v33 }
 0x632   : > { %9111 = vmatmul.mubr.msk.f32.vlgmr.msra.gmra.mxu0 %vm1953_vm2, %v8573_v15  ;;  %9054 = vmatpush3.msra.mxu1 %v4254_v20  ;;  %v1347_v15 = vadd.f32 %v10547_v13, %v11082_v21  ;;  %v4251_v13 = vld [vmem:[#allocation10 + $0xb8] sm:$0xff] }
 0x633   : > { %9114 = vmatpush3.msra.mxu0 %v11062_v19  ;;  %9115 = vmatprep.mubr.msk.f32.mxu0 %vm9934_vm0, %v11839_v33 }
 0x634   : > { %9123 = vmatprep.subr.mxu0 %v11839_v33  ;;  %9055 = vmatprep.subr.mxu1 %v11839_v33 }
 0x635   : > { %9056 = vmatpush3.msra.mxu1 %v4253_v28 }
 0x636   : > { %9116 = vmatmul.mubr.msk.f32.vlgmr.msra.gmra.mxu0 %vm1953_vm2, %v8574_v18  ;;  %9057 = vmatprep.subr.mxu1 %v11839_v33 }
 0x637   : > { %9124 = vmatpush3.xpose.msra.mxu0 %v1172_v38  ;;  %9125 = vmatprep.mubr.msk.f32.mxu0 %vm9934_vm0, %v11839_v33 }
 0x638   : > { %9133 = vmatprep.subr.mxu0 %v11839_v33 }
 0x640   : > { %v8953_v32 = vpop.f32.mrf.mxu0 }
 0x641   : > { %v2727_v48 = vadd.f32 %v8953_v32, %v8554_v11  ;;  %v4252_v32 = vld [vmem:[#allocation10 + $0xc0] sm:$0xff] }
 0x642   : > { %v2721_v14 = vpop.f32.mrf.mxu0  ;;  %9058 = vmatpush3.msra.mxu1 %v4252_v32 }
 0x643   : > { %v11088_v51 = vadd.f32 %v2727_v48, %v1329_v60  ;;  %v2722_v41 = vadd.f32 %v8554_v11, %v2721_v14  ;;  %9059 = vmatprep.subr.mxu1 %v11839_v33 }
 0x644   : > { %9060 = vmatpush3.msra.mxu1 %v4251_v13 }
 0x645   : > { %v11090_v8 = vadd.f32 %v2722_v41, %v1323_v63  ;;  %9061 = vmatprep.subr.mxu1 %v11839_v33  ;;  %v4250_v63 = vld [vmem:[#allocation10 + $0xb0] sm:$0xff]  ;;  %v4249_v41 = vld [vmem:[#allocation10 + $0xa8] sm:$0xff] }
 0x646   : > { %9062 = vmatpush3.msra.mxu1 %v4250_v63 }
 0x647   : > { %9063 = vmatprep.subr.mxu1 %v11839_v33 }
 0x648   : > { %9064 = vmatpush3.msra.mxu1 %v4249_v41 }
 0x649   : > { %9065 = vmatprep.subr.mxu1 %v11839_v33 }
 0x64a   : > { %9066 = vmatpush3.msra.mxu1 %v4248_v61 }
 0x64b   : > { %9067 = vmatprep.subr.mxu1 %v11839_v33 }
 0x64c   : > { %v8956_v2 = vpop.f32.mrf.mxu0 }
 0x64d   : > { %v2737_v47 = vadd.f32 %v8956_v2, %v8554_v11 }
 0x64e   : > { %v11097_v36 = vpop.f32.mrf.mxu0 }
 0x64f   : > { %v11100_v46 = vadd.f32 %v2737_v47, %v1341_v12 }
 0x650   : > { %v8959_v31 = vpop.f32.mrf.mxu0 }
 0x651   : > { %v2747_v53 = vadd.f32 %v8959_v31, %v8554_v11 }
 0x652   : > { %v2741_v35 = vpop.f32.mrf.mxu0 }
 0x653   : > { %v11108_v38 = vadd.f32 %v2747_v53, %v1353_v0  ;;  %v2742_v18 = vadd.f32 %v8554_v11, %v2741_v35 }
 0x654   : > { %v8962_v43 = vpop.f32.mrf.mxu0 }
 0x655   : > { %v11113_v60 = vadd.f32 %v2742_v18, %v1347_v15  ;;  %v2757_v48 = vadd.f32 %v8962_v43, %v8554_v11  ;;  %v4247_v11 = vld [vmem:[#allocation10 + $0x98] sm:$0xff] }
 0x656   : > { %9068 = vmatpush3.msra.mxu1 %v4247_v11  ;;  %v11126_v4 = vpop.f32.mrf.mxu0 }
 0x657   : > { %v11116_v14 = vadd.f32 %v2757_v48, %v1365_v40  ;;  %9069 = vmatprep.subr.mxu1 %v11839_v33 }
 0x658   : > { %9070 = vmatpush3.msra.mxu1 %v4246_v25 }
 0x659   : > { %9071 = vmatprep.subr.mxu1 %v11839_v33 }
 0x65a   : > { %9072 = vmatpush3.msra.mxu1 %v4245_v58 }
 0x65b   : > { %9073 = vmatprep.subr.mxu1 %v11839_v33 }
 0x65c   : > { %9074 = vmatpush3.msra.mxu1 %v4244_v45 }
 0x65d   : > { %9118 = vmatprep.subr.mxu1 %v11839_v33 }
 0x6c1   : > { %v3947_v2 = vpop.f32.mrf.mxu0 }
 0x6c2   : > { %v4277_v61 = vrot.slane %v3947_v2, 5 }
 0x6c3   : > { %v9022_v54 = vpop.f32.mrf.mxu0 }
 0x6c5   : > { %v4093_v12 = vpop.f32.mrf.mxu0 }
 0x6c6   : > { %v4281_v2 = vrot.slane %v4093_v12, 3 }
 0x6c7   : > { %v9032_v47 = vpop.f32.mrf.mxu0 }
 0x6d2   : > { %v3728_v20 = vpop.f32.mrf.mxu1 }
 0x6d4   : > { %v9007_v31 = vpop.f32.mrf.mxu1 }
 0x6d6   : > { %v4239_v53 = vpop.f32.mrf.mxu0 }
 0x6d7   : > { %v3801_v0 = vpop.f32.mrf.mxu1 }
 0x6d8   : > { %v9042_v28 = vpop.f32.mrf.mxu0  ;;  %v4273_v15 = vrot.slane %v3801_v0, 7 }
 0x6d9   : > { %v9012_v35 = vpop.f32.mrf.mxu1 }
 0x6da   : > { %v4787_v18 = vpop.f32.mrf.mxu0  ;;  %v4274_v48 = vsel %vm2863_vm12, %v4273_v15, %v3728_v20 }
 0x6db   : > { %v3874_v43 = vpop.f32.mrf.mxu1 }
 0x6dc   : > { %v4275_v32 = vrot.slane %v3874_v43, 6  ;;  %v9082_v40 = vpop.f32.mrf.mxu0 }
 0x6dd   : > { %v9017_v13 = vpop.f32.mrf.mxu1 }
 0x6de   : > { %v4276_v63 = vsel %vm11783_vm13, %v4275_v32, %v4274_v48  ;;  %v4860_v41 = vpop.f32.mrf.mxu0  ;;  %vm11784_vm13 = vcmask 1047559   ;;  %v11857_v13 = vld [vmem:[#allocation29_spill] sm:$0xff] }
 0x6df   : > { %v4020_v11 = vpop.f32.mrf.mxu1  ;;  %9126 = vmatmul.mubr.f32.vlgmr.msra.gmra.mxu0 %v4860_v41  ;;  %v4278_v45 = vsel %vm2867_vm14, %v4277_v61, %v4276_v63  ;;  %v11859_v41 = vld [vmem:[#allocation32_spill] sm:$0xff] }
 0x6e0   : > { %v4279_v25 = vrot.slane %v4020_v11, 4  ;;  %9134 = vmatpush3.xpose.msra.mxu0 %v10430_v56  ;;  %v9087_v58 = vpop.f32.mrf.mxu0  ;;  %9135 = vmatprep.mubr.msk.f32.mxu0 %vm9934_vm0, %v11839_v33  ;;  %v4285_v56 = vrot.slane %v4239_v53, 1  ;;  %v11860_v11 = vld [vmem:[#allocation35_spill] sm:$0xff] }
 0x6e1   : > { %v9027_v54 = vpop.f32.mrf.mxu1  ;;  %9143 = vmatprep.subr.mxu0 %v11839_v33 }
 0x6e2   : > { %v4280_v47 = vsel %vm2869_vm15, %v4279_v25, %v4278_v45  ;;  %v4933_v20 = vpop.f32.mrf.mxu0  ;;  %v11167_v45 = vld [vmem:[%s10211_s28] sm:$0xff] }
 0x6e3   : > { %v4166_v31 = vpop.f32.mrf.mxu1  ;;  %v4282_v28 = vsel %vm2871_vm6, %v4281_v2, %v4280_v47 }
 0x6e4   : > { %v4283_v0 = vrot.slane %v4166_v31, 2  ;;  %v9092_v35 = vpop.f32.mrf.mxu0 }
 0x6e5   : > { %v9037_v15 = vpop.f32.mrf.mxu1 }
 0x6e6   : > { %v4284_v43 = vsel %vm2873_vm11, %v4283_v0, %v4282_v28  ;;  %v5006_v32 = vpop.f32.mrf.mxu0 }
 0x6e7   : > { %v4286_v40 = vsel %vm11784_vm13, %v4285_v56, %v4284_v43  ;;  %9136 = vmatmul.mubr.f32.vlgmr.msra.gmra.mxu0 %v5006_v32  ;;  %vm5870_vm13 = vcmask 57344  }
 0x6e8   : > { %9076 = vmatmul.mubr.f32.vlgmr.msra.gmra.mxu1 %v4286_v40  ;;  %9144 = vmatpush3.xpose.msra.mxu0 %v10447_v5  ;;  %v9097_v48 = vpop.f32.mrf.mxu0 }
 0x6e9   : > { %9119 = vmatpush3.xpose.msra.mxu1 %v10395_v26  ;;  %9120 = vmatprep.mubr.msk.f32.mxu1 %vm9934_vm0, %v11839_v33  ;;  %v11858_v26 = vld [vmem:[#allocation37_spill] sm:$0xff] }
 0x6ea   : > { %v5079_v12 = vpop.f32.mrf.mxu0  ;;  %9128 = vmatprep.subr.mxu1 %v11839_v33  ;;  %9145 = vmatprep.mubr.msk.f32.mxu0 %vm9934_vm0, %v11839_v33 }
 0x6eb   : > { %9153 = vmatprep.subr.mxu0 %v11839_v33 }
 0x6ec   : > { %9121 = vmatmul.mubr.f32.vlgmr.msra.gmra.mxu1 %v4787_v18  ;;  %v9102_v53 = vpop.f32.mrf.mxu0 }
 0x6ed   : > { %9129 = vmatpush3.xpose.msra.mxu1 %v11857_v13  ;;  %9130 = vmatprep.mubr.msk.f32.mxu1 %vm9934_vm0, %v11839_v33 }
 0x6ee   : > { %v5152_v5 = vpop.f32.mrf.mxu0  ;;  %9138 = vmatprep.subr.mxu1 %v11839_v33 }
 0x6ef   : > { %9146 = vmatmul.mubr.f32.vlgmr.msra.gmra.mxu0 %v5152_v5 }
 0x6f0   : > { %9131 = vmatmul.mubr.f32.vlgmr.msra.gmra.mxu1 %v4933_v20  ;;  %9154 = vmatpush3.xpose.msra.mxu0 %v11858_v26  ;;  %v9107_v63 = vpop.f32.mrf.mxu0 }
 0x6f1   : > { %9139 = vmatpush3.xpose.msra.mxu1 %v11859_v41  ;;  %9140 = vmatprep.mubr.msk.f32.mxu1 %vm9934_vm0, %v11839_v33 }
 0x6f2   : > { %v5225_v18 = vpop.f32.mrf.mxu0  ;;  %9148 = vmatprep.subr.mxu1 %v11839_v33  ;;  %9155 = vmatprep.mubr.msk.f32.mxu0 %vm9934_vm0, %v11839_v33 }
 0x6f3   : > { %9163 = vmatprep.subr.mxu0 %v11839_v33 }
 0x6f4   : > { %9141 = vmatmul.mubr.f32.vlgmr.msra.gmra.mxu1 %v5079_v12  ;;  %v9112_v61 = vpop.f32.mrf.mxu0 }
 0x6f5   : > { %9149 = vmatpush3.xpose.msra.mxu1 %v11860_v11  ;;  %9150 = vmatprep.mubr.msk.f32.mxu1 %vm9934_vm0, %v11839_v33 }
 0x6f6   : > { %v5298_v25 = vpop.f32.mrf.mxu0  ;;  %9158 = vmatprep.subr.mxu1 %v11839_v33 }
 0x6f7   : > { %9156 = vmatmul.mubr.f32.vlgmr.msra.gmra.mxu0 %v5298_v25 }
 0x6f8   : > { %9151 = vmatmul.mubr.f32.vlgmr.msra.gmra.mxu1 %v5225_v18  ;;  %v9117_v58 = vpop.f32.mrf.mxu0  ;;  %9164 = vmatpush3.msra.mxu0 %v10957_v27 }
 0x6f9   : > { %9165 = vmatprep.mubr.msk.f32.mxu0 %vm9934_vm0, %v11839_v33  ;;  %9159 = vmatpush3.msra.mxu1 %v11167_v45 }
 0x6fa   : > { %9160 = vmatprep.mubr.msk.f32.mxu1 %vm9934_vm0, %v11839_v33  ;;  %9168 = vmatprep.subr.mxu1 %v11839_v33 }
 0x6fb   : > { %9173 = vmatprep.subr.mxu0 %v11839_v33 }
 0x79f   : > { %v5438_v54 = vpop.f32.mrf.mxu0 }
 0x7a0   : > { %v5863_v47 = vsel %vm10468_vm1, -100.0, %v5438_v54 }
 0x7a1   : > { %v9127_v20 = vpop.f32.mrf.mxu0  ;;  %v5874_v2 = vsel %vm5870_vm13, %v5863_v47, -inf }
 0x7a2   : > { %5875 = vmax.xlane.f32.xlu1 %v5874_v2 }
 0x7a7   : > { %v5578_v31 = vpop.f32.mrf.mxu0 }
 0x7a8   : > { %v11177_v0 = vpop.f32.mrf.mxu1  ;;  %v5865_v26 = vsel %vm10481_vm3, -100.0, %v5578_v31 }
 0x7a9   : > { %v9137_v35 = vpop.f32.mrf.mxu0  ;;  %v5880_v11 = vsel %vm5870_vm13, %v5865_v26, -inf }
 0x7aa   : > { %v9077_v56 = vpop.f32.mrf.mxu1 }
 0x7ac   : > { %v5368_v28 = vpop.f32.mrf.mxu1 }
 0x7ad   : > { %v5862_v15 = vsel %vm10579_vm7, -100.0, %v5368_v28 }
 0x7ae   : > { %v9122_v43 = vpop.f32.mrf.mxu1  ;;  %v5871_v32 = vsel %vm5870_vm13, %v5862_v15, -inf }
 0x7af   : > { %5872 = vmax.xlane.f32.xlu0 %v5871_v32  ;;  %v5718_v40 = vpop.f32.mrf.mxu0 }
 0x7b0   : > { %v5508_v48 = vpop.f32.mrf.mxu1  ;;  %v5867_v58 = vsel %vm10492_vm4, -100.0, %v5718_v40 }
 0x7b1   : > { %v9147_v12 = vpop.f32.mrf.mxu0  ;;  %v5864_v53 = vsel %vm10625_vm10, -100.0, %v5508_v48  ;;  %v5886_v56 = vsel %vm5870_vm13, %v5867_v58, -inf }
 0x7b2   : > { %v9132_v13 = vpop.f32.mrf.mxu1  ;;  %v5877_v5 = vsel %vm5870_vm13, %v5864_v53, -inf }
 0x7b3   : > { %5878 = vmax.xlane.f32.xlu0 %v5877_v5 }
 0x7b4   : > { %v5648_v63 = vpop.f32.mrf.mxu1 }
 0x7b5   : > { %v5866_v41 = vsel %vm10593_vm8, -100.0, %v5648_v63 }
 0x7b6   : > { %v9142_v18 = vpop.f32.mrf.mxu1  ;;  %v5883_v61 = vsel %vm5870_vm13, %v5866_v41, -inf }
 0x7b7   : > { %5884 = vmax.xlane.f32.xlu1 %v5883_v61  ;;  %v5858_v25 = vpop.f32.mrf.mxu0  ;;  %5881 = vmax.xlane.f32.xlu0 %v5880_v11 }
 0x7b8   : > { %v5788_v54 = vpop.f32.mrf.mxu1  ;;  %v5869_v28 = vsel %vm10503_vm5, -100.0, %v5858_v25 }
 0x7b9   : > { %v5868_v20 = vsel %vm10609_vm9, -100.0, %v5788_v54  ;;  %v9157_v2 = vpop.f32.mrf.mxu0  ;;  %v5892_v43 = vsel %vm5870_vm13, %v5869_v28, -inf }
 0x7ba   : > { %v9152_v31 = vpop.f32.mrf.mxu1  ;;  %v5889_v35 = vsel %vm5870_vm13, %v5868_v20, -inf }
 0x7bb   : > { %5890 = vmax.xlane.f32.xlu1 %v5889_v35  ;;  %5887 = vmax.xlane.f32.xlu0 %v5886_v56 }
 0x7bf   : > { %5893 = vmax.xlane.f32.xlu0 %v5892_v43 }
 0x82b   : > { %v5876_v32 = vpop.xlane.xlu1 %5875 }
 0x82c   : > { %v5896_v40 = vsub.f32 %v5863_v47, %v5876_v32 }
 0x82e   : > { %v5905_v48 = vmul.f32 1.442695, %v5896_v40 }
 0x830   : > { %9532 = vpow2.f32 %v5905_v48 }
 0x838   : > { %v5873_v12 = vpop.xlane.xlu0 %5872 }
 0x839   : > { %v5895_v13 = vsub.f32 %v5862_v15, %v5873_v12 }
 0x83b   : > { %v5903_v5 = vmul.f32 1.442695, %v5895_v13 }
 0x83c   : > { %v5879_v18 = vpop.xlane.xlu0 %5878 }
 0x83d   : > { %v9533_v63 = vpop.eup %9532  ;;  %9534 = vpow2.f32 %v5903_v5  ;;  %v5897_v61 = vsub.f32 %v5864_v53, %v5879_v18 }
 0x83e   : > { %v5920_v11 = vmul.f32 %v9533_v63, %v10528_v49 }
 0x83f   : > { %v5907_v54 = vmul.f32 1.442695, %v5897_v61 }
 0x840   : > { %v5885_v2 = vpop.xlane.xlu1 %5884  ;;  %v5930_v25 = vsel %vm5870_vm13, %v5920_v11, 0.0  ;;  %v5882_v35 = vpop.xlane.xlu0 %5881 }
 0x841   : > { %v5899_v31 = vsub.f32 %v5866_v41, %v5885_v2  ;;  %5931 = vadd.xlane.f32.xlu0 %v5930_v25  ;;  %9536 = vpow2.f32 %v5907_v54  ;;  %v5898_v47 = vsub.f32 %v5865_v26, %v5882_v35 }
 0x843   : > { %v5911_v56 = vmul.f32 1.442695, %v5899_v31  ;;  %v5909_v43 = vmul.f32 1.442695, %v5898_v47 }
 0x844   : > { %v5891_v32 = vpop.xlane.xlu1 %5890  ;;  %v5888_v40 = vpop.xlane.xlu0 %5887 }
 0x845   : > { %9538 = vpow2.f32 %v5911_v56  ;;  %v5901_v15 = vsub.f32 %v5868_v20, %v5891_v32  ;;  %v5900_v48 = vsub.f32 %v5867_v58, %v5888_v40 }
 0x846   : > { %9540 = vpow2.f32 %v5909_v43 }
 0x847   : > { %v5915_v53 = vmul.f32 1.442695, %v5901_v15  ;;  %v5913_v12 = vmul.f32 1.442695, %v5900_v48 }
 0x848   : > { %v5894_v13 = vpop.xlane.xlu0 %5893 }
 0x849   : > { %9542 = vpow2.f32 %v5915_v53  ;;  %v5902_v63 = vsub.f32 %v5869_v28, %v5894_v13 }
 0x84a   : > { %v9535_v5 = vpop.eup %9534  ;;  %9544 = vpow2.f32 %v5913_v12 }
 0x84b   : > { %v5919_v41 = vmul.f32 %v9535_v5, %v10528_v49  ;;  %v5917_v18 = vmul.f32 1.442695, %v5902_v63 }
 0x84d   : > { %v5927_v26 = vsel %vm5870_vm13, %v5919_v41, 0.0  ;;  %9546 = vpow2.f32 %v5917_v18 }
 0x84e   : > { %5928 = vadd.xlane.f32.xlu1 %v5927_v26  ;;  %v9537_v61 = vpop.eup %9536 }
 0x84f   : > { %v5921_v20 = vmul.f32 %v9537_v61, %v10528_v49 }
 0x851   : > { %v5933_v58 = vsel %vm5870_vm13, %v5921_v20, 0.0 }
 0x852   : > { %v9539_v54 = vpop.eup %9538  ;;  %5934 = vadd.xlane.f32.xlu1 %v5933_v58 }
 0x853   : > { %v9541_v2 = vpop.eup %9540  ;;  %v5923_v25 = vmul.f32 %v9539_v54, %v10528_v49 }
 0x854   : > { %v5922_v31 = vmul.f32 %v9541_v2, %v10528_v49 }
 0x855   : > { %v5939_v28 = vsel %vm5870_vm13, %v5923_v25, 0.0 }
 0x856   : > { %v9543_v35 = vpop.eup %9542  ;;  %v5936_v47 = vsel %vm5870_vm13, %v5922_v31, 0.0  ;;  %5940 = vadd.xlane.f32.xlu1 %v5939_v28 }
 0x857   : > { %v9545_v56 = vpop.eup %9544  ;;  %5937 = vadd.xlane.f32.xlu0 %v5936_v47  ;;  %v5925_v43 = vmul.f32 %v9543_v35, %v10528_v49 }
 0x858   : > { %v11212_v32 = vmul.f32 %v9545_v56, %v10528_v49 }
 0x859   : > { %v5945_v15 = vsel %vm5870_vm13, %v5925_v43, 0.0 }
 0x85a   : > { %v5942_v40 = vsel %vm5870_vm13, %v11212_v32, 0.0  ;;  %v9547_v48 = vpop.eup %9546  ;;  %5946 = vadd.xlane.f32.xlu1 %v5945_v15  ;;  %v980_v15 = vsub.s32 3, %v10329_v55 }
 0x85b   : > { %5943 = vadd.xlane.f32.xlu0 %v5942_v40  ;;  %v11218_v53 = vmul.f32 %v9547_v48, %v10528_v49  ;;  %v11238_v40 = vld [vmem:[%s10211_s28 + $0x20] sm:$0xff] }
 0x85d   : > { %v5948_v12 = vsel %vm5870_vm13, %v11218_v53, 0.0  ;;  %vm11869_vm13 = vcmask 1042434  }
 0x85f   : > { %5949 = vadd.xlane.f32.xlu0 %v5948_v12 }
 0x8ca   : > { %v5932_v13 = vpop.xlane.xlu0 %5931 }
 0x8cb   : > { %9548 = vrcp.f32 %v5932_v13 }
 0x8d7   : > { %v5929_v5 = vpop.xlane.xlu1 %5928 }
 0x8d8   : > { %v9549_v63 = vpop.eup %9548  ;;  %9550 = vrcp.f32 %v5929_v5 }
 0x8d9   : > { %v5960_v18 = vmul.f32 %v9549_v63, %v5920_v11 }
 0x8db   : > { %9166 = vmatmul.mubr.msk.f32.vlgmr.msra.gmra.mxu0 %vm1953_vm2, %v5960_v18  ;;  %v5935_v26 = vpop.xlane.xlu1 %5934  ;;  %v11250_v18 = vld [vmem:[%s10211_s28 + $0x30] sm:$0xff] }
 0x8dc   : > { %9174 = vmatpush3.msra.mxu0 %v10893_v10  ;;  %9175 = vmatprep.mubr.msk.f32.mxu0 %vm9934_vm0, %v11839_v33  ;;  %9552 = vrcp.f32 %v5935_v26  ;;  %v11229_v10 = vld [vmem:[%s10211_s28 + $0x10] sm:$0xff] }
 0x8dd   : > { %9183 = vmatprep.subr.mxu0 %v11839_v33 }
 0x8df   : > { %v5941_v61 = vpop.xlane.xlu1 %5940 }
 0x8e0   : > { %v5938_v54 = vpop.xlane.xlu0 %5937  ;;  %9554 = vrcp.f32 %v5941_v61  ;;  %v11861_v61 = vld [vmem:[#allocation27_spill] sm:$0xff] }
 0x8e1   : > { %9556 = vrcp.f32 %v5938_v54 }
 0x8e3   : > { %v5947_v58 = vpop.xlane.xlu1 %5946 }
 0x8e4   : > { %v5944_v2 = vpop.xlane.xlu0 %5943  ;;  %9558 = vrcp.f32 %v5947_v58 }
 0x8e5   : > { %v9551_v28 = vpop.eup %9550  ;;  %9560 = vrcp.f32 %v5944_v2 }
 0x8e6   : > { %v5959_v11 = vmul.f32 %v9551_v28, %v5919_v41 }
 0x8e8   : > { %v5950_v35 = vpop.xlane.xlu0 %5949  ;;  %9161 = vmatmul.mubr.msk.f32.vlgmr.msra.gmra.mxu1 %vm1953_vm2, %v5959_v11  ;;  %v11865_v11 = vld [vmem:[#allocation31_spill] sm:$0xff] }
 0x8e9   : > { %9562 = vrcp.f32 %v5950_v35  ;;  %9169 = vmatpush3.msra.mxu1 %v11229_v10  ;;  %9170 = vmatprep.mubr.msk.f32.mxu1 %vm9934_vm0, %v11839_v33  ;;  %v9553_v47 = vpop.eup %9552 }
 0x8ea   : > { %9178 = vmatprep.subr.mxu1 %v11839_v33  ;;  %v5961_v56 = vmul.f32 %v9553_v47, %v5921_v20  ;;  %v9647_v20 = vld [vmem:[%s11750_s6] sm:$0xf] }
 0x8eb   : > { %v981_v13 = vrot.slane %v9647_v20, %v980_v15 }
 0x8ec   : > { %9171 = vmatmul.mubr.msk.f32.vlgmr.msra.gmra.mxu1 %vm1953_vm2, %v5961_v56  ;;  %v11867_v56 = vld [vmem:[#allocation34_spill] sm:$0xff] }
 0x8ed   : > { %v9555_v41 = vpop.eup %9554  ;;  %9179 = vmatpush3.msra.mxu1 %v11238_v40  ;;  %9180 = vmatprep.mubr.msk.f32.mxu1 %vm9934_vm0, %v11839_v33  ;;  %v1168_v54 = vadd.f32 %v11861_v61, %v981_v13  ;;  %v1186_v35 = vadd.f32 %v11865_v11, %v981_v13  ;;  %v1198_v15 = vadd.f32 %v11867_v56, %v981_v13 }
 0x8ee   : > { %v9557_v48 = vpop.eup %9556  ;;  %v5963_v12 = vmul.f32 %v9555_v41, %v5923_v25  ;;  %9188 = vmatprep.subr.mxu1 %v11839_v33 }
 0x8ef   : > { %v5962_v5 = vmul.f32 %v9557_v48, %v5922_v31 }
 0x8f0   : > { %9181 = vmatmul.mubr.msk.f32.vlgmr.msra.gmra.mxu1 %vm1953_vm2, %v5963_v12 }
 0x8f1   : > { %v9559_v63 = vpop.eup %9558  ;;  %9176 = vmatmul.mubr.msk.f32.vlgmr.msra.gmra.mxu0 %vm1953_vm2, %v5962_v5  ;;  %9189 = vmatpush3.msra.mxu1 %v11250_v18 }
 0x8f2   : > { %v9561_v26 = vpop.eup %9560  ;;  %9184 = vmatpush3.msra.mxu0 %v10918_v9  ;;  %9185 = vmatprep.mubr.msk.f32.mxu0 %vm9934_vm0, %v11839_v33  ;;  %v5965_v25 = vmul.f32 %v9559_v63, %v5925_v43  ;;  %v11862_v43 = vld [vmem:[#allocation30_spill] sm:$0xff] }
 0x8f3   : > { %9190 = vmatprep.mubr.msk.f32.mxu1 %vm9934_vm0, %v11839_v33  ;;  %9198 = vmatprep.subr.mxu1 %v11839_v33  ;;  %v5964_v31 = vmul.f32 %v9561_v26, %v11212_v32  ;;  %v1180_v2 = vadd.f32 %v11862_v43, %v981_v13  ;;  %v11863_v32 = vld [vmem:[#allocation28_spill] sm:$0xff] }
 0x8f4   : > { %9191 = vmatmul.mubr.msk.f32.vlgmr.msra.gmra.mxu1 %vm1953_vm2, %v5965_v25  ;;  %9193 = vmatprep.subr.mxu0 %v11839_v33  ;;  %v1174_v28 = vadd.f32 %v11863_v32, %v981_v13 }
 0x8f5   : > { %9186 = vmatmul.mubr.msk.f32.vlgmr.msra.gmra.mxu0 %vm1953_vm2, %v5964_v31  ;;  %9199 = vmatpush3.xpose.msra.mxu1 %v1168_v54 }
 0x8f6   : > { %v9563_v58 = vpop.eup %9562  ;;  %9194 = vmatpush3.msra.mxu0 %v10930_v24  ;;  %9195 = vmatprep.mubr.msk.f32.mxu0 %vm9934_vm0, %v11839_v33  ;;  %v11864_v24 = vld [vmem:[#allocation33_spill] sm:$0xff] }
 0x8f7   : > { %v5966_v9 = vmul.f32 %v9563_v58, %v11218_v53  ;;  %9200 = vmatprep.mubr.msk.f32.mxu1 %vm9934_vm0, %v11839_v33  ;;  %9203 = vmatprep.subr.mxu0 %v11839_v33  ;;  %v1192_v53 = vadd.f32 %v11864_v24, %v981_v13 }
 0x8f8   : > { %9208 = vmatprep.subr.mxu1 %v11839_v33  ;;  %9201 = vmatmul.mubr.f32.vlgmr.msra.gmra.mxu1 %v10972_v52  ;;  %v11866_v52 = vld [vmem:[#allocation36_spill] sm:$0xff] }
 0x8f9   : > { %9196 = vmatmul.mubr.msk.f32.vlgmr.msra.gmra.mxu0 %vm1953_vm2, %v5966_v9  ;;  %9209 = vmatpush3.xpose.msra.mxu1 %v1180_v2  ;;  %v1204_v47 = vadd.f32 %v11866_v52, %v981_v13 }
 0x8fa   : > { %9204 = vmatpush3.xpose.msra.mxu0 %v1174_v28  ;;  %9205 = vmatprep.mubr.msk.f32.mxu0 %vm9934_vm0, %v11839_v33 }
 0x8fb   : > { %9210 = vmatprep.mubr.msk.f32.mxu1 %vm9934_vm0, %v11839_v33  ;;  %9213 = vmatprep.subr.mxu0 %v11839_v33 }
 0x8fc   : > { %9218 = vmatprep.subr.mxu1 %v11839_v33  ;;  %9211 = vmatmul.mubr.f32.vlgmr.msra.gmra.mxu1 %v11001_v50 }
 0x8fd   : > { %9206 = vmatmul.mubr.f32.vlgmr.msra.gmra.mxu0 %v10985_v29  ;;  %9219 = vmatpush3.xpose.msra.mxu1 %v1192_v53  ;;  %v11868_v29 = vld [vmem:[#allocation38_spill] sm:$0xff] }
 0x8fe   : > { %9214 = vmatpush3.xpose.msra.mxu0 %v1186_v35  ;;  %9215 = vmatprep.mubr.msk.f32.mxu0 %vm9934_vm0, %v11839_v33  ;;  %v1210_v50 = vadd.f32 %v11868_v29, %v981_v13 }
 0x8ff   : > { %9220 = vmatprep.mubr.msk.f32.mxu1 %vm9934_vm0, %v11839_v33  ;;  %9223 = vmatprep.subr.mxu0 %v11839_v33 }
 0x900   : > { %9228 = vmatprep.subr.mxu1 %v11839_v33  ;;  %9221 = vmatmul.mubr.f32.vlgmr.msra.gmra.mxu1 %v11030_v7 }
 0x901   : > { %9216 = vmatmul.mubr.f32.vlgmr.msra.gmra.mxu0 %v11017_v42  ;;  %9229 = vmatpush3.xpose.msra.mxu1 %v1204_v47 }
 0x902   : > { %9224 = vmatpush3.xpose.msra.mxu0 %v1198_v15  ;;  %9225 = vmatprep.mubr.msk.f32.mxu0 %vm9934_vm0, %v11839_v33 }
 0x903   : > { %9230 = vmatprep.mubr.msk.f32.mxu1 %vm9934_vm0, %v11839_v33  ;;  %9233 = vmatprep.subr.mxu0 %v11839_v33 }
 0x904   : > { %9231 = vmatmul.mubr.f32.vlgmr.msra.gmra.mxu1 %v11052_v37  ;;  %9238 = vmatprep.subr.mxu1 %v11839_v33 }
 0x905   : > { %9226 = vmatmul.mubr.f32.vlgmr.msra.gmra.mxu0 %v11041_v3  ;;  %9239 = vmatpush3.msra.mxu1 %v11167_v45 }
 0x906   : > { %9234 = vmatpush3.xpose.msra.mxu0 %v1210_v50  ;;  %9235 = vmatprep.mubr.msk.f32.mxu0 %vm9934_vm0, %v11839_v33 }
 0x907   : > { %9240 = vmatprep.mubr.msk.f32.mxu1 %vm9934_vm0, %v11839_v33  ;;  %9243 = vmatprep.subr.mxu0 %v11839_v33 }
 0x908   : > { %9248 = vmatprep.subr.mxu1 %v11839_v33 }
 0x909   : > { %9236 = vmatmul.mubr.f32.vlgmr.msra.gmra.mxu0 %v11062_v19 }
 0x90a   : > { %9244 = vmatpush3.msra.mxu0 %v10957_v27  ;;  %9245 = vmatprep.mubr.msk.f32.mxu0 %vm9934_vm0, %v11839_v33 }
 0x90b   : > { %9253 = vmatprep.subr.mxu0 %v11839_v33 }
 0x99b   : > { %v6109_v42 = vpop.f32.mrf.mxu0 }
 0x99c   : > { %v7964_v3 = vrot.slane %v6109_v42, 7 }
 0x99d   : > { %v9167_v7 = vpop.f32.mrf.mxu0 }
 0x9a8   : > { %v6036_v37 = vpop.f32.mrf.mxu1 }
 0x9a9   : > { %v7965_v45 = vsel %vm2863_vm12, %v7964_v3, %v6036_v37 }
 0x9aa   : > { %v9162_v41 = vpop.f32.mrf.mxu1 }
 0x9ac   : > { %v6182_v48 = vpop.f32.mrf.mxu1 }
 0x9ad   : > { %v7966_v12 = vrot.slane %v6182_v48, 6 }
 0x9ae   : > { %v9172_v20 = vpop.f32.mrf.mxu1 }
 0x9af   : > { %v7967_v13 = vsel %vm11869_vm13, %v7966_v12, %v7965_v45  ;;  %vm11870_vm13 = vcmask 1047559  }
 0x9b0   : > { %v6328_v19 = vpop.f32.mrf.mxu1 }
 0x9b1   : > { %v6255_v5 = vpop.f32.mrf.mxu0  ;;  %v7970_v27 = vrot.slane %v6328_v19, 4 }
 0x9b2   : > { %v7968_v63 = vrot.slane %v6255_v5, 5  ;;  %v9182_v26 = vpop.f32.mrf.mxu1 }
 0x9b3   : > { %v9177_v25 = vpop.f32.mrf.mxu0 }
 0x9b4   : > { %v7969_v61 = vsel %vm2867_vm14, %v7968_v63, %v7967_v13  ;;  %v6474_v54 = vpop.f32.mrf.mxu1 }
 0x9b5   : > { %v7971_v31 = vsel %vm2869_vm15, %v7970_v27, %v7969_v61  ;;  %v6401_v58 = vpop.f32.mrf.mxu0  ;;  %v7974_v9 = vrot.slane %v6474_v54, 2 }
 0x9b6   : > { %v7972_v43 = vrot.slane %v6401_v58, 3  ;;  %v9192_v2 = vpop.f32.mrf.mxu1 }
 0x9b7   : > { %v9187_v32 = vpop.f32.mrf.mxu0 }
 0x9b8   : > { %v7973_v28 = vsel %vm2871_vm6, %v7972_v43, %v7971_v31  ;;  %v6617_v24 = vpop.f32.mrf.mxu1 }
 0x9b9   : > { %v7975_v53 = vsel %vm2873_vm11, %v7974_v9, %v7973_v28  ;;  %v6547_v11 = vpop.f32.mrf.mxu0  ;;  %v7111_v35 = vsel %vm10579_vm7, -100.0, %v6617_v24  ;;  %v4355_v28 = vadd.f32 %v8565_v17, %v11177_v0 }
 0x9ba   : > { %v7976_v52 = vrot.slane %v6547_v11, 1  ;;  %v9202_v47 = vpop.f32.mrf.mxu1  ;;  %v7119_v56 = vsel %vm1953_vm2, %v7111_v35, -inf }
 0x9bb   : > { %v9197_v15 = vpop.f32.mrf.mxu0  ;;  %7120 = vmax.xlane.f32.xlu1 %v7119_v56  ;;  %v4366_v47 = vrot.slane %v4355_v28, %v10338_v57 }
 0x9bc   : > { %v6757_v29 = vpop.f32.mrf.mxu1  ;;  %v11327_v50 = vsel %vm11870_vm13, %v7976_v52, %v7975_v53 }
 0x9bd   : > { %v6687_v42 = vpop.f32.mrf.mxu0  ;;  %v7113_v7 = vsel %vm10625_vm10, -100.0, %v6757_v29 }
 0x9be   : > { %v7112_v3 = vsel %vm10468_vm1, -100.0, %v6687_v42  ;;  %v9212_v37 = vpop.f32.mrf.mxu1  ;;  %v7125_v30 = vsel %vm1953_vm2, %v7113_v7, -inf  ;;  %vm11882_vm1 = vmmov %vm11870_vm13 }
 0x9bf   : > { %v9207_v45 = vpop.f32.mrf.mxu0  ;;  %7126 = vmax.xlane.f32.xlu1 %v7125_v30  ;;  %v7122_v41 = vsel %vm1953_vm2, %v7112_v3, -inf }
 0x9c0   : > { %7123 = vmax.xlane.f32.xlu0 %v7122_v41  ;;  %v6897_v48 = vpop.f32.mrf.mxu1  ;;  %v4382_v45 = vrot.slane %v4366_v47, %v10338_v57 }
 0x9c1   : > { %v6827_v12 = vpop.f32.mrf.mxu0  ;;  %v7115_v20 = vsel %vm10593_vm8, -100.0, %v6897_v48  ;;  %v4374_v48 = vcombine.high %v4366_v47, %v4366_v47 }
 0x9c2   : > { %v7114_v16 = vsel %vm10481_vm3, -100.0, %v6827_v12  ;;  %v9222_v13 = vpop.f32.mrf.mxu1  ;;  %v7131_v22 = vsel %vm1953_vm2, %v7115_v20, -inf }
 0x9c3   : > { %v9217_v19 = vpop.f32.mrf.mxu0  ;;  %7132 = vmax.xlane.f32.xlu1 %v7131_v22  ;;  %v7128_v5 = vsel %vm1953_vm2, %v7114_v16, -inf }
 0x9c4   : > { %7129 = vmax.xlane.f32.xlu0 %v7128_v5  ;;  %v7037_v27 = vpop.f32.mrf.mxu1  ;;  %v4404_v19 = vcombine.high %v4382_v45, %v4382_v45 }
 0x9c5   : > { %v6967_v63 = vpop.f32.mrf.mxu0  ;;  %v7117_v26 = vsel %vm10609_vm9, -100.0, %v7037_v27 }
 0x9c6   : > { %v7116_v34 = vsel %vm10492_vm4, -100.0, %v6967_v63  ;;  %v7137_v25 = vsel %vm1953_vm2, %v7117_v26, -inf  ;;  %v9232_v39 = vpop.f32.mrf.mxu1 }
 0x9c7   : > { %v9227_v61 = vpop.f32.mrf.mxu0  ;;  %7138 = vmax.xlane.f32.xlu1 %v7137_v25  ;;  %v7134_v54 = vsel %vm1953_vm2, %v7116_v34, -inf }
 0x9c8   : > { %7135 = vmax.xlane.f32.xlu0 %v7134_v54 }
 0x9c9   : > { %v7107_v31 = vpop.f32.mrf.mxu0 }
 0x9ca   : > { %v7118_v58 = vsel %vm10503_vm5, -100.0, %v7107_v31 }
 0x9cb   : > { %v7140_v9 = vsel %vm1953_vm2, %v7118_v58, -inf  ;;  %v9237_v43 = vpop.f32.mrf.mxu0 }
 0x9cc   : > { %7141 = vmax.xlane.f32.xlu0 %v7140_v9 }
 0xa44   : > { %v7121_v23 = vpop.xlane.xlu1 %7120 }
 0xa45   : > { %v7143_v2 = vsub.f32 %v7111_v35, %v7121_v23  ;;  %v4359_v35 = vcombine.high %v4355_v28, %v4355_v28 }
 0xa47   : > { %v7151_v32 = vmul.f32 1.442695, %v7143_v2  ;;  %v4373_v22 = vrot.slane %v4359_v35, %v10338_v57 }
 0xa48   : > { %v7127_v24 = vpop.xlane.xlu1 %7126 }
 0xa49   : > { %9564 = vpow2.f32 %v7151_v32  ;;  %v7145_v53 = vsub.f32 %v7113_v7, %v7127_v24  ;;  %v7124_v11 = vpop.xlane.xlu0 %7123  ;;  %v4375_v39 = vcombine.high %v4373_v22, %v4373_v22 }
 0xa4a   : > { %v7144_v52 = vsub.f32 %v7112_v3, %v7124_v11 }
 0xa4b   : > { %v7155_v1 = vmul.f32 1.442695, %v7145_v53  ;;  %v4403_v17 = vrot.slane %v4375_v39, %v10338_v57 }
 0xa4c   : > { %v7153_v56 = vmul.f32 1.442695, %v7144_v52  ;;  %v7133_v15 = vpop.xlane.xlu1 %7132 }
 0xa4d   : > { %9566 = vpow2.f32 %v7155_v1  ;;  %v7147_v29 = vsub.f32 %v7115_v20, %v7133_v15  ;;  %v7130_v42 = vpop.xlane.xlu0 %7129  ;;  %v4407_v1 = vcombine.high %v4403_v17, %v4403_v17 }
 0xa4e   : > { %9568 = vpow2.f32 %v7153_v56  ;;  %v7146_v37 = vsub.f32 %v7114_v16, %v7130_v42  ;;  %v4396_v16 = vrot.slane %v4374_v48, %v10338_v57 }
 0xa4f   : > { %v7159_v30 = vmul.f32 1.442695, %v7147_v29 }
 0xa50   : > { %v7157_v0 = vmul.f32 1.442695, %v7146_v37  ;;  %v7139_v41 = vpop.xlane.xlu1 %7138  ;;  %v4406_v61 = vcombine.high %v4396_v16, %v4396_v16 }
 0xa51   : > { %9570 = vpow2.f32 %v7159_v30  ;;  %v7149_v7 = vsub.f32 %v7117_v26, %v7139_v41  ;;  %v7136_v3 = vpop.xlane.xlu0 %7135  ;;  %v4389_v26 = vrot.slane %v4373_v22, %v10338_v57 }
 0xa52   : > { %9572 = vpow2.f32 %v7157_v0  ;;  %v7148_v12 = vsub.f32 %v7116_v34, %v7136_v3  ;;  %v4424_v0 = vld [vmem:[%s11755_s11] sm:$0xff] }
 0xa53   : > { %v7163_v13 = vmul.f32 1.442695, %v7149_v7  ;;  %9574 = vtanh.f32 %v4382_v45 }
 0xa54   : > { %v7161_v20 = vmul.f32 1.442695, %v7148_v12 }
 0xa55   : > { %9576 = vpow2.f32 %v7163_v13  ;;  %v7142_v5 = vpop.xlane.xlu0 %7141 }
 0xa56   : > { %v9565_v27 = vpop.eup %9564  ;;  %9578 = vpow2.f32 %v7161_v20  ;;  %v7150_v63 = vsub.f32 %v7118_v58, %v7142_v5  ;;  %v4405_v58 = vcombine.high %v4389_v26, %v4389_v26 }
 0xa57   : > { %v11359_v25 = vmul.f32 %v9565_v27, %v10528_v49  ;;  %9580 = vtanh.f32 %v4404_v19 }
 0xa58   : > { %v7165_v34 = vmul.f32 1.442695, %v7150_v63  ;;  %9582 = vtanh.f32 %v4396_v16 }
 0xa59   : > { %v7175_v54 = vsel %vm1953_vm2, %v11359_v25, 0.0 }
 0xa5a   : > { %v9567_v31 = vpop.eup %9566  ;;  %9584 = vpow2.f32 %v7165_v34  ;;  %7176 = vadd.xlane.f32.xlu1 %v7175_v54  ;;  %v11871_v54 = vld [vmem:[#allocation41_spill] sm:$0xff] }
 0xa5b   : > { %v9569_v9 = vpop.eup %9568  ;;  %v11365_v43 = vmul.f32 %v9567_v31, %v10528_v49  ;;  %9586 = vtanh.f32 %v4389_v26  ;;  %v1335_v31 = vadd.f32 %v11871_v54, %v11082_v21 }
 0xa5c   : > { %v11368_v23 = vmul.f32 %v9569_v9, %v10528_v49  ;;  %9588 = vtanh.f32 %v4406_v61 }
 0xa5d   : > { %v7181_v2 = vsel %vm1953_vm2, %v11365_v43, 0.0  ;;  %9590 = vtanh.f32 %v4405_v58 }
 0xa5e   : > { %v9571_v32 = vpop.eup %9570  ;;  %7182 = vadd.xlane.f32.xlu1 %v7181_v2  ;;  %v7178_v28 = vsel %vm1953_vm2, %v11368_v23, 0.0  ;;  %9592 = vtanh.f32 %v4403_v17 }
 0xa5f   : > { %v9573_v24 = vpop.eup %9572  ;;  %7179 = vadd.xlane.f32.xlu0 %v7178_v28  ;;  %v11376_v53 = vmul.f32 %v9571_v32, %v10528_v49  ;;  %9594 = vtanh.f32 %v4407_v1 }
 0xa60   : > { %v11379_v11 = vmul.f32 %v9573_v24, %v10528_v49  ;;  %v9575_v52 = vpop.eup %9574  ;;  %9596 = vtanh.f32 %v11090_v8 }
 0xa61   : > { %v7187_v47 = vsel %vm1953_vm2, %v11376_v53, 0.0  ;;  %v4436_v30 = vrot.slane %v9575_v52, %v10353_v6  ;;  %9598 = vtanh.f32 %v11088_v51  ;;  %v8555_v51 = vld [vmem:[%s11755_s11] ss:$0 sm:$0xff] }
 0xa62   : > { %v9577_v56 = vpop.eup %9576  ;;  %7188 = vadd.xlane.f32.xlu1 %v7187_v47  ;;  %v7184_v15 = vsel %vm1953_vm2, %v11379_v11, 0.0 }
 0xa63   : > { %v9579_v29 = vpop.eup %9578  ;;  %7185 = vadd.xlane.f32.xlu0 %v7184_v15  ;;  %v11386_v42 = vmul.f32 %v9577_v56, %v10528_v49  ;;  %v4473_v3 = vmul.f32 %v4436_v30, %v4424_v0 }
 0xa64   : > { %v11389_v37 = vmul.f32 %v9579_v29, %v10528_v49  ;;  %v9581_v35 = vpop.eup %9580  ;;  %v11872_v29 = vld [vmem:[#allocation46_spill] sm:$0xff] }
 0xa65   : > { %v7193_v45 = vsel %vm1953_vm2, %v11386_v42, 0.0  ;;  %v9583_v41 = vpop.eup %9582  ;;  %v4444_v13 = vrot.slane %v9581_v35, %v10353_v6  ;;  %v1359_v30 = vadd.f32 %v11872_v29, %v11082_v21  ;;  %v7948_v29 = vld [vmem:[#allocation10 + $0x1e8] sm:$0xff] }
 0xa66   : > { %7194 = vadd.xlane.f32.xlu1 %v7193_v45  ;;  %v7190_v48 = vsel %vm1953_vm2, %v11389_v37, 0.0  ;;  %v4440_v19 = vrot.slane %v9583_v41, %v10353_v6  ;;  %v9937_v45 = vmov 6  }
 0xa67   : > { %v9585_v7 = vpop.eup %9584  ;;  %7191 = vadd.xlane.f32.xlu0 %v7190_v48  ;;  %v4475_v5 = vmul.f32 %v4444_v13, %v4424_v0  ;;  %9462 = vset.pattern.permute.xlu1 %v9937_v45 }
 0xa68   : > { %v11400_v12 = vmul.f32 %v9585_v7, %v10528_v49  ;;  %v9587_v22 = vpop.eup %9586  ;;  %v9649_v49 = vld [vmem:[%s11754_s10] ss:$0 sm:$0xff]  ;;  %v4474_v34 = vmul.f32 %v4440_v19, %v4424_v0 }
 0xa69   : > { %v9589_v20 = vpop.eup %9588  ;;  %v4452_v27 = vrot.slane %v9587_v22, %v10353_v6  ;;  %v2732_v26 = vadd.f32 %v9649_v49, %v11097_v36  ;;  %v2752_v47 = vadd.f32 %v9649_v49, %v11126_v4 }
 0xa6a   : > { %4481 = vadd.xlane.f32.xlu1 %v4473_v3  ;;  %v7196_v16 = vsel %vm1953_vm2, %v11400_v12, 0.0  ;;  %v9591_v63 = vpop.eup %9590  ;;  %v4448_v39 = vrot.slane %v9589_v20, %v10353_v6 }
 0xa6b   : > { %7197 = vadd.xlane.f32.xlu0 %v7196_v16  ;;  %v9593_v61 = vpop.eup %9592  ;;  %v4477_v9 = vmul.f32 %v4452_v27, %v4424_v0  ;;  %v4460_v58 = vrot.slane %v9591_v63, %v10353_v6  ;;  %v2762_v8 = vadd.f32 %v2732_v26, %v1335_v31 }
 0xa6c   : > { %v4476_v17 = vmul.f32 %v4448_v39, %v4424_v0  ;;  %v4456_v2 = vrot.slane %v9593_v61, %v10353_v6  ;;  %v9595_v32 = vpop.eup %9594 }
 0xa6d   : > { %v4479_v36 = vmul.f32 %v4460_v58, %v4424_v0  ;;  %9600 = vtanh.f32 %v2762_v8  ;;  %v4464_v24 = vrot.slane %v9595_v32, %v10353_v6  ;;  %v9597_v1 = vpop.eup %9596 }
 0xa6e   : > { %4485 = vadd.xlane.f32.xlu1 %v4475_v5  ;;  %v4478_v28 = vmul.f32 %v4456_v2, %v4424_v0  ;;  %9602 = vtanh.f32 %v11100_v46  ;;  %v2781_v56 = vmul.f32 %v9597_v1, %v8555_v51  ;;  %v9599_v15 = vpop.eup %9598  ;;  %v2766_v46 = vadd.f32 %v2752_v47, %v1359_v30 }
 0xa6f   : > { %4483 = vadd.xlane.f32.xlu0 %v4474_v34  ;;  %v4480_v52 = vmul.f32 %v4464_v24, %v4424_v0  ;;  %9604 = vtanh.f32 %v11113_v60  ;;  %v2782_v35 = vmul.f32 %v9599_v15, %v8555_v51  ;;  %v8566_v60 = vld [vmem:[%s11873_s13] ss:$0 sm:$0xff]  ;;  %v7949_v15 = vld [vmem:[#allocation10 + $0x1f0] sm:$0xff] }
 0xa70   : > { %9606 = vtanh.f32 %v11108_v38 }
 0xa71   : > { %9608 = vtanh.f32 %v2766_v46 }
 0xa72   : > { %4489 = vadd.xlane.f32.xlu1 %v4477_v9  ;;  %9610 = vtanh.f32 %v11116_v14 }
 0xa73   : > { %4487 = vadd.xlane.f32.xlu0 %v4476_v17 }
 0xa76   : > { %4493 = vadd.xlane.f32.xlu1 %v4479_v36 }
 0xa77   : > { %4491 = vadd.xlane.f32.xlu0 %v4478_v28 }
 0xa7a   : > { %v9601_v0 = vpop.eup %9600 }
 0xa7b   : > { %4495 = vadd.xlane.f32.xlu0 %v4480_v52  ;;  %v2783_v4 = vmul.f32 %v9601_v0, %v8555_v51  ;;  %v9603_v41 = vpop.eup %9602  ;;  %v9652_v52 = vld [vmem:[%s10211_s28 + $0x38] sm:$0xff] }
 0xa7c   : > { %v2784_v21 = vmul.f32 %v9603_v41, %v8555_v51  ;;  %v9605_v38 = vpop.eup %9604  ;;  %v7946_v0 = vld [vmem:[#allocation10 + $0x1d8] sm:$0xff] }
 0xa7d   : > { %v2785_v48 = vmul.f32 %v9605_v38, %v8555_v51  ;;  %v9607_v7 = vpop.eup %9606  ;;  %v7943_v38 = vld [vmem:[#allocation10 + $0x1c0] sm:$0xff] }
 0xa7e   : > { %v2786_v3 = vmul.f32 %v9607_v7, %v8555_v51  ;;  %v9609_v13 = vpop.eup %9608  ;;  %v7815_v7 = vld [vmem:[#allocation10 + $0x178] sm:$0xff] }
 0xa7f   : > { %2789 = vadd.xlane.f32.xlu0 %v2781_v56  ;;  %v2787_v22 = vmul.f32 %v9609_v13, %v8555_v51  ;;  %v9611_v19 = vpop.eup %9610  ;;  %v7942_v13 = vld [vmem:[#allocation10 + $0x1b8] sm:$0xff] }
 0xa80   : > { %v2788_v20 = vmul.f32 %v9611_v19, %v8555_v51  ;;  %v7950_v51 = vld [vmem:[#allocation10 + $0x1f8] sm:$0xff]  ;;  %v7941_v19 = vld [vmem:[#allocation10 + $0x1b0] sm:$0xff] }
 0xa83   : > { %2791 = vadd.xlane.f32.xlu0 %v2782_v35 }
 0xa87   : > { %2793 = vadd.xlane.f32.xlu0 %v2783_v4  ;;  %4504 = vbcast.lane.b32.xlu1 %v8566_v60, 256  ;;  %v7945_v4 = vld [vmem:[#allocation10 + $0x1d0] sm:$0xff] }
 0xa8b   : > { %2795 = vadd.xlane.f32.xlu0 %v2784_v21  ;;  %8191 = vperm.xlu1 %9462, %v8566_v60   ;;  %v7944_v21 = vld [vmem:[#allocation10 + $0x1c8] sm:$0xff] }
 0xa8f   : > { %2797 = vadd.xlane.f32.xlu0 %v2785_v48  ;;  %9463 = vset.pattern.permute.xlu1 %v11856_v44 }
 0xa93   : > { %2799 = vadd.xlane.f32.xlu0 %v2786_v3  ;;  %v7814_v3 = vld [vmem:[#allocation10 + $0x170] sm:$0xff] }
 0xa97   : > { %2801 = vadd.xlane.f32.xlu0 %v2787_v22  ;;  %v7813_v22 = vld [vmem:[#allocation10 + $0x168] sm:$0xff] }
 0xa9b   : > { %2803 = vadd.xlane.f32.xlu0 %v2788_v20  ;;  %v7812_v20 = vld [vmem:[#allocation10 + $0x160] sm:$0xff] }
 0xab1   : > { %2812 = vperm.xlu0 %9460, %v8566_v60  }
 0xae3   : > { %v7177_v16 = vpop.xlane.xlu1 %7176 }
 0xae4   : > { %9612 = vrcp.f32 %v7177_v16  ;;  %v7940_v16 = vld [vmem:[#allocation10 + $0x1a8] sm:$0xff] }
 0xae7   : > { %v7183_v14 = vpop.xlane.xlu1 %7182 }
 0xae8   : > { %9614 = vrcp.f32 %v7183_v14  ;;  %v7180_v5 = vpop.xlane.xlu0 %7179  ;;  %v7811_v14 = vld [vmem:[#allocation10 + $0x158] sm:$0xff] }
 0xae9   : > { %9616 = vrcp.f32 %v7180_v5  ;;  %v7939_v5 = vld [vmem:[#allocation10 + $0x1a0] sm:$0xff] }
 0xaeb   : > { %v7189_v27 = vpop.xlane.xlu1 %7188 }
 0xaec   : > { %9618 = vrcp.f32 %v7189_v27  ;;  %v7186_v63 = vpop.xlane.xlu0 %7185  ;;  %v7810_v27 = vld [vmem:[#allocation10 + $0x150] sm:$0xff] }
 0xaed   : > { %9620 = vrcp.f32 %v7186_v63  ;;  %v7938_v63 = vld [vmem:[#allocation10 + $0x198] sm:$0xff] }
 0xaef   : > { %v7195_v44 = vpop.xlane.xlu1 %7194 }
 0xaf0   : > { %9622 = vrcp.f32 %v7195_v44  ;;  %v7192_v49 = vpop.xlane.xlu0 %7191  ;;  %v7809_v44 = vld [vmem:[#allocation10 + $0x148] sm:$0xff] }
 0xaf1   : > { %v9613_v26 = vpop.eup %9612  ;;  %9624 = vrcp.f32 %v7192_v49  ;;  %v7937_v49 = vld [vmem:[#allocation10 + $0x190] sm:$0xff] }
 0xaf2   : > { %v7207_v34 = vmul.f32 %v9613_v26, %v11359_v25  ;;  %v7808_v26 = vld [vmem:[#allocation10 + $0x140] sm:$0xff] }
 0xaf3   : > { %v4482_v39 = vpop.xlane.xlu1 %4481 }
 0xaf4   : > { %v7198_v61 = vpop.xlane.xlu0 %7197  ;;  %9241 = vmatmul.mubr.msk.f32.vlgmr.msra.gmra.mxu1 %vm1953_vm2, %v7207_v34  ;;  %v7936_v34 = vld [vmem:[#allocation10 + $0x188] sm:$0xff] }
 0xaf5   : > { %v9615_v54 = vpop.eup %9614  ;;  %9626 = vrcp.f32 %v7198_v61  ;;  %9249 = vmatpush3.msra.mxu1 %v11229_v10  ;;  %9250 = vmatprep.mubr.msk.f32.mxu1 %vm9934_vm0, %v11839_v33  ;;  %v9650_v10 = vld [vmem:[%s10211_s28 + $0x18] sm:$0xff]  ;;  %v7935_v61 = vld [vmem:[#allocation10 + $0x180] sm:$0xff] }
 0xaf6   : > { %v9617_v31 = vpop.eup %9616  ;;  %v7209_v9 = vmul.f32 %v9615_v54, %v11365_v43  ;;  %9258 = vmatprep.subr.mxu1 %v11839_v33  ;;  %v7806_v54 = vld [vmem:[#allocation10 + $0x130] sm:$0xff] }
 0xaf7   : > { %v4486_v58 = vpop.xlane.xlu1 %4485  ;;  %v7208_v25 = vmul.f32 %v9617_v31, %v11368_v23  ;;  %v7805_v31 = vld [vmem:[#allocation10 + $0x128] sm:$0xff] }
 0xaf8   : > { %9251 = vmatmul.mubr.msk.f32.vlgmr.msra.gmra.mxu1 %vm1953_vm2, %v7209_v9  ;;  %v4484_v36 = vpop.xlane.xlu0 %4483  ;;  %v7804_v9 = vld [vmem:[#allocation10 + $0x120] sm:$0xff] }
 0xaf9   : > { %v9619_v8 = vpop.eup %9618  ;;  %9246 = vmatmul.mubr.msk.f32.vlgmr.msra.gmra.mxu0 %vm1953_vm2, %v7208_v25  ;;  %9259 = vmatpush3.msra.mxu1 %v11238_v40  ;;  %v7802_v25 = vld [vmem:[#allocation10 + $0x110] sm:$0xff] }
 0xafa   : > { %v9621_v17 = vpop.eup %9620  ;;  %9260 = vmatprep.mubr.msk.f32.mxu1 %vm9934_vm0, %v11839_v33  ;;  %9254 = vmatpush3.msra.mxu0 %v9650_v10  ;;  %v7211_v43 = vmul.f32 %v9619_v8, %v11376_v53  ;;  %v9651_v53 = vld [vmem:[%s10211_s28 + $0x28] sm:$0xff]  ;;  %v7800_v8 = vld [vmem:[#allocation10 + $0x100] sm:$0xff]  ;;  %s11625_s28 = scalar_lea.sflag [#allocation13], %s563_s26 }
 0xafb   : > { %v4490_v2 = vpop.xlane.xlu1 %4489  ;;  %9255 = vmatprep.mubr.msk.f32.mxu0 %vm9934_vm0, %v11839_v33  ;;  %v7210_v23 = vmul.f32 %v9621_v17, %v11379_v11  ;;  %9263 = vmatprep.subr.mxu0 %v11839_v33 }
 0xafc   : > { %9261 = vmatmul.mubr.msk.f32.vlgmr.msra.gmra.mxu1 %vm1953_vm2, %v7211_v43  ;;  %9268 = vmatprep.subr.mxu1 %v11839_v33  ;;  %v4488_v56 = vpop.xlane.xlu0 %4487 }
 0xafd   : > { %v9623_v40 = vpop.eup %9622  ;;  %9256 = vmatmul.mubr.msk.f32.vlgmr.msra.gmra.mxu0 %vm1953_vm2, %v7210_v23  ;;  %9269 = vmatpush3.msra.mxu1 %v11250_v18 }
 0xafe   : > { %v9625_v32 = vpop.eup %9624  ;;  %9270 = vmatprep.mubr.msk.f32.mxu1 %vm9934_vm0, %v11839_v33  ;;  %9264 = vmatpush3.msra.mxu0 %v9651_v53  ;;  %v7213_v11 = vmul.f32 %v9623_v40, %v11386_v42 }
 0xaff   : > { %v4494_v28 = vpop.xlane.xlu1 %4493  ;;  %9265 = vmatprep.mubr.msk.f32.mxu0 %vm9934_vm0, %v11839_v33  ;;  %v7212_v24 = vmul.f32 %v9625_v32, %v11389_v37  ;;  %9273 = vmatprep.subr.mxu0 %v11839_v33 }
 0xb00   : > { %9271 = vmatmul.mubr.msk.f32.vlgmr.msra.gmra.mxu1 %vm1953_vm2, %v7213_v11  ;;  %v4492_v35 = vpop.xlane.xlu0 %4491  ;;  %9278 = vmatprep.subr.mxu1 %v7815_v7 }
 0xb01   : > { %9266 = vmatmul.mubr.msk.f32.vlgmr.msra.gmra.mxu0 %vm1953_vm2, %v7212_v24  ;;  %9279 = vmatpush3.msra.mxu1 %v7815_v7 }
 0xb02   : > { %v9627_v18 = vpop.eup %9626  ;;  %9274 = vmatpush3.msra.mxu0 %v9652_v52  ;;  %9275 = vmatprep.mubr.msk.f32.mxu0 %vm9934_vm0, %v11839_v33 }
 0xb03   : > { %v11470_v42 = vpop.permute.xlu1 %4504  ;;  %9322 = vmatprep.subr.mxu0 %v11839_v33  ;;  %v7214_v1 = vmul.f32 %v9627_v18, %v11400_v12  ;;  %v7947_v12 = vld [vmem:[#allocation10 + $0x1e0] sm:$0xff]  ;;  %9280 = vmatprep.subr.mxu1 %v7814_v3 }
 0xb04   : > { %v4508_v37 = vadd.f32 %v11470_v42, %v4484_v36  ;;  %v4507_v47 = vadd.f32 %v11470_v42, %v4482_v39  ;;  %v4510_v30 = vadd.f32 %v11470_v42, %v4488_v56  ;;  %v4509_v46 = vadd.f32 %v11470_v42, %v4486_v58  ;;  %9281 = vmatpush3.msra.mxu1 %v7814_v3  ;;  %v7807_v39 = vld [vmem:[#allocation10 + $0x138] sm:$0xff] }
 0xb05   : > { %9276 = vmatmul.mubr.msk.f32.vlgmr.msra.gmra.mxu0 %vm1953_vm2, %v7214_v1  ;;  %v4512_v60 = vadd.f32 %v11470_v42, %v4492_v35  ;;  %v4511_v41 = vadd.f32 %v11470_v42, %v4490_v2  ;;  %v4513_v48 = vadd.f32 %v11470_v42, %v4494_v28  ;;  %9282 = vmatprep.subr.mxu1 %v7813_v22  ;;  %v7803_v58 = vld [vmem:[#allocation10 + $0x118] sm:$0xff]  ;;  %v8599_v35 = vld [vmem:[%s11754_s10 + $0x2] ss:$0 sm:$0xff] }
 0xb06   : > { %9323 = vmatpush3.msra.mxu0 %v7950_v51  ;;  %4527 = vperm.xlu1 %9463, %v4508_v37  }
 0xb07   : > { %9324 = vmatprep.subr.mxu0 %v11839_v33  ;;  %4524 = vperm.xlu0 %9460, %v4507_v47   ;;  %v8600_v47 = vld [vmem:[%s11754_s10 + $0x3] ss:$0 sm:$0xff] }
 0xb08   : > { %9325 = vmatpush3.msra.mxu0 %v7949_v15  ;;  %9354 = vmatprep.mubr.msk.f32.mxu0 %vm9934_vm0, %v11839_v33  ;;  %vm11881_vm0 = vcmask 1042434  }
 0xb09   : > { %9326 = vmatprep.subr.mxu0 %v11839_v33  ;;  %9283 = vmatpush3.msra.mxu1 %v7813_v22  ;;  %vm11883_vm3 = vmmov %vm11881_vm0 }
 0xb0a   : > { %9327 = vmatpush3.msra.mxu0 %v7948_v29  ;;  %4533 = vperm.xlu1 %9463, %v4510_v30   ;;  %vm11884_vm4 = vmmov %vm11881_vm0 }
 0xb0b   : > { %9328 = vmatprep.subr.mxu0 %v11839_v33  ;;  %4530 = vperm.xlu0 %9460, %v4509_v46  }
 0xb0c   : > { %9329 = vmatpush3.msra.mxu0 %v7947_v12  ;;  %9284 = vmatprep.subr.mxu1 %v7812_v20 }
 0xb0d   : > { %9330 = vmatprep.subr.mxu0 %v11839_v33  ;;  %9285 = vmatpush3.msra.mxu1 %v7812_v20 }
 0xb0e   : > { %9331 = vmatpush3.msra.mxu0 %v7946_v0  ;;  %4539 = vperm.xlu1 %9463, %v4512_v60  }
 0xb0f   : > { %9332 = vmatprep.subr.mxu0 %v11839_v33  ;;  %4536 = vperm.xlu0 %9460, %v4511_v41  }
 0xb10   : > { %9333 = vmatpush3.msra.mxu0 %v7945_v4  ;;  %9286 = vmatprep.subr.mxu1 %v7811_v14 }
 0xb11   : > { %9334 = vmatprep.subr.mxu0 %v11839_v33  ;;  %9287 = vmatpush3.msra.mxu1 %v7811_v14 }
 0xb12   : > { %9335 = vmatpush3.msra.mxu0 %v7944_v21  ;;  %9288 = vmatprep.subr.mxu1 %v7810_v27 }
 0xb13   : > { %9336 = vmatprep.subr.mxu0 %v11839_v33  ;;  %4542 = vperm.xlu0 %9460, %v4513_v48   ;;  %v11874_v48 = vld [vmem:[#allocation40_spill] sm:$0xff] }
 0xb14   : > { %9337 = vmatpush3.msra.mxu0 %v7943_v38  ;;  %9289 = vmatpush3.msra.mxu1 %v7810_v27 }
 0xb15   : > { %9338 = vmatprep.subr.mxu0 %v11839_v33  ;;  %9290 = vmatprep.subr.mxu1 %v7809_v44 }
 0xb16   : > { %9339 = vmatpush3.msra.mxu0 %v7942_v13  ;;  %9291 = vmatpush3.msra.mxu1 %v7809_v44 }
 0xb17   : > { %9340 = vmatprep.subr.mxu0 %v11839_v33  ;;  %9292 = vmatprep.subr.mxu1 %v7808_v26 }
 0xb18   : > { %9341 = vmatpush3.msra.mxu0 %v7941_v19  ;;  %9293 = vmatpush3.msra.mxu1 %v7808_v26 }
 0xb19   : > { %9342 = vmatprep.subr.mxu0 %v11839_v33  ;;  %9294 = vmatprep.subr.mxu1 %v7807_v39 }
 0xb1a   : > { %9343 = vmatpush3.msra.mxu0 %v7940_v16  ;;  %9295 = vmatpush3.msra.mxu1 %v7807_v39  ;;  %v11875_v16 = vld [vmem:[#allocation39_spill] sm:$0xff] }
 0xb1b   : > { %9344 = vmatprep.subr.mxu0 %v11839_v33  ;;  %9296 = vmatprep.subr.mxu1 %v7806_v54  ;;  %v11876_v39 = vld [vmem:[#allocation43_spill] sm:$0xff] }
 0xb1c   : > { %9345 = vmatpush3.msra.mxu0 %v7939_v5  ;;  %9297 = vmatpush3.msra.mxu1 %v7806_v54 }
 0xb1d   : > { %9346 = vmatprep.subr.mxu0 %v11839_v33  ;;  %9298 = vmatprep.subr.mxu1 %v7805_v31 }
 0xb1e   : > { %9347 = vmatpush3.msra.mxu0 %v7938_v63  ;;  %9299 = vmatpush3.msra.mxu1 %v7805_v31  ;;  %v8601_v31 = vld [vmem:[%s11755_s11 + $0x6] ss:$0 sm:$0xff] }
 0xb1f   : > { %9348 = vmatprep.subr.mxu0 %v11839_v33  ;;  %9300 = vmatprep.subr.mxu1 %v7804_v9 }
 0xb20   : > { %9349 = vmatpush3.msra.mxu0 %v7937_v49  ;;  %9301 = vmatpush3.msra.mxu1 %v7804_v9 }
 0xb21   : > { %9350 = vmatprep.subr.mxu0 %v11839_v33  ;;  %9302 = vmatprep.subr.mxu1 %v7803_v58 }
 0xb22   : > { %9351 = vmatpush3.msra.mxu0 %v7936_v34  ;;  %9303 = vmatpush3.msra.mxu1 %v7803_v58 }
 0xb23   : > { %9352 = vmatprep.subr.mxu0 %v11839_v33  ;;  %9304 = vmatprep.subr.mxu1 %v7802_v25  ;;  %v7801_v33 = vld [vmem:[#allocation10 + $0x108] sm:$0xff] }
 0xb24   : > { %9353 = vmatpush3.msra.mxu0 %v7935_v61  ;;  %9305 = vmatpush3.msra.mxu1 %v7802_v25 }
 0xb25   : > { %9355 = vmatmul.mubr.f32.vlgmr.msra.gmra.mxu0 %v11327_v50  ;;  %9306 = vmatprep.subr.mxu1 %v7801_v33 }
 0xb26   : > { %9307 = vmatpush3.msra.mxu1 %v7801_v33 }
 0xb27   : > { %9308 = vmatprep.subr.mxu1 %v7800_v8 }
 0xb28   : > { %9309 = vmatpush3.msra.mxu1 %v7800_v8 }
 0xbb4   : > { %v7284_v50 = vpop.f32.mrf.mxu1 }
 0xbb5   : > { %9310 = vmatprep.mubr.f32.mxu1 %v7284_v50  ;;  %v11877_v50 = vld [vmem:[#allocation42_spill] sm:$0xff] }
 0xbb6   : > { %v9242_v17 = vpop.f32.mrf.mxu1 }
 0xbb8   : > { %v7430_v10 = vpop.f32.mrf.mxu1 }
 0xbb9   : > { %v7357_v43 = vpop.f32.mrf.mxu0 }
 0xbba   : > { %9311 = vmatmul.mubr.f32.vlgmr.msra.gmra.mxu1 %v7357_v43  ;;  %v9252_v2 = vpop.f32.mrf.mxu1 }
 0xbbb   : > { %v9247_v23 = vpop.f32.mrf.mxu0  ;;  %9313 = vmatprep.mubr.f32.mxu1 %v7430_v10 }
 0xbbc   : > { %v7576_v40 = vpop.f32.mrf.mxu1 }
 0xbbd   : > { %v7503_v32 = vpop.f32.mrf.mxu0 }
 0xbbe   : > { %9314 = vmatmul.mubr.f32.gmra.mxu1 %v7503_v32  ;;  %v9262_v53 = vpop.f32.mrf.mxu1  ;;  %v11878_v32 = vld [vmem:[#allocation45_spill] sm:$0xff] }
 0xbbf   : > { %v9257_v11 = vpop.f32.mrf.mxu0  ;;  %9316 = vmatprep.mubr.f32.mxu1 %v7576_v40 }
 0xbc0   : > { %v7722_v36 = vpop.f32.mrf.mxu1 }
 0xbc1   : > { %v7649_v28 = vpop.f32.mrf.mxu0 }
 0xbc2   : > { %9317 = vmatmul.mubr.f32.gmra.mxu1 %v7649_v28  ;;  %v9272_v24 = vpop.f32.mrf.mxu1 }
 0xbc3   : > { %v9267_v18 = vpop.f32.mrf.mxu0  ;;  %9319 = vmatprep.mubr.f32.mxu1 %v7722_v36 }
 0xbc5   : > { %v7795_v52 = vpop.f32.mrf.mxu0 }
 0xbc6   : > { %9320 = vmatmul.mubr.f32.gmra.mxu1 %v7795_v52 }
 0xbc7   : > { %v9277_v1 = vpop.f32.mrf.mxu0 }
 0xbc8   : > { %v11879_v1 = vld [vmem:[#allocation44_spill] sm:$0xff] }
 0xbe5   : > { %v8045_v51 = vpop.f32.mrf.mxu0 }
 0xbe6   : > { %v8046_v56 = vadd.f32 %v8600_v47, %v8045_v51 }
 0xbe7   : > { %v9356_v37 = vpop.f32.mrf.mxu0 }
 0xbe8   : > { %v8057_v15 = vrot.slane %v8046_v56, %v10338_v57  ;;  %v8050_v29 = vcombine.high %v8046_v56, %v8046_v56 }
 0xbea   : > { %v8065_v30 = vcombine.high %v8057_v15, %v8057_v15  ;;  %v8064_v12 = vrot.slane %v8050_v29, %v10338_v57  ;;  %v8073_v0 = vrot.slane %v8057_v15, %v10338_v57 }
 0xbec   : > { %v8087_v46 = vrot.slane %v8065_v30, %v10338_v57  ;;  %v8066_v41 = vcombine.high %v8064_v12, %v8064_v12  ;;  %v8095_v22 = vcombine.high %v8073_v0, %v8073_v0  ;;  %v8102_v5 = vrot.slane %v8073_v0, %v10353_v6 }
 0xbed   : > { %v8080_v9 = vrot.slane %v8064_v12, %v10338_v57 }
 0xbee   : > { %v8097_v38 = vcombine.high %v8087_v46, %v8087_v46  ;;  %v8106_v3 = vrot.slane %v8087_v46, %v10353_v6  ;;  %v8094_v49 = vrot.slane %v8066_v41, %v10338_v57  ;;  %v8110_v58 = vrot.slane %v8095_v22, %v10353_v6 }
 0xbef   : > { %v8118_v57 = vrot.slane %v8080_v9, %v10353_v6  ;;  %v8096_v47 = vcombine.high %v8080_v9, %v8080_v9 }
 0xbf0   : > { %v8114_v63 = vrot.slane %v8097_v38, %v10353_v6  ;;  %v8122_v43 = vrot.slane %v8094_v49, %v10353_v6  ;;  %v8098_v36 = vcombine.high %v8094_v49, %v8094_v49 }
 0xbf2   : > { %v8130_v30 = vrot.slane %v8098_v36, %v10353_v6 }
 0xc7a   : > { %v9312_v60 = vpop.f32.mrf.mxu1 }
 0xc7b   : > { %v7893_v4 = vadd.f32 %v9312_v60, %v8599_v35 }
 0xc7c   : > { %v7887_v21 = vpop.f32.mrf.mxu1 }
 0xc7d   : > { %v7927_v7 = vadd.f32 %v7893_v4, %v11874_v48  ;;  %v7888_v13 = vadd.f32 %v8599_v35, %v7887_v21  ;;  %v11880_v4 = vld [vmem:[#allocation47_spill] sm:$0xff]  ;;  %v8126_v21 = vrot.slane %v8096_v47, %v10353_v6  ;;  %v4496_v6 = vpop.xlane.xlu0 %4495 }
 0xc7e   : > { %v9315_v19 = vpop.f32.mrf.mxu1 }
 0xc7f   : > { %v8140_v20 = vadd.f32 %v8106_v3, %v7927_v7  ;;  %v7926_v14 = vadd.f32 %v7888_v13, %v11875_v16  ;;  %v7903_v27 = vadd.f32 %v9315_v19, %v8599_v35  ;;  %v9653_v16 = vld [vmem:[%s10695_s27] sm:$0xff]  ;;  %s11567_s27 = sshll.u32 %s10207_s3, 3 }
 0xc80   : > { %v7897_v44 = vpop.f32.mrf.mxu1  ;;  %s645_s5 = scalar_lea.vmem [#allocation12], %s11567_s27  ;;  %s652_s16 = scalar_lea.vmem [#allocation14], %s11567_s27 }
 0xc81   : > { %v8148_v26 = vmax.f32 %v8140_v20, 0.0  ;;  %v8139_v34 = vadd.f32 %v8102_v5, %v7926_v14  ;;  %v7929_v61 = vadd.f32 %v7903_v27, %v11876_v39  ;;  %v7898_v54 = vadd.f32 %v8599_v35, %v7897_v44  ;;  %v2790_v5 = vpop.xlane.xlu0 %2789  ;;  %s8290_s7 = sshll.u32 %s645_s5, 4  ;;  %s11616_s13 = sshll.u32 %s652_s16, 4  ;;  %s11603_s7 = int_to_ptr.vmem [resolvable:$true] %s8290_s7  ;;  %s11655_s13 = int_to_ptr.vmem [resolvable:$true] %s11616_s13 }
 0xc82   : > { %v9318_v25 = vpop.f32.mrf.mxu1  ;;  %v4514_v14 = vadd.f32 %v11470_v42, %v4496_v6  ;;  %v11538_v42 = vsub.s32 %v10464_v59, %v10329_v55  ;;  %s9788_s14 = scalar_lea.vmem %s11603_s7, 128  ;;  %p9795_p12 = scmp.lt.s32.totalorder %s11603_s7, %s9793_s9 }
 0xc83   : > { %v8147_v33 = vmax.f32 %v8139_v34, 0.0  ;;  %v8142_v8 = vadd.f32 %v8114_v63, %v7929_v61  ;;  %v7928_v17 = vadd.f32 %v7898_v54, %v11877_v50  ;;  %v7913_v10 = vadd.f32 %v9318_v25, %v8599_v35  ;;  %p9789_p1 = scmp.ne.s32.totalorder %s11603_s7, %s9788_s14  ;;  %p9796_p4 = scmp.lt.s32.totalorder %s9794_s20, %s9788_s14 }
 0xc84   : > { %v7907_v2 = vpop.f32.mrf.mxu1  ;;  %v8161_v23 = vmul.f32 %v8601_v31, %v8148_v26 }
 0xc85   : > { %v8141_v40 = vadd.f32 %v8110_v58, %v7928_v17  ;;  %v7931_v53 = vadd.f32 %v7913_v10, %v11878_v32  ;;  %v7908_v11 = vadd.f32 %v8599_v35, %v7907_v2  ;;  %v8150_v28 = vmax.f32 %v8142_v8, 0.0  ;;  %v2792_v27 = vpop.xlane.xlu0 %2791  ;;  %p9790_p6 = pnand %p9789_p1, %p11888_p3  ;;  %p9797_p2 = por %p9796_p4, %p9795_p12 }
 0xc86   : > { %8170 = vadd.xlane.f32.xlu1 %v8161_v23  ;;  %v9321_v24 = vpop.f32.mrf.mxu1  ;;  %v8160_v18 = vmul.f32 %v8601_v31, %v8147_v33 }
 0xc87   : > { %v8144_v52 = vadd.f32 %v8122_v43, %v7931_v53  ;;  %v7930_v51 = vadd.f32 %v7908_v11, %v11879_v1  ;;  %v7923_v37 = vadd.f32 %v9321_v24, %v8599_v35  ;;  %v8149_v46 = vmax.f32 %v8141_v40, 0.0  ;;  %p9791_p9 = pneg %p9790_p6 }
 0xc88   : > { %8168 = vadd.xlane.f32.xlu0 %v8160_v18  ;;  %v7917_v56 = vpop.f32.mrf.mxu1  ;;  %v8163_v0 = vmul.f32 %v8601_v31, %v8150_v28 }
 0xc89   : > { %v8143_v15 = vadd.f32 %v8118_v57, %v7930_v51  ;;  %v7933_v29 = vadd.f32 %v7923_v37, %v10568_v62  ;;  %v7918_v12 = vadd.f32 %v8599_v35, %v7917_v56  ;;  %v8152_v7 = vmax.f32 %v8144_v52, 0.0  ;;  %v2794_v63 = vpop.xlane.xlu0 %2793  ;;  %p9798_p0 = pnand %p9797_p2, %p9791_p9 }
 0xc8a   : > { %v8162_v3 = vmul.f32 %v8601_v31, %v8149_v46 }
 0xc8b   : > { %v8146_v60 = vadd.f32 %v8130_v30, %v7933_v29  ;;  %v7932_v41 = vadd.f32 %v7918_v12, %v11880_v4  ;;  %v8151_v62 = vmax.f32 %v8143_v15, 0.0  ;;  %v8165_v19 = vmul.f32 %v8601_v31, %v8152_v7 }
 0xc8c   : > { %8174 = vadd.xlane.f32.xlu0 %v8163_v0 }
 0xc8d   : > { %v8154_v38 = vmax.f32 %v8146_v60, 0.0  ;;  %v8145_v48 = vadd.f32 %v8126_v21, %v7932_v41  ;;  %v8164_v20 = vmul.f32 %v8601_v31, %v8151_v62  ;;  %v2796_v44 = vpop.xlane.xlu0 %2795 }
 0xc8f   : > { %v8153_v13 = vmax.f32 %v8145_v48, 0.0  ;;  %v8167_v22 = vmul.f32 %v8601_v31, %v8154_v38 }
 0xc90   : > { %8172 = vadd.xlane.f32.xlu0 %v8162_v3 }
 0xc91   : > { %8182 = vadd.xlane.f32.xlu1 %v8167_v22  ;;  %v8166_v35 = vmul.f32 %v8601_v31, %v8153_v13  ;;  %v2798_v49 = vpop.xlane.xlu0 %2797  ;;  %v11534_v31 = vpop.permute.xlu1 %8191 }
 0xc94   : > { %8178 = vadd.xlane.f32.xlu0 %v8165_v19 }
 0xc95   : > { %8180 = vadd.xlane.f32.xlu1 %v8166_v35  ;;  %v2800_v26 = vpop.xlane.xlu0 %2799 }
 0xc98   : > { %8176 = vadd.xlane.f32.xlu0 %v8164_v20 }
 0xc99   : > { %v2802_v34 = vpop.xlane.xlu0 %2801 }
 0xc9d   : > { %v2804_v39 = vpop.xlane.xlu0 %2803 }
 0xca1   : > { %v2813_v61 = vpop.permute.xlu0 %2812 }
 0xca2   : > { %v2815_v58 = vadd.f32 %v2813_v61, %v2790_v5  ;;  %v2816_v25 = vadd.f32 %v2813_v61, %v2792_v27  ;;  %v2817_v8 = vadd.f32 %v2813_v61, %v2794_v63  ;;  %v2818_v23 = vadd.f32 %v2813_v61, %v2796_v44 }
 0xca3   : > { %v2819_v55 = vadd.f32 %v2813_v61, %v2798_v49  ;;  %v2820_v28 = vadd.f32 %v2813_v61, %v2800_v26  ;;  %v2821_v1 = vadd.f32 %v2813_v61, %v2802_v34  ;;  %v2822_v30 = vadd.f32 %v2813_v61, %v2804_v39 }
 0xca4   : > { %v2834_v50 = vrot.slane %v2815_v58, %v11538_v42  ;;  %v2838_v17 = vrot.slane %v2816_v25, %v11538_v42  ;;  %v2842_v2 = vrot.slane %v2817_v8, %v11538_v42  ;;  %v2846_v36 = vrot.slane %v2818_v23, %v11538_v42 }
 0xca5   : > { %v4525_v54 = vpop.permute.xlu0 %4524  ;;  %v2850_v18 = vrot.slane %v2819_v55, %v11538_v42  ;;  %v2854_v37 = vrot.slane %v2820_v28, %v11538_v42  ;;  %v2858_v0 = vrot.slane %v2821_v1, %v11538_v42  ;;  %v2862_v13 = vrot.slane %v2822_v30, %v11538_v42 }
 0xca6   : > { %893 = vperm.xlu1 %9463, %v9653_v16   ;;  %v2864_v40 = vsel %vm2863_vm12, %v2838_v17, %v2834_v50  ;;  %v4550_v4 = vrot.slane %v4525_v54, %v11538_v42 }
 0xca7   : > { %v2866_v53 = vsel %vm11881_vm0, %v2842_v2, %v2864_v40 }
 0xca8   : > { %v2868_v57 = vsel %vm2867_vm14, %v2846_v36, %v2866_v53 }
 0xca9   : > { %v4531_v9 = vpop.permute.xlu0 %4530  ;;  %v2870_v51 = vsel %vm2869_vm15, %v2850_v18, %v2868_v57 }
 0xcaa   : > { %v2872_v12 = vsel %vm2871_vm6, %v2854_v37, %v2870_v51  ;;  %v4558_v48 = vrot.slane %v4531_v9, %v11538_v42 }
 0xcab   : > { %v2874_v38 = vsel %vm2873_vm11, %v2858_v0, %v2872_v12 }
 0xcac   : > { %v2876_v19 = vsel %vm11882_vm1, %v2862_v13, %v2874_v38 }
 0xcad   : > { %v11540_v33 = vpop.permute.xlu0 %4536 }
 0xcae   : > { %4545 = vperm.xlu0 %9460, %v4514_v14   ;;  %v4566_v26 = vrot.slane %v11540_v33, %v11538_v42 }
 0xcb1   : > { %v11546_v43 = vpop.permute.xlu0 %4542 }
 0xcb2   : > { %9464 = vset.pattern.permute.xlu0 %v9937_v45  ;;  %v4528_v45 = vpop.permute.xlu1 %4527  ;;  %v4574_v17 = vrot.slane %v11546_v43, %v11538_v42 }
 0xcb3   : > { %v4554_v60 = vrot.slane %v4528_v45, %v11538_v42 }
 0xcb5   : > { %v4579_v35 = vsel %vm2863_vm12, %v4554_v60, %v4550_v4 }
 0xcb6   : > { %v11544_v10 = vpop.permute.xlu1 %4533  ;;  %v4580_v5 = vsel %vm11883_vm3, %v4558_v48, %v4579_v35 }
 0xcb7   : > { %v4562_v20 = vrot.slane %v11544_v10, %v11538_v42 }
 0xcb9   : > { %v4581_v45 = vsel %vm2867_vm14, %v4562_v20, %v4580_v5 }
 0xcba   : > { %v11551_v11 = vpop.permute.xlu1 %4539  ;;  %v4582_v50 = vsel %vm2869_vm15, %v4566_v26, %v4581_v45 }
 0xcbb   : > { %v4570_v25 = vrot.slane %v11551_v11, %v11538_v42 }
 0xd0f   : > { %v8171_v52 = vpop.xlane.xlu1 %8170 }
 0xd10   : > { %v8195_v46 = vadd.f32 %v11534_v31, %v8171_v52 }
 0xd11   : > { %v8169_v32 = vpop.xlane.xlu0 %8168 }
 0xd12   : > { %v8194_v47 = vadd.f32 %v11534_v31, %v8169_v32  ;;  %v8217_v22 = vrot.slane %v8195_v46, %v11538_v42 }
 0xd14   : > { %v8213_v41 = vrot.slane %v8194_v47, %v11538_v42 }
 0xd15   : > { %v8175_v24 = vpop.xlane.xlu0 %8174 }
 0xd16   : > { %v8197_v62 = vadd.f32 %v11534_v31, %v8175_v24  ;;  %v8242_v16 = vsel %vm2863_vm12, %v8217_v22, %v8213_v41 }
 0xd18   : > { %v8225_v34 = vrot.slane %v8197_v62, %v11538_v42 }
 0xd19   : > { %v8173_v56 = vpop.xlane.xlu0 %8172 }
 0xd1a   : > { %v8196_v15 = vadd.f32 %v11534_v31, %v8173_v56  ;;  %v8183_v29 = vpop.xlane.xlu1 %8182 }
 0xd1b   : > { %v8201_v39 = vadd.f32 %v11534_v31, %v8183_v29 }
 0xd1c   : > { %v8221_v7 = vrot.slane %v8196_v15, %v11538_v42 }
 0xd1d   : > { %v8179_v21 = vpop.xlane.xlu0 %8178  ;;  %v8241_v10 = vrot.slane %v8201_v39, %v11538_v42 }
 0xd1e   : > { %v8181_v3 = vpop.xlane.xlu1 %8180  ;;  %v8199_v6 = vadd.f32 %v11534_v31, %v8179_v21  ;;  %v8243_v27 = vsel %vm11884_vm4, %v8221_v7, %v8242_v16 }
 0xd1f   : > { %v8200_v63 = vadd.f32 %v11534_v31, %v8181_v3 }
 0xd20   : > { %v8233_v9 = vrot.slane %v8199_v6, %v11538_v42 }
 0xd21   : > { %v8177_v14 = vpop.xlane.xlu0 %8176  ;;  %v8237_v33 = vrot.slane %v8200_v63, %v11538_v42 }
 0xd22   : > { %v8198_v44 = vadd.f32 %v11534_v31, %v8177_v14  ;;  %v894_v49 = vpop.permute.xlu1 %893  ;;  %v8244_v31 = vsel %vm2867_vm14, %v8225_v34, %v8243_v27 }
 0xd23   : > { %vm895_vm5 = vcmp.ge.s32.totalorder %v10464_v59, %v894_v49 }
 0xd24   : > { %v8229_v61 = vrot.slane %v8198_v44, %v11538_v42  ;;  %v2878_v54 = vsel %vm895_vm5, -100.0, %v2876_v19 }
 0xd25   : > { %v2879_v58 = vsel %vm1953_vm2, %v2878_v54, 0.0 }
 0xd26   : > { %v8245_v8 = vsel %vm2869_vm15, %v8229_v61, %v8244_v31  ;;  %2880 = vst [vmem:[%s645_s5] sm:$0xff] %v2879_v58 }
 0xd27   : > { %v8246_v2 = vsel %vm2871_vm6, %v8233_v9, %v8245_v8 }
 0xd28   : > { %9801 = shalt.err (!%p9798_p0)
}
 0xd29   : > { %s9802_s22 = scalar_lea.hbm %s11601_s15, 128  ;;  %s9806_s5 = scalar_lea.hbm %s11886_s25, 256 }
 0xd2a   : > { %p9803_p7 = scmp.ne.s32.totalorder %s11601_s15, %s9802_s22  ;;  %p9807_p13 = scmp.lt.s32.totalorder %s11601_s15, %s11886_s25 }
 0xd2b   : > { %p9808_p5 = scmp.lt.s32.totalorder %s9806_s5, %s9802_s22 }
 0xd2c   : > { %p9804_p8 = pnand %p9803_p7, %p11888_p3 }
 0xd2d   : > { %p9809_p10 = por %p9808_p5, %p9807_p13 }
 0xd2e   : > { %p9805_p11 = pneg %p9804_p8 }
 0xd30   : > { %p9810_p1 = pnand %p9809_p10, %p9805_p11 }
 0xd32   : > { %9813 = shalt.err (!%p9810_p1)
}
 0xd33   : > { %9374 = dma.vmem_to_hbm [thread:$0]  (%p11888_p3), %s11603_s7, 128, %s11601_s15, %s11625_s28   ;;  %v8247_v43 = vsel %vm2873_vm11, %v8237_v33, %v8246_v2  ;;  %vm11889_vm7 = vmmov %vm11882_vm1  ;;  %v4546_v40 = vpop.permute.xlu0 %4545  ;;  %v4583_v32 = vsel %vm2871_vm6, %v4570_v25, %v4582_v50 }
 0xd34   : > { %v8248_v23 = vsel %vm11889_vm7, %v8241_v10, %v8247_v43  ;;  %s638_s18 = scalar_lea.vmem [#allocation11], %s11567_s27  ;;  %v4578_v53 = vrot.slane %v4546_v40, %v11538_v42  ;;  %s11890_s24 = sld [smem:[#allocation55_spill]]  ;;  %v4584_v11 = vsel %vm2873_vm11, %v4574_v17, %v4583_v32  ;;  %vm11891_vm8 = vmmov %vm11882_vm1 }
 0xd35   : > { %s8277_s14 = sshll.u32 %s638_s18, 4  ;;  %v8250_v55 = vsel %vm895_vm5, -100.0, %v8248_v23  ;;  %s11892_s26 = sld [smem:[#allocation53_spill]]  ;;  %s11677_s14 = int_to_ptr.vmem [resolvable:$true] %s8277_s14 }
 0xd36   : > { %v8251_v36 = vsel %vm1953_vm2, %v8250_v55, 0.0  ;;  %v4585_v28 = vsel %vm11891_vm8, %v4578_v53, %v4584_v11  ;;  %s9814_s5 = scalar_lea.vmem %s11655_s13, 128  ;;  %s9939_s17 = smov [#allocation14]  }
 0xd37   : > { %8252 = vst [vmem:[%s652_s16] sm:$0xff] %v8251_v36  ;;  %v4587_v59 = vsel %vm1953_vm2, %v4585_v28, 0.0  ;;  %p9815_p6 = scmp.ne.s32.totalorder %s11655_s13, %s9814_s5  ;;  %s9818_s23 = sshll.u32 %s9939_s17, 4  ;;  %s9819_s23 = int_to_ptr.vmem [resolvable:$false] %s9818_s23 }
 0xd38   : > { %s9820_s16 = scalar_lea.vmem %s9819_s23, 256  ;;  %p9821_p4 = scmp.lt.s32.totalorder %s11655_s13, %s9819_s23 }
 0xd39   : > { %p9816_p9 = pnand %p9815_p6, %p11888_p3  ;;  %p9822_p2 = scmp.lt.s32.totalorder %s9820_s16, %s9814_s5 }
 0xd3a   : > { %s11664_s9 = scalar_lea.hbm %s11890_s24, %s11582_s30 }
 0xd3b   : > { %s11675_s29 = scalar_lea.hbm %s11892_s26, %s11582_s30  ;;  %p9817_p12 = pneg %p9816_p9 }
 0xd3c   : > { %p9823_p0 = por %p9822_p2, %p9821_p4 }
 0xd3e   : > { %p9824_p7 = pnand %p9823_p0, %p9817_p12 }
 0xd40   : > { %9827 = shalt.err (!%p9824_p7)
}
 0xd41   : > { %s9828_s30 = scalar_lea.hbm %s11664_s9, 128  ;;  %s9832_s20 = scalar_lea.hbm %s11890_s24, 256 }
 0xd42   : > { %p9829_p8 = scmp.ne.s32.totalorder %s11664_s9, %s9828_s30  ;;  %p9833_p5 = scmp.lt.s32.totalorder %s11664_s9, %s11890_s24 }
 0xd43   : > { %p9834_p10 = scmp.lt.s32.totalorder %s9832_s20, %s9828_s30 }
 0xd44   : > { %p9830_p11 = pnand %p9829_p8, %p11888_p3 }
 0xd45   : > { %p9835_p1 = por %p9834_p10, %p9833_p5 }
 0xd46   : > { %p9831_p13 = pneg %p9830_p11 }
 0xd48   : > { %p9836_p6 = pnand %p9835_p1, %p9831_p13 }
 0xd4a   : > { %9839 = shalt.err (!%p9836_p6)
}
 0xd4b   : > { %9375 = dma.vmem_to_hbm [thread:$0]  (%p11888_p3), %s11655_s13, 128, %s11664_s9, %s11625_s28   ;;  %4588 = vst [vmem:[%s638_s18] sm:$0xff] %v4587_v59 }
 0xd4c   : > { %s8254_s5 = scalar_lea.sflag [#allocation4], %s10207_s3  ;;  %s9840_s23 = scalar_lea.vmem %s11677_s14, 128 }
 0xd4d   : > { %p9841_p9 = scmp.ne.s32.totalorder %s11677_s14, %s9840_s23  ;;  %s9940_s16 = smov [#allocation11]  }
 0xd4e   : > { %s9844_s30 = sshll.u32 %s9940_s16, 4  ;;  %s9845_s30 = int_to_ptr.vmem [resolvable:$false] %s9844_s30 }
 0xd4f   : > { %p9842_p12 = pnand %p9841_p9, %p11888_p3  ;;  %s9846_s7 = scalar_lea.vmem %s9845_s30, 256 }
 0xd50   : > { %p9847_p2 = scmp.lt.s32.totalorder %s11677_s14, %s9845_s30  ;;  %p9848_p0 = scmp.lt.s32.totalorder %s9846_s7, %s9840_s23 }
 0xd51   : > { %p9843_p4 = pneg %p9842_p12 }
 0xd52   : > { %p9849_p7 = por %p9848_p0, %p9847_p2 }
 0xd54   : > { %p9850_p8 = pnand %p9849_p7, %p9843_p4 }
 0xd56   : > { %9853 = shalt.err (!%p9850_p8)
}
 0xd57   : > { %s9854_s27 = scalar_lea.hbm %s11675_s29, 128  ;;  %s9858_s28 = scalar_lea.hbm %s11892_s26, 256 }
 0xd58   : > { %p9855_p11 = scmp.ne.s32.totalorder %s11675_s29, %s9854_s27  ;;  %p9859_p10 = scmp.lt.s32.totalorder %s11675_s29, %s11892_s26 }
 0xd59   : > { %p9860_p1 = scmp.lt.s32.totalorder %s9858_s28, %s9854_s27 }
 0xd5a   : > { %p9856_p13 = pnand %p9855_p11, %p11888_p3 }
 0xd5b   : > { %p9861_p6 = por %p9860_p1, %p9859_p10 }
 0xd5c   : > { %p9857_p5 = pneg %p9856_p13 }
 0xd5e   : > { %p9862_p9 = pnand %p9861_p6, %p9857_p5 }
 0xd60   : > { %9865 = shalt.err (!%p9862_p9)
}
 0xd61   : > { %9373 = dma.vmem_to_hbm [thread:$0]  (%p11888_p3), %s11677_s14, 128, %s11675_s29, %s8254_s5  }
 0xd62 PF: > { %s11893_s15 = sld [smem:[#allocation21_spill]]  ;;  %p11896_p4 = scmp.ge.s32.totalorder %s9920_s21, 2 }
 0xd63   : > { %s11894_s20 = sld [smem:[#allocation23_spill]] }
 0xd68   : > { %s8315_s22 = sand.u32 1, %s11893_s15  }
 0xd69   : > { %p11895_p12 = scmp.ne.s32.totalorder %s11894_s20, 0  ;;  %s8316_s17 = scalar_lea.sflag [#allocation4], %s8315_s22 }
 0xd6b   : > { %p9397_p2 = pnand %p11896_p4, %p11895_p12 }
 0xd6d   : > { %p9398_p0 = pneg %p9397_p2 }
 0xd6f   : > { %9899 = dma.done.wait (%p9398_p0), %s8316_s17, 128  }
 0xd70   : > { %9901 = vsyncadd (%p9398_p0), %s8316_s17, 4294967168  ;;  %s11897_s23 = sadd.s32 4294967294, %s9920_s21  }
 0xd71   : > { %s8324_s16 = sand.u32 1, %s11897_s23  }
 0xd72   : > { %s8325_s30 = scalar_lea.sflag [#allocation13], %s8324_s16 }
 0xd73   : > { %9903 = dma.done.wait (%p9398_p0), %s8325_s30, 256  }
 0xd74   : > { %9905 = vsyncadd (%p9398_p0), %s8325_s30, 4294967040  ;;  %s11898_s21 = sld [smem:[#allocation24_spill]]  ;;  %s11901_s18 = smov %s9912_s19 }
 0xd75   : > { %s11899_s12 = sld [smem:[#allocation22_spill]] }
 0xd76   : > { %s11900_s20 = sld [smem:[#allocation25_spill]] }
 0xd7a   : > { %p36_p3 = scmp.ge.s32.totalorder %s11898_s21, 4  }
 0xd7b   : > { %s11902_s19 = smov %s11899_s12 }
 0xd7c   :  { %38 = sbr.rel (!%p36_p3) target bundleno = 19 (0x13), region = 186 }
 0xd81   :  { %8339 = vsyncpa [#allocation3], 1 }
 0xd82   :  { %8341 = vsyncpa [#allocation3 + $0x1], 1 }
 0xd83   :  { %8342 = vsyncpa [#allocation6], 1 }
 0xd84   :  { %8344 = vsyncpa [#allocation6 + $0x1], 1 }
 0xd85   :  { %8345 = vsyncpa [#allocation9], 1 }
 0xd86   :  { %8346 = vsyncpa [#allocation4], 1 }
 0xd87   :  { %8348 = vsyncpa [#allocation4 + $0x1], 1 }
 0xd88   :  { %8349 = vsyncpa [#allocation13], 1 }
 0xd89   :  { %8351 = vsyncpa [#allocation13 + $0x1], 1 }

</bundles_post_ra>
